<compile_context>
chip_gen: v7x
topology: tpu7x:2x2x1
jax: 0.10.0
libtpu: 0.0.40
codegen_flags: <defaults>
</compile_context>

<pallas_src>
import jax
import jax.numpy as jnp
from jax.experimental import pallas as pl
from jax.experimental.pallas import tpu as pltpu

_LANES = 128
_TARGET_BLOCK_BYTES = 4 << 20   # ~4 MiB blocks: per-step overhead <~15% on v6e/v7x
_VMEM_LIMIT_BYTES = 32 << 20    # 2 bufs x (in + out) x 4 MiB = 16 MiB used; safe on all gens


def _identity_kernel(x_ref, o_ref):
    # Pure pass-through on the current VMEM tile.
    o_ref[...] = x_ref[...]


def _min_rows(dtype) -> int:
    # Packed-sublane minimum: 8 rows for 32-bit, 16 for bf16/f16, 32 for int8/fp8.
    itemsize = max(1, jnp.dtype(dtype).itemsize)  # guard sub-byte dtypes
    return 8 * max(1, 4 // itemsize)


def _copy_2d(x2d: jax.Array) -> jax.Array:
    """HBM->VMEM->HBM copy of a 2D array, blocked over the leading axis only."""
    rows, cols = x2d.shape
    itemsize = max(1, jnp.dtype(x2d.dtype).itemsize)
    mr = _min_rows(x2d.dtype)

    # Dtype-aware ~4 MiB block: rows a multiple of the packed sublane minimum.
    target_rows = max(mr, ((_TARGET_BLOCK_BYTES // max(1, cols * itemsize)) // mr) * mr)
    if rows <= target_rows:
        tile_rows = rows            # full-extent block: always a legal block shape
    else:
        tile_rows = target_rows     # multiple of 8 sublanes; tail block masked by Pallas
    grid = (pl.cdiv(rows, tile_rows),)

    return pl.pallas_call(
        _identity_kernel,
        out_shape=jax.ShapeDtypeStruct((rows, cols), x2d.dtype),
        grid=grid,
        in_specs=[pl.BlockSpec((tile_rows, cols), lambda i: (i, 0))],
        out_specs=pl.BlockSpec((tile_rows, cols), lambda i: (i, 0)),
        compiler_params=pltpu.CompilerParams(
            dimension_semantics=("parallel",),   # v7x: shard grid across both TCs
            vmem_limit_bytes=_VMEM_LIMIT_BYTES,
        ),
        cost_estimate=pl.CostEstimate(
            flops=0,
            transcendentals=0,
            bytes_accessed=2 * rows * cols * itemsize,
        ),
    )(x2d)


@jax.jit
def _instructor_copy_impl(x: jax.Array) -> jax.Array:
    """Materializing identity: Pallas copy at the 1R+1W HBM-traffic floor."""
    orig_shape = x.shape
    n = x.size
    if n == 0:
        return x
    if n % _LANES == 0:
        # Free contiguous reshape to a lane-dense (rows, 128) slab.
        x2d = x.reshape(n // _LANES, _LANES)
    else:
        # Full last dim as the lane axis (legal for any size); block leading rows only.
        last = orig_shape[-1] if (x.ndim >= 1 and orig_shape[-1] > 0) else 1
        x2d = x.reshape(n // last, last)
    return _copy_2d(x2d).reshape(orig_shape)


def instructor_forward(x: jax.Array, materialize: bool = False) -> jax.Array:
    """Pallas equivalent of Instructor.forward (empty body).

    Default: zero-copy pass-through (0 bytes of HBM traffic, no kernel) — the
    optimal realization of a no-op forward.  `materialize=True` returns a
    freshly materialized copy via the Pallas identity kernel.
    """
    if not materialize:
        return x
    return _instructor_copy_impl(x)


if __name__ == "__main__":
    key = jax.random.PRNGKey(0)

    # Primary example input (small NCHW-style tensor): empty forward body ->
    # zero-copy pass-through is the fastest correct implementation.
    x = jax.random.normal(key, (2, 4, 16, 16), dtype=jnp.float32)
    y = instructor_forward(x)
    jax.block_until_ready(y)
    assert y.shape == x.shape and y.dtype == x.dtype
    assert bool(jnp.array_equal(y, x))

    # Exercise the Pallas identity-copy kernel (materializing variant):
    # (a) lane-aligned, multi-block path (grid > 1, ~4 MiB blocks).
    xa = jax.random.normal(jax.random.PRNGKey(1), (16, 1024, 128), dtype=jnp.float32)
    ya = instructor_forward(xa, materialize=True)
    jax.block_until_ready(ya)
    assert ya.shape == xa.shape and ya.dtype == xa.dtype
    assert bool(jnp.array_equal(ya, xa))

    # (b) non-lane-aligned path (full-last-dim block, no pad/slice wrappers).
    xb = jax.random.normal(jax.random.PRNGKey(2), (3, 5, 7), dtype=jnp.float32)
    yb = instructor_forward(xb, materialize=True)
    jax.block_until_ready(yb)
    assert yb.shape == xb.shape and bool(jnp.array_equal(yb, xb))

    print("KERNEL_OK")
</pallas_src>

<mosaic_0001>
module attributes {stable_mosaic.version = 11 : i64} {
  func.func @_identity_kernel(%arg0: i32, %arg1: memref<8192x128xf32, #tpu.memory_space<vmem>>, %arg2: memref<8192x128xf32, #tpu.memory_space<vmem>>) attributes {dimension_semantics = [#tpu.dimension_semantics<parallel>], iteration_bounds = array<i64: 2>, scalar_prefetch = 0 : i64, scratch_operands = 0 : i64, tpu.core_type = #tpu.core_type<tc>, window_params = [{transform_indices = @transform_0, window_bounds = array<i64: 8192, 128>}, {transform_indices = @transform_1, window_bounds = array<i64: 8192, 128>}]} {
    %c0 = arith.constant 0 : index
    %c0_0 = arith.constant 0 : index
    %0 = vector.load %arg1[%c0, %c0_0] : memref<8192x128xf32, #tpu.memory_space<vmem>>, vector<8192x128xf32>
    %c0_1 = arith.constant 0 : index
    %c0_2 = arith.constant 0 : index
    %1 = vector.load %arg2[%c0_1, %c0_2] : memref<8192x128xf32, #tpu.memory_space<vmem>>, vector<8192x128xf32>
    tpu.vector_store %arg2[%c0_1, %c0_2], %0 {strides = array<i32>} : memref<8192x128xf32, #tpu.memory_space<vmem>>, vector<8192x128xf32>,
    return
  }
  func.func @transform_0(%arg0: i32) -> (i32, i32) {
    %c0_i32 = arith.constant 0 : i32
    %c0_i32_0 = arith.constant 0 : i32
    return %arg0, %c0_i32 : i32, i32
  }
  func.func @transform_1(%arg0: i32) -> (i32, i32) {
    %c0_i32 = arith.constant 0 : i32
    %c0_i32_0 = arith.constant 0 : i32
    return %arg0, %c0_i32 : i32, i32
  }
}

</mosaic_0001>

<bundles_post_ra>
// kernel: _instructor_copy_impl.1
= control target key start
LH: loop header
LB: loop body
LE: loop exit
PB: predicated region body
PF: predicated region fallthrough
CT: control target
= control target key end

     0   :  { %6 = vsyncpa [#allocation3], 0  ;;  %s4667_s0 = inlined_call_operand.hbm [shape: f32[16384,128], index: 0, kind: input, shape index: {}]   ;;  %s4668_s1 = inlined_call_operand.hbm [shape: f32[16384,128], index: 1, kind: output, shape index: {}]  }
   0x1   :  { %8 = vsyncpa [#allocation3 + $0x1], 0 }
   0x2   :  { %9 = vsyncpa [#allocation4], 0 }
   0x3   :  { %11 = vsyncpa [#allocation4 + $0x1], 0  ;;  %s2452_s6 = smov 0   ;;  %s2454_s7 = smov 0  }
   0x4   :  { %s2456_s8 = smov 0   ;;  %s2458_s9 = smov 0  }
   0x5 LB: > { %s2473_s10 = sadd.s32 4294967295, %s2434_s9   ;;  %s2272_s11 = sadd.s32 4294967294, %s2434_s9   ;;  %s2434_s9 = sphi %s2458_s9, %s4681_s9   ;;  %s2430_s8 = sphi %s2456_s8, %s4680_s8   ;;  %s2426_s7 = sphi %s2454_s7, %s4679_s7   ;;  %s2422_s6 = sphi %s2452_s6, %s4678_s6  }
   0x6   : > { %s2477_s12 = sadd.s32 1, %s2434_s9   ;;  %s24_s13 = sadd.s32 1, %s2430_s8 }
   0x7   : > { %s21_s14 = ssub.s32 %s2434_s9, %s2477_s12  ;;  %p31_p0 = scmp.ne.s32.totalorder %s2430_s8, %s2426_s7 }
   0x8   : > { %p22_p1 = scmp.eq.s32.totalorder %s21_s14, 0  ;;  %p32_p2 = scmp.eq.s32.totalorder %s2434_s9, 0 }
   0x9   : > { %p37_p3 = scmp.ne.s32.totalorder %s2426_s7, %s2422_s6  ;;  %p38_p4 = scmp.eq.s32.totalorder %s2473_s10, 0 }
   0xa   : > { %s2489_s15 = scalar_select %p22_p1, %s2430_s8, %s24_s13  }
   0xb   : > { %p2491_p5 = por %p32_p2, %p31_p0  ;;  %p2495_p6 = por %p38_p4, %p37_p3 }
   0xc   : > { %p61_p7 = scmp.eq.s32.totalorder %s2473_s10, 1  ;;  %p67_p8 = scmp.eq.s32.totalorder %s2272_s11, 1 }
   0xd   : > { %p2300_p10 = scmp.lt.s32.totalorder %s2434_s9, 2  ;;  %s87_s20 = sand.u32 1, %s2430_s8  }
   0xe   : > { %p2502_p11 = por %p61_p7, %p31_p0  ;;  %p2506_p12 = por %p67_p8, %p37_p3 }
   0xf   : > { %s2286_s21 = sshll.u32 %s2434_s9, 17  ;;  %s2275_s22 = sshll.u32 %s87_s20, 13 }
  0x10   : > { %s4672_s18 = scalar_select %p2502_p11, 1, 0 }
  0x11   : > { %s4673_s19 = scalar_select %p2506_p12, 1, 0 }
  0x12   : > { %s2515_s25 = scalar_lea.hbm %s4667_s0, %s2286_s21  ;;  %s91_s26 = scalar_lea.vmem [#allocation2], %s2275_s22 }
  0x13   : > { %s98_s27 = sshll.u32 %s91_s26, 4  ;;  %p2519_p13 = pnand %p2300_p10, %p2491_p5  ;;  %s2523_s27 = int_to_ptr.vmem [resolvable:$true] %s98_s27 }
  0x14   : > { %s2525_s29 = scalar_lea.sflag [#allocation3], %s87_s20  ;;  %s2338_s30 = scalar_lea.hbm %s2515_s25, 131072 }
  0x15   : > { %p2339_p0 = scmp.ne.s32.totalorder %s2515_s25, %s2338_s30  ;;  %p2340_p1 = pneg %p2519_p13 }
  0x16   : > { %s2343_s4 = scalar_lea.hbm %s4667_s0, 262144  ;;  %p2344_p4 = scmp.lt.u32.totalorder %s2515_s25, %s4667_s0 }
  0x17   : > { %p2341_p2 = pnand %p2340_p1, %p2339_p0  ;;  %p2345_p5 = scmp.lt.u32.totalorder %s2343_s4, %s2338_s30 }
  0x18   : > { %p2347_p8 = scmp.lt.u32.totalorder %s2338_s30, %s2515_s25 }
  0x19   : > { %p2342_p3 = pneg %p2341_p2  ;;  %p2346_p7 = por %p2345_p5, %p2344_p4 }
  0x1b   : > { %p2348_p10 = por %p2347_p8, %p2346_p7 }
  0x1d   : > { %p2349_p9 = pnand %p2348_p10, %p2342_p3 }
  0x1f   : > { %2352 = shalt.err (!%p2349_p9)
}
  0x20   : > { %s2353_s13 = scalar_lea.vmem %s2523_s27, 131072  ;;  %s2436_s14 = smov [#allocation2]  }
  0x21   : > { %p2354_p0 = scmp.ne.s32.totalorder %s2523_s27, %s2353_s13  ;;  %s2358_s16 = sshll.u32 %s2436_s14, 4  ;;  %s2359_s16 = int_to_ptr.vmem [resolvable:$false] %s2358_s16 }
  0x22   : > { %s2360_s20 = scalar_lea.vmem %s2359_s16, 262144  ;;  %p2361_p11 = scmp.lt.s32.totalorder %s2523_s27, %s2359_s16 }
  0x23   : > { %p2356_p2 = pnand %p2354_p0, %p2340_p1  ;;  %p2362_p4 = scmp.lt.s32.totalorder %s2360_s20, %s2353_s13 }
  0x25   : > { %p2357_p12 = pneg %p2356_p2  ;;  %p2363_p5 = por %p2362_p4, %p2361_p11 }
  0x27   : > { %p2364_p7 = pnand %p2363_p5, %p2357_p12 }
  0x29   : > { %2367 = shalt.err (!%p2364_p7)
}
  0x2a   : > { %s2437_s21 = smov 128   ;;  %s2438_s22 = smov 8  }
  0x2b   : > { %2295 = dma.hbm_to_vmem [thread:$0]  (!%p2519_p13), %s2515_s25, 131072, %s2523_s27, %s2525_s29, %s2437_s21, %s2437_s21, %s2438_s22  }
  0x2c   : > { %p2278_p9 = scmp.ge.s32.totalorder %s2434_s9, 1  ;;  %p106_p1 = scmp.lt.s32.totalorder %s2434_s9, 3 }
  0x2e   : > { %p107_p3 = pnand %p2278_p9, %p106_p1 }
  0x2f   : > { %s2556_s23 = sand.u32 (!%p107_p3), 1, %s2426_s7  }
  0x30   : > { %110 = sbr.rel (%p107_p3) target bundleno = 583 (0x247), region = 24  ;;  %s2279_s24 = sshll.u32 (!%p107_p3), %s2556_s23, 13 }
  0x31   : > { %s113_s26 = scalar_lea.sflag (!%p107_p3), [#allocation3], %s2556_s23  ;;  %s2560_s30 = scalar_lea.vmem (!%p107_p3), [#allocation2], %s2279_s24 }
  0x37   : > { %2413 = dma.done.wait (%p2495_p6), %s113_s26, 131072  }
  0x38   : > { %2415 = vsyncadd (%p2495_p6), %s113_s26, 4294836224  ;;  %v137_v0 = vld [vmem:[%s2560_s30] sm:$0xff]  ;;  %v138_v1 = vld [vmem:[%s2560_s30 + $0x8] sm:$0xff]  ;;  %s2569_s25 = scalar_lea.vmem [#allocation5], %s2279_s24  ;;  %s2287_s17 = sshll.u32 %s2473_s10, 17 }
  0x39   : > { %v139_v2 = vld [vmem:[%s2560_s30 + $0x10] sm:$0xff]  ;;  %1161 = vst [vmem:[%s2569_s25] sm:$0xff] %v137_v0  ;;  %1162 = vst [vmem:[%s2569_s25 + $0x8] sm:$0xff] %v138_v1  ;;  %v140_v3 = vld [vmem:[%s2560_s30 + $0x18] sm:$0xff]  ;;  %s2199_s27 = sshll.u32 %s2569_s25, 4  ;;  %s4610_s29 = scalar_lea.hbm %s4668_s1, %s2287_s17  ;;  %s4612_s27 = int_to_ptr.vmem [resolvable:$true] %s2199_s27 }
  0x3a   : > { %1163 = vst [vmem:[%s2569_s25 + $0x10] sm:$0xff] %v139_v2  ;;  %v141_v4 = vld [vmem:[%s2560_s30 + $0x20] sm:$0xff]  ;;  %v142_v5 = vld [vmem:[%s2560_s30 + $0x28] sm:$0xff]  ;;  %1164 = vst [vmem:[%s2569_s25 + $0x18] sm:$0xff] %v140_v3  ;;  %s2186_s2 = scalar_lea.sflag [#allocation4], %s2556_s23  ;;  %s2368_s3 = scalar_lea.vmem %s4612_s27, 131072 }
  0x3b   : > { %1165 = vst [vmem:[%s2569_s25 + $0x20] sm:$0xff] %v141_v4  ;;  %1166 = vst [vmem:[%s2569_s25 + $0x28] sm:$0xff] %v142_v5  ;;  %v143_v6 = vld [vmem:[%s2560_s30 + $0x30] sm:$0xff]  ;;  %v144_v7 = vld [vmem:[%s2560_s30 + $0x38] sm:$0xff]  ;;  %p2369_p6 = scmp.ne.s32.totalorder %s4612_s27, %s2368_s3  ;;  %p4675_p11 = scmp.ne.s32.totalorder %s4672_s18, 0 }
  0x3c   : > { %v145_v8 = vld [vmem:[%s2560_s30 + $0x40] sm:$0xff]  ;;  %1167 = vst [vmem:[%s2569_s25 + $0x30] sm:$0xff] %v143_v6  ;;  %1168 = vst [vmem:[%s2569_s25 + $0x38] sm:$0xff] %v144_v7  ;;  %v146_v9 = vld [vmem:[%s2560_s30 + $0x48] sm:$0xff]  ;;  %s2439_s4 = smov [#allocation5]  }
  0x3d   : > { %1169 = vst [vmem:[%s2569_s25 + $0x40] sm:$0xff] %v145_v8  ;;  %v147_v10 = vld [vmem:[%s2560_s30 + $0x50] sm:$0xff]  ;;  %v148_v11 = vld [vmem:[%s2560_s30 + $0x58] sm:$0xff]  ;;  %1170 = vst [vmem:[%s2569_s25 + $0x48] sm:$0xff] %v146_v9  ;;  %p2370_p12 = pnand %p2369_p6, %p4675_p11  ;;  %s2372_s5 = sshll.u32 %s2439_s4, 4  ;;  %s2373_s5 = int_to_ptr.vmem [resolvable:$false] %s2372_s5 }
  0x3e   : > { %1171 = vst [vmem:[%s2569_s25 + $0x50] sm:$0xff] %v147_v10  ;;  %1172 = vst [vmem:[%s2569_s25 + $0x58] sm:$0xff] %v148_v11  ;;  %v149_v12 = vld [vmem:[%s2560_s30 + $0x60] sm:$0xff]  ;;  %v150_v13 = vld [vmem:[%s2560_s30 + $0x68] sm:$0xff]  ;;  %s2374_s11 = scalar_lea.vmem %s2373_s5, 262144  ;;  %p2375_p8 = scmp.lt.s32.totalorder %s4612_s27, %s2373_s5 }
  0x3f   : > { %v151_v14 = vld [vmem:[%s2560_s30 + $0x70] sm:$0xff]  ;;  %1173 = vst [vmem:[%s2569_s25 + $0x60] sm:$0xff] %v149_v12  ;;  %1174 = vst [vmem:[%s2569_s25 + $0x68] sm:$0xff] %v150_v13  ;;  %v152_v15 = vld [vmem:[%s2560_s30 + $0x78] sm:$0xff]  ;;  %p2371_p13 = pneg %p2370_p12  ;;  %p2376_p10 = scmp.lt.s32.totalorder %s2374_s11, %s2368_s3 }
  0x40   : > { %1175 = vst [vmem:[%s2569_s25 + $0x70] sm:$0xff] %v151_v14  ;;  %v153_v16 = vld [vmem:[%s2560_s30 + $0x80] sm:$0xff]  ;;  %v154_v17 = vld [vmem:[%s2560_s30 + $0x88] sm:$0xff]  ;;  %1176 = vst [vmem:[%s2569_s25 + $0x78] sm:$0xff] %v152_v15 }
  0x41   : > { %1177 = vst [vmem:[%s2569_s25 + $0x80] sm:$0xff] %v153_v16  ;;  %1178 = vst [vmem:[%s2569_s25 + $0x88] sm:$0xff] %v154_v17  ;;  %v155_v18 = vld [vmem:[%s2560_s30 + $0x90] sm:$0xff]  ;;  %v156_v19 = vld [vmem:[%s2560_s30 + $0x98] sm:$0xff]  ;;  %p2377_p0 = por %p2376_p10, %p2375_p8 }
  0x42   : > { %v157_v20 = vld [vmem:[%s2560_s30 + $0xa0] sm:$0xff]  ;;  %1179 = vst [vmem:[%s2569_s25 + $0x90] sm:$0xff] %v155_v18  ;;  %1180 = vst [vmem:[%s2569_s25 + $0x98] sm:$0xff] %v156_v19  ;;  %v158_v21 = vld [vmem:[%s2560_s30 + $0xa8] sm:$0xff] }
  0x43   : > { %1181 = vst [vmem:[%s2569_s25 + $0xa0] sm:$0xff] %v157_v20  ;;  %v159_v22 = vld [vmem:[%s2560_s30 + $0xb0] sm:$0xff]  ;;  %v160_v23 = vld [vmem:[%s2560_s30 + $0xb8] sm:$0xff]  ;;  %1182 = vst [vmem:[%s2569_s25 + $0xa8] sm:$0xff] %v158_v21  ;;  %p2378_p2 = pnand %p2377_p0, %p2371_p13 }
  0x44   : > { %1183 = vst [vmem:[%s2569_s25 + $0xb0] sm:$0xff] %v159_v22  ;;  %1184 = vst [vmem:[%s2569_s25 + $0xb8] sm:$0xff] %v160_v23  ;;  %v161_v24 = vld [vmem:[%s2560_s30 + $0xc0] sm:$0xff]  ;;  %v162_v25 = vld [vmem:[%s2560_s30 + $0xc8] sm:$0xff] }
  0x45   : > { %v163_v26 = vld [vmem:[%s2560_s30 + $0xd0] sm:$0xff]  ;;  %1185 = vst [vmem:[%s2569_s25 + $0xc0] sm:$0xff] %v161_v24  ;;  %1186 = vst [vmem:[%s2569_s25 + $0xc8] sm:$0xff] %v162_v25  ;;  %v164_v27 = vld [vmem:[%s2560_s30 + $0xd8] sm:$0xff] }
  0x46   : > { %1187 = vst [vmem:[%s2569_s25 + $0xd0] sm:$0xff] %v163_v26  ;;  %v165_v28 = vld [vmem:[%s2560_s30 + $0xe0] sm:$0xff]  ;;  %v166_v29 = vld [vmem:[%s2560_s30 + $0xe8] sm:$0xff]  ;;  %1188 = vst [vmem:[%s2569_s25 + $0xd8] sm:$0xff] %v164_v27 }
  0x47   : > { %1189 = vst [vmem:[%s2569_s25 + $0xe0] sm:$0xff] %v165_v28  ;;  %1190 = vst [vmem:[%s2569_s25 + $0xe8] sm:$0xff] %v166_v29  ;;  %v167_v30 = vld [vmem:[%s2560_s30 + $0xf0] sm:$0xff]  ;;  %v168_v31 = vld [vmem:[%s2560_s30 + $0xf8] sm:$0xff] }
  0x48   : > { %v169_v32 = vld [vmem:[%s2560_s30 + $0x100] sm:$0xff]  ;;  %1191 = vst [vmem:[%s2569_s25 + $0xf0] sm:$0xff] %v167_v30  ;;  %1192 = vst [vmem:[%s2569_s25 + $0xf8] sm:$0xff] %v168_v31  ;;  %v170_v33 = vld [vmem:[%s2560_s30 + $0x108] sm:$0xff] }
  0x49   : > { %1193 = vst [vmem:[%s2569_s25 + $0x100] sm:$0xff] %v169_v32  ;;  %v171_v34 = vld [vmem:[%s2560_s30 + $0x110] sm:$0xff]  ;;  %v172_v35 = vld [vmem:[%s2560_s30 + $0x118] sm:$0xff]  ;;  %1194 = vst [vmem:[%s2569_s25 + $0x108] sm:$0xff] %v170_v33 }
  0x4a   : > { %1195 = vst [vmem:[%s2569_s25 + $0x110] sm:$0xff] %v171_v34  ;;  %1196 = vst [vmem:[%s2569_s25 + $0x118] sm:$0xff] %v172_v35  ;;  %v173_v36 = vld [vmem:[%s2560_s30 + $0x120] sm:$0xff]  ;;  %v174_v37 = vld [vmem:[%s2560_s30 + $0x128] sm:$0xff] }
  0x4b   : > { %v175_v38 = vld [vmem:[%s2560_s30 + $0x130] sm:$0xff]  ;;  %1197 = vst [vmem:[%s2569_s25 + $0x120] sm:$0xff] %v173_v36  ;;  %1198 = vst [vmem:[%s2569_s25 + $0x128] sm:$0xff] %v174_v37  ;;  %v176_v39 = vld [vmem:[%s2560_s30 + $0x138] sm:$0xff] }
  0x4c   : > { %1199 = vst [vmem:[%s2569_s25 + $0x130] sm:$0xff] %v175_v38  ;;  %v177_v40 = vld [vmem:[%s2560_s30 + $0x140] sm:$0xff]  ;;  %v178_v41 = vld [vmem:[%s2560_s30 + $0x148] sm:$0xff]  ;;  %1200 = vst [vmem:[%s2569_s25 + $0x138] sm:$0xff] %v176_v39 }
  0x4d   : > { %1201 = vst [vmem:[%s2569_s25 + $0x140] sm:$0xff] %v177_v40  ;;  %1202 = vst [vmem:[%s2569_s25 + $0x148] sm:$0xff] %v178_v41  ;;  %v179_v42 = vld [vmem:[%s2560_s30 + $0x150] sm:$0xff]  ;;  %v180_v43 = vld [vmem:[%s2560_s30 + $0x158] sm:$0xff] }
  0x4e   : > { %v181_v44 = vld [vmem:[%s2560_s30 + $0x160] sm:$0xff]  ;;  %1203 = vst [vmem:[%s2569_s25 + $0x150] sm:$0xff] %v179_v42  ;;  %1204 = vst [vmem:[%s2569_s25 + $0x158] sm:$0xff] %v180_v43  ;;  %v182_v45 = vld [vmem:[%s2560_s30 + $0x168] sm:$0xff] }
  0x4f   : > { %1205 = vst [vmem:[%s2569_s25 + $0x160] sm:$0xff] %v181_v44  ;;  %v183_v46 = vld [vmem:[%s2560_s30 + $0x170] sm:$0xff]  ;;  %v184_v47 = vld [vmem:[%s2560_s30 + $0x178] sm:$0xff]  ;;  %1206 = vst [vmem:[%s2569_s25 + $0x168] sm:$0xff] %v182_v45 }
  0x50   : > { %1207 = vst [vmem:[%s2569_s25 + $0x170] sm:$0xff] %v183_v46  ;;  %1208 = vst [vmem:[%s2569_s25 + $0x178] sm:$0xff] %v184_v47  ;;  %v185_v48 = vld [vmem:[%s2560_s30 + $0x180] sm:$0xff]  ;;  %v186_v49 = vld [vmem:[%s2560_s30 + $0x188] sm:$0xff] }
  0x51   : > { %v187_v50 = vld [vmem:[%s2560_s30 + $0x190] sm:$0xff]  ;;  %1209 = vst [vmem:[%s2569_s25 + $0x180] sm:$0xff] %v185_v48  ;;  %1210 = vst [vmem:[%s2569_s25 + $0x188] sm:$0xff] %v186_v49  ;;  %v188_v51 = vld [vmem:[%s2560_s30 + $0x198] sm:$0xff] }
  0x52   : > { %1211 = vst [vmem:[%s2569_s25 + $0x190] sm:$0xff] %v187_v50  ;;  %v189_v52 = vld [vmem:[%s2560_s30 + $0x1a0] sm:$0xff]  ;;  %v190_v53 = vld [vmem:[%s2560_s30 + $0x1a8] sm:$0xff]  ;;  %1212 = vst [vmem:[%s2569_s25 + $0x198] sm:$0xff] %v188_v51 }
  0x53   : > { %1213 = vst [vmem:[%s2569_s25 + $0x1a0] sm:$0xff] %v189_v52  ;;  %1214 = vst [vmem:[%s2569_s25 + $0x1a8] sm:$0xff] %v190_v53  ;;  %v191_v54 = vld [vmem:[%s2560_s30 + $0x1b0] sm:$0xff]  ;;  %v192_v55 = vld [vmem:[%s2560_s30 + $0x1b8] sm:$0xff] }
  0x54   : > { %v193_v56 = vld [vmem:[%s2560_s30 + $0x1c0] sm:$0xff]  ;;  %1215 = vst [vmem:[%s2569_s25 + $0x1b0] sm:$0xff] %v191_v54  ;;  %1216 = vst [vmem:[%s2569_s25 + $0x1b8] sm:$0xff] %v192_v55  ;;  %v194_v57 = vld [vmem:[%s2560_s30 + $0x1c8] sm:$0xff] }
  0x55   : > { %1217 = vst [vmem:[%s2569_s25 + $0x1c0] sm:$0xff] %v193_v56  ;;  %v195_v58 = vld [vmem:[%s2560_s30 + $0x1d0] sm:$0xff]  ;;  %v196_v59 = vld [vmem:[%s2560_s30 + $0x1d8] sm:$0xff]  ;;  %1218 = vst [vmem:[%s2569_s25 + $0x1c8] sm:$0xff] %v194_v57 }
  0x56   : > { %1219 = vst [vmem:[%s2569_s25 + $0x1d0] sm:$0xff] %v195_v58  ;;  %1220 = vst [vmem:[%s2569_s25 + $0x1d8] sm:$0xff] %v196_v59  ;;  %v197_v60 = vld [vmem:[%s2560_s30 + $0x1e0] sm:$0xff]  ;;  %v198_v61 = vld [vmem:[%s2560_s30 + $0x1e8] sm:$0xff] }
  0x57   : > { %v199_v62 = vld [vmem:[%s2560_s30 + $0x1f0] sm:$0xff]  ;;  %1221 = vst [vmem:[%s2569_s25 + $0x1e0] sm:$0xff] %v197_v60  ;;  %1222 = vst [vmem:[%s2569_s25 + $0x1e8] sm:$0xff] %v198_v61  ;;  %v200_v63 = vld [vmem:[%s2560_s30 + $0x1f8] sm:$0xff] }
  0x58   : > { %1223 = vst [vmem:[%s2569_s25 + $0x1f0] sm:$0xff] %v199_v62  ;;  %v201_v0 = vld [vmem:[%s2560_s30 + $0x200] sm:$0xff]  ;;  %v202_v1 = vld [vmem:[%s2560_s30 + $0x208] sm:$0xff]  ;;  %1224 = vst [vmem:[%s2569_s25 + $0x1f8] sm:$0xff] %v200_v63 }
  0x59   : > { %1225 = vst [vmem:[%s2569_s25 + $0x200] sm:$0xff] %v201_v0  ;;  %1226 = vst [vmem:[%s2569_s25 + $0x208] sm:$0xff] %v202_v1  ;;  %v203_v2 = vld [vmem:[%s2560_s30 + $0x210] sm:$0xff]  ;;  %v204_v3 = vld [vmem:[%s2560_s30 + $0x218] sm:$0xff] }
  0x5a   : > { %v205_v4 = vld [vmem:[%s2560_s30 + $0x220] sm:$0xff]  ;;  %1227 = vst [vmem:[%s2569_s25 + $0x210] sm:$0xff] %v203_v2  ;;  %1228 = vst [vmem:[%s2569_s25 + $0x218] sm:$0xff] %v204_v3  ;;  %v206_v5 = vld [vmem:[%s2560_s30 + $0x228] sm:$0xff] }
  0x5b   : > { %1229 = vst [vmem:[%s2569_s25 + $0x220] sm:$0xff] %v205_v4  ;;  %v207_v6 = vld [vmem:[%s2560_s30 + $0x230] sm:$0xff]  ;;  %v208_v7 = vld [vmem:[%s2560_s30 + $0x238] sm:$0xff]  ;;  %1230 = vst [vmem:[%s2569_s25 + $0x228] sm:$0xff] %v206_v5 }
  0x5c   : > { %1231 = vst [vmem:[%s2569_s25 + $0x230] sm:$0xff] %v207_v6  ;;  %1232 = vst [vmem:[%s2569_s25 + $0x238] sm:$0xff] %v208_v7  ;;  %v209_v8 = vld [vmem:[%s2560_s30 + $0x240] sm:$0xff]  ;;  %v210_v9 = vld [vmem:[%s2560_s30 + $0x248] sm:$0xff] }
  0x5d   : > { %v211_v10 = vld [vmem:[%s2560_s30 + $0x250] sm:$0xff]  ;;  %1233 = vst [vmem:[%s2569_s25 + $0x240] sm:$0xff] %v209_v8  ;;  %1234 = vst [vmem:[%s2569_s25 + $0x248] sm:$0xff] %v210_v9  ;;  %v212_v11 = vld [vmem:[%s2560_s30 + $0x258] sm:$0xff] }
  0x5e   : > { %1235 = vst [vmem:[%s2569_s25 + $0x250] sm:$0xff] %v211_v10  ;;  %v213_v12 = vld [vmem:[%s2560_s30 + $0x260] sm:$0xff]  ;;  %v214_v13 = vld [vmem:[%s2560_s30 + $0x268] sm:$0xff]  ;;  %1236 = vst [vmem:[%s2569_s25 + $0x258] sm:$0xff] %v212_v11 }
  0x5f   : > { %1237 = vst [vmem:[%s2569_s25 + $0x260] sm:$0xff] %v213_v12  ;;  %1238 = vst [vmem:[%s2569_s25 + $0x268] sm:$0xff] %v214_v13  ;;  %v215_v14 = vld [vmem:[%s2560_s30 + $0x270] sm:$0xff]  ;;  %v216_v15 = vld [vmem:[%s2560_s30 + $0x278] sm:$0xff] }
  0x60   : > { %v217_v16 = vld [vmem:[%s2560_s30 + $0x280] sm:$0xff]  ;;  %1239 = vst [vmem:[%s2569_s25 + $0x270] sm:$0xff] %v215_v14  ;;  %1240 = vst [vmem:[%s2569_s25 + $0x278] sm:$0xff] %v216_v15  ;;  %v218_v17 = vld [vmem:[%s2560_s30 + $0x288] sm:$0xff] }
  0x61   : > { %1241 = vst [vmem:[%s2569_s25 + $0x280] sm:$0xff] %v217_v16  ;;  %v219_v18 = vld [vmem:[%s2560_s30 + $0x290] sm:$0xff]  ;;  %v220_v19 = vld [vmem:[%s2560_s30 + $0x298] sm:$0xff]  ;;  %1242 = vst [vmem:[%s2569_s25 + $0x288] sm:$0xff] %v218_v17 }
  0x62   : > { %1243 = vst [vmem:[%s2569_s25 + $0x290] sm:$0xff] %v219_v18  ;;  %1244 = vst [vmem:[%s2569_s25 + $0x298] sm:$0xff] %v220_v19  ;;  %v221_v20 = vld [vmem:[%s2560_s30 + $0x2a0] sm:$0xff]  ;;  %v222_v21 = vld [vmem:[%s2560_s30 + $0x2a8] sm:$0xff] }
  0x63   : > { %v223_v22 = vld [vmem:[%s2560_s30 + $0x2b0] sm:$0xff]  ;;  %1245 = vst [vmem:[%s2569_s25 + $0x2a0] sm:$0xff] %v221_v20  ;;  %1246 = vst [vmem:[%s2569_s25 + $0x2a8] sm:$0xff] %v222_v21  ;;  %v224_v23 = vld [vmem:[%s2560_s30 + $0x2b8] sm:$0xff] }
  0x64   : > { %1247 = vst [vmem:[%s2569_s25 + $0x2b0] sm:$0xff] %v223_v22  ;;  %v225_v24 = vld [vmem:[%s2560_s30 + $0x2c0] sm:$0xff]  ;;  %v226_v25 = vld [vmem:[%s2560_s30 + $0x2c8] sm:$0xff]  ;;  %1248 = vst [vmem:[%s2569_s25 + $0x2b8] sm:$0xff] %v224_v23 }
  0x65   : > { %1249 = vst [vmem:[%s2569_s25 + $0x2c0] sm:$0xff] %v225_v24  ;;  %1250 = vst [vmem:[%s2569_s25 + $0x2c8] sm:$0xff] %v226_v25  ;;  %v227_v26 = vld [vmem:[%s2560_s30 + $0x2d0] sm:$0xff]  ;;  %v228_v27 = vld [vmem:[%s2560_s30 + $0x2d8] sm:$0xff] }
  0x66   : > { %v229_v28 = vld [vmem:[%s2560_s30 + $0x2e0] sm:$0xff]  ;;  %1251 = vst [vmem:[%s2569_s25 + $0x2d0] sm:$0xff] %v227_v26  ;;  %1252 = vst [vmem:[%s2569_s25 + $0x2d8] sm:$0xff] %v228_v27  ;;  %v230_v29 = vld [vmem:[%s2560_s30 + $0x2e8] sm:$0xff] }
  0x67   : > { %1253 = vst [vmem:[%s2569_s25 + $0x2e0] sm:$0xff] %v229_v28  ;;  %v231_v30 = vld [vmem:[%s2560_s30 + $0x2f0] sm:$0xff]  ;;  %v232_v31 = vld [vmem:[%s2560_s30 + $0x2f8] sm:$0xff]  ;;  %1254 = vst [vmem:[%s2569_s25 + $0x2e8] sm:$0xff] %v230_v29 }
  0x68   : > { %1255 = vst [vmem:[%s2569_s25 + $0x2f0] sm:$0xff] %v231_v30  ;;  %1256 = vst [vmem:[%s2569_s25 + $0x2f8] sm:$0xff] %v232_v31  ;;  %v233_v32 = vld [vmem:[%s2560_s30 + $0x300] sm:$0xff]  ;;  %v234_v33 = vld [vmem:[%s2560_s30 + $0x308] sm:$0xff] }
  0x69   : > { %v235_v34 = vld [vmem:[%s2560_s30 + $0x310] sm:$0xff]  ;;  %1257 = vst [vmem:[%s2569_s25 + $0x300] sm:$0xff] %v233_v32  ;;  %1258 = vst [vmem:[%s2569_s25 + $0x308] sm:$0xff] %v234_v33  ;;  %v236_v35 = vld [vmem:[%s2560_s30 + $0x318] sm:$0xff] }
  0x6a   : > { %1259 = vst [vmem:[%s2569_s25 + $0x310] sm:$0xff] %v235_v34  ;;  %v237_v36 = vld [vmem:[%s2560_s30 + $0x320] sm:$0xff]  ;;  %v238_v37 = vld [vmem:[%s2560_s30 + $0x328] sm:$0xff]  ;;  %1260 = vst [vmem:[%s2569_s25 + $0x318] sm:$0xff] %v236_v35 }
  0x6b   : > { %1261 = vst [vmem:[%s2569_s25 + $0x320] sm:$0xff] %v237_v36  ;;  %1262 = vst [vmem:[%s2569_s25 + $0x328] sm:$0xff] %v238_v37  ;;  %v239_v38 = vld [vmem:[%s2560_s30 + $0x330] sm:$0xff]  ;;  %v240_v39 = vld [vmem:[%s2560_s30 + $0x338] sm:$0xff] }
  0x6c   : > { %v241_v40 = vld [vmem:[%s2560_s30 + $0x340] sm:$0xff]  ;;  %1263 = vst [vmem:[%s2569_s25 + $0x330] sm:$0xff] %v239_v38  ;;  %1264 = vst [vmem:[%s2569_s25 + $0x338] sm:$0xff] %v240_v39  ;;  %v242_v41 = vld [vmem:[%s2560_s30 + $0x348] sm:$0xff] }
  0x6d   : > { %1265 = vst [vmem:[%s2569_s25 + $0x340] sm:$0xff] %v241_v40  ;;  %v243_v42 = vld [vmem:[%s2560_s30 + $0x350] sm:$0xff]  ;;  %v244_v43 = vld [vmem:[%s2560_s30 + $0x358] sm:$0xff]  ;;  %1266 = vst [vmem:[%s2569_s25 + $0x348] sm:$0xff] %v242_v41 }
  0x6e   : > { %1267 = vst [vmem:[%s2569_s25 + $0x350] sm:$0xff] %v243_v42  ;;  %1268 = vst [vmem:[%s2569_s25 + $0x358] sm:$0xff] %v244_v43  ;;  %v245_v44 = vld [vmem:[%s2560_s30 + $0x360] sm:$0xff]  ;;  %v246_v45 = vld [vmem:[%s2560_s30 + $0x368] sm:$0xff] }
  0x6f   : > { %v247_v46 = vld [vmem:[%s2560_s30 + $0x370] sm:$0xff]  ;;  %1269 = vst [vmem:[%s2569_s25 + $0x360] sm:$0xff] %v245_v44  ;;  %1270 = vst [vmem:[%s2569_s25 + $0x368] sm:$0xff] %v246_v45  ;;  %v248_v47 = vld [vmem:[%s2560_s30 + $0x378] sm:$0xff] }
  0x70   : > { %1271 = vst [vmem:[%s2569_s25 + $0x370] sm:$0xff] %v247_v46  ;;  %v249_v48 = vld [vmem:[%s2560_s30 + $0x380] sm:$0xff]  ;;  %v250_v49 = vld [vmem:[%s2560_s30 + $0x388] sm:$0xff]  ;;  %1272 = vst [vmem:[%s2569_s25 + $0x378] sm:$0xff] %v248_v47 }
  0x71   : > { %1273 = vst [vmem:[%s2569_s25 + $0x380] sm:$0xff] %v249_v48  ;;  %1274 = vst [vmem:[%s2569_s25 + $0x388] sm:$0xff] %v250_v49  ;;  %v251_v50 = vld [vmem:[%s2560_s30 + $0x390] sm:$0xff]  ;;  %v252_v51 = vld [vmem:[%s2560_s30 + $0x398] sm:$0xff] }
  0x72   : > { %v253_v52 = vld [vmem:[%s2560_s30 + $0x3a0] sm:$0xff]  ;;  %1275 = vst [vmem:[%s2569_s25 + $0x390] sm:$0xff] %v251_v50  ;;  %1276 = vst [vmem:[%s2569_s25 + $0x398] sm:$0xff] %v252_v51  ;;  %v254_v53 = vld [vmem:[%s2560_s30 + $0x3a8] sm:$0xff] }
  0x73   : > { %1277 = vst [vmem:[%s2569_s25 + $0x3a0] sm:$0xff] %v253_v52  ;;  %v255_v54 = vld [vmem:[%s2560_s30 + $0x3b0] sm:$0xff]  ;;  %v256_v55 = vld [vmem:[%s2560_s30 + $0x3b8] sm:$0xff]  ;;  %1278 = vst [vmem:[%s2569_s25 + $0x3a8] sm:$0xff] %v254_v53 }
  0x74   : > { %1279 = vst [vmem:[%s2569_s25 + $0x3b0] sm:$0xff] %v255_v54  ;;  %1280 = vst [vmem:[%s2569_s25 + $0x3b8] sm:$0xff] %v256_v55  ;;  %v257_v56 = vld [vmem:[%s2560_s30 + $0x3c0] sm:$0xff]  ;;  %v258_v57 = vld [vmem:[%s2560_s30 + $0x3c8] sm:$0xff] }
  0x75   : > { %v259_v58 = vld [vmem:[%s2560_s30 + $0x3d0] sm:$0xff]  ;;  %1281 = vst [vmem:[%s2569_s25 + $0x3c0] sm:$0xff] %v257_v56  ;;  %1282 = vst [vmem:[%s2569_s25 + $0x3c8] sm:$0xff] %v258_v57  ;;  %v260_v59 = vld [vmem:[%s2560_s30 + $0x3d8] sm:$0xff] }
  0x76   : > { %1283 = vst [vmem:[%s2569_s25 + $0x3d0] sm:$0xff] %v259_v58  ;;  %v261_v60 = vld [vmem:[%s2560_s30 + $0x3e0] sm:$0xff]  ;;  %v262_v61 = vld [vmem:[%s2560_s30 + $0x3e8] sm:$0xff]  ;;  %1284 = vst [vmem:[%s2569_s25 + $0x3d8] sm:$0xff] %v260_v59 }
  0x77   : > { %1285 = vst [vmem:[%s2569_s25 + $0x3e0] sm:$0xff] %v261_v60  ;;  %1286 = vst [vmem:[%s2569_s25 + $0x3e8] sm:$0xff] %v262_v61  ;;  %v263_v62 = vld [vmem:[%s2560_s30 + $0x3f0] sm:$0xff]  ;;  %v264_v63 = vld [vmem:[%s2560_s30 + $0x3f8] sm:$0xff] }
  0x78   : > { %v265_v0 = vld [vmem:[%s2560_s30 + $0x400] sm:$0xff]  ;;  %1287 = vst [vmem:[%s2569_s25 + $0x3f0] sm:$0xff] %v263_v62  ;;  %1288 = vst [vmem:[%s2569_s25 + $0x3f8] sm:$0xff] %v264_v63  ;;  %v266_v1 = vld [vmem:[%s2560_s30 + $0x408] sm:$0xff] }
  0x79   : > { %1289 = vst [vmem:[%s2569_s25 + $0x400] sm:$0xff] %v265_v0  ;;  %v267_v2 = vld [vmem:[%s2560_s30 + $0x410] sm:$0xff]  ;;  %v268_v3 = vld [vmem:[%s2560_s30 + $0x418] sm:$0xff]  ;;  %1290 = vst [vmem:[%s2569_s25 + $0x408] sm:$0xff] %v266_v1 }
  0x7a   : > { %1291 = vst [vmem:[%s2569_s25 + $0x410] sm:$0xff] %v267_v2  ;;  %1292 = vst [vmem:[%s2569_s25 + $0x418] sm:$0xff] %v268_v3  ;;  %v269_v4 = vld [vmem:[%s2560_s30 + $0x420] sm:$0xff]  ;;  %v270_v5 = vld [vmem:[%s2560_s30 + $0x428] sm:$0xff] }
  0x7b   : > { %v271_v6 = vld [vmem:[%s2560_s30 + $0x430] sm:$0xff]  ;;  %1293 = vst [vmem:[%s2569_s25 + $0x420] sm:$0xff] %v269_v4  ;;  %1294 = vst [vmem:[%s2569_s25 + $0x428] sm:$0xff] %v270_v5  ;;  %v272_v7 = vld [vmem:[%s2560_s30 + $0x438] sm:$0xff] }
  0x7c   : > { %1295 = vst [vmem:[%s2569_s25 + $0x430] sm:$0xff] %v271_v6  ;;  %v273_v8 = vld [vmem:[%s2560_s30 + $0x440] sm:$0xff]  ;;  %v274_v9 = vld [vmem:[%s2560_s30 + $0x448] sm:$0xff]  ;;  %1296 = vst [vmem:[%s2569_s25 + $0x438] sm:$0xff] %v272_v7 }
  0x7d   : > { %1297 = vst [vmem:[%s2569_s25 + $0x440] sm:$0xff] %v273_v8  ;;  %1298 = vst [vmem:[%s2569_s25 + $0x448] sm:$0xff] %v274_v9  ;;  %v275_v10 = vld [vmem:[%s2560_s30 + $0x450] sm:$0xff]  ;;  %v276_v11 = vld [vmem:[%s2560_s30 + $0x458] sm:$0xff] }
  0x7e   : > { %v277_v12 = vld [vmem:[%s2560_s30 + $0x460] sm:$0xff]  ;;  %1299 = vst [vmem:[%s2569_s25 + $0x450] sm:$0xff] %v275_v10  ;;  %1300 = vst [vmem:[%s2569_s25 + $0x458] sm:$0xff] %v276_v11  ;;  %v278_v13 = vld [vmem:[%s2560_s30 + $0x468] sm:$0xff] }
  0x7f   : > { %1301 = vst [vmem:[%s2569_s25 + $0x460] sm:$0xff] %v277_v12  ;;  %v279_v14 = vld [vmem:[%s2560_s30 + $0x470] sm:$0xff]  ;;  %v280_v15 = vld [vmem:[%s2560_s30 + $0x478] sm:$0xff]  ;;  %1302 = vst [vmem:[%s2569_s25 + $0x468] sm:$0xff] %v278_v13 }
  0x80   : > { %1303 = vst [vmem:[%s2569_s25 + $0x470] sm:$0xff] %v279_v14  ;;  %1304 = vst [vmem:[%s2569_s25 + $0x478] sm:$0xff] %v280_v15  ;;  %v281_v16 = vld [vmem:[%s2560_s30 + $0x480] sm:$0xff]  ;;  %v282_v17 = vld [vmem:[%s2560_s30 + $0x488] sm:$0xff] }
  0x81   : > { %v283_v18 = vld [vmem:[%s2560_s30 + $0x490] sm:$0xff]  ;;  %1305 = vst [vmem:[%s2569_s25 + $0x480] sm:$0xff] %v281_v16  ;;  %1306 = vst [vmem:[%s2569_s25 + $0x488] sm:$0xff] %v282_v17  ;;  %v284_v19 = vld [vmem:[%s2560_s30 + $0x498] sm:$0xff] }
  0x82   : > { %1307 = vst [vmem:[%s2569_s25 + $0x490] sm:$0xff] %v283_v18  ;;  %v285_v20 = vld [vmem:[%s2560_s30 + $0x4a0] sm:$0xff]  ;;  %v286_v21 = vld [vmem:[%s2560_s30 + $0x4a8] sm:$0xff]  ;;  %1308 = vst [vmem:[%s2569_s25 + $0x498] sm:$0xff] %v284_v19 }
  0x83   : > { %1309 = vst [vmem:[%s2569_s25 + $0x4a0] sm:$0xff] %v285_v20  ;;  %1310 = vst [vmem:[%s2569_s25 + $0x4a8] sm:$0xff] %v286_v21  ;;  %v287_v22 = vld [vmem:[%s2560_s30 + $0x4b0] sm:$0xff]  ;;  %v288_v23 = vld [vmem:[%s2560_s30 + $0x4b8] sm:$0xff] }
  0x84   : > { %v289_v24 = vld [vmem:[%s2560_s30 + $0x4c0] sm:$0xff]  ;;  %1311 = vst [vmem:[%s2569_s25 + $0x4b0] sm:$0xff] %v287_v22  ;;  %1312 = vst [vmem:[%s2569_s25 + $0x4b8] sm:$0xff] %v288_v23  ;;  %v290_v25 = vld [vmem:[%s2560_s30 + $0x4c8] sm:$0xff] }
  0x85   : > { %1313 = vst [vmem:[%s2569_s25 + $0x4c0] sm:$0xff] %v289_v24  ;;  %v291_v26 = vld [vmem:[%s2560_s30 + $0x4d0] sm:$0xff]  ;;  %v292_v27 = vld [vmem:[%s2560_s30 + $0x4d8] sm:$0xff]  ;;  %1314 = vst [vmem:[%s2569_s25 + $0x4c8] sm:$0xff] %v290_v25 }
  0x86   : > { %1315 = vst [vmem:[%s2569_s25 + $0x4d0] sm:$0xff] %v291_v26  ;;  %1316 = vst [vmem:[%s2569_s25 + $0x4d8] sm:$0xff] %v292_v27  ;;  %v293_v28 = vld [vmem:[%s2560_s30 + $0x4e0] sm:$0xff]  ;;  %v294_v29 = vld [vmem:[%s2560_s30 + $0x4e8] sm:$0xff] }
  0x87   : > { %v295_v30 = vld [vmem:[%s2560_s30 + $0x4f0] sm:$0xff]  ;;  %1317 = vst [vmem:[%s2569_s25 + $0x4e0] sm:$0xff] %v293_v28  ;;  %1318 = vst [vmem:[%s2569_s25 + $0x4e8] sm:$0xff] %v294_v29  ;;  %v296_v31 = vld [vmem:[%s2560_s30 + $0x4f8] sm:$0xff] }
  0x88   : > { %1319 = vst [vmem:[%s2569_s25 + $0x4f0] sm:$0xff] %v295_v30  ;;  %v297_v32 = vld [vmem:[%s2560_s30 + $0x500] sm:$0xff]  ;;  %v298_v33 = vld [vmem:[%s2560_s30 + $0x508] sm:$0xff]  ;;  %1320 = vst [vmem:[%s2569_s25 + $0x4f8] sm:$0xff] %v296_v31 }
  0x89   : > { %1321 = vst [vmem:[%s2569_s25 + $0x500] sm:$0xff] %v297_v32  ;;  %1322 = vst [vmem:[%s2569_s25 + $0x508] sm:$0xff] %v298_v33  ;;  %v299_v34 = vld [vmem:[%s2560_s30 + $0x510] sm:$0xff]  ;;  %v300_v35 = vld [vmem:[%s2560_s30 + $0x518] sm:$0xff] }
  0x8a   : > { %v301_v36 = vld [vmem:[%s2560_s30 + $0x520] sm:$0xff]  ;;  %1323 = vst [vmem:[%s2569_s25 + $0x510] sm:$0xff] %v299_v34  ;;  %1324 = vst [vmem:[%s2569_s25 + $0x518] sm:$0xff] %v300_v35  ;;  %v302_v37 = vld [vmem:[%s2560_s30 + $0x528] sm:$0xff] }
  0x8b   : > { %1325 = vst [vmem:[%s2569_s25 + $0x520] sm:$0xff] %v301_v36  ;;  %v303_v38 = vld [vmem:[%s2560_s30 + $0x530] sm:$0xff]  ;;  %v304_v39 = vld [vmem:[%s2560_s30 + $0x538] sm:$0xff]  ;;  %1326 = vst [vmem:[%s2569_s25 + $0x528] sm:$0xff] %v302_v37 }
  0x8c   : > { %1327 = vst [vmem:[%s2569_s25 + $0x530] sm:$0xff] %v303_v38  ;;  %1328 = vst [vmem:[%s2569_s25 + $0x538] sm:$0xff] %v304_v39  ;;  %v305_v40 = vld [vmem:[%s2560_s30 + $0x540] sm:$0xff]  ;;  %v306_v41 = vld [vmem:[%s2560_s30 + $0x548] sm:$0xff] }
  0x8d   : > { %v307_v42 = vld [vmem:[%s2560_s30 + $0x550] sm:$0xff]  ;;  %1329 = vst [vmem:[%s2569_s25 + $0x540] sm:$0xff] %v305_v40  ;;  %1330 = vst [vmem:[%s2569_s25 + $0x548] sm:$0xff] %v306_v41  ;;  %v308_v43 = vld [vmem:[%s2560_s30 + $0x558] sm:$0xff] }
  0x8e   : > { %1331 = vst [vmem:[%s2569_s25 + $0x550] sm:$0xff] %v307_v42  ;;  %v309_v44 = vld [vmem:[%s2560_s30 + $0x560] sm:$0xff]  ;;  %v310_v45 = vld [vmem:[%s2560_s30 + $0x568] sm:$0xff]  ;;  %1332 = vst [vmem:[%s2569_s25 + $0x558] sm:$0xff] %v308_v43 }
  0x8f   : > { %1333 = vst [vmem:[%s2569_s25 + $0x560] sm:$0xff] %v309_v44  ;;  %1334 = vst [vmem:[%s2569_s25 + $0x568] sm:$0xff] %v310_v45  ;;  %v311_v46 = vld [vmem:[%s2560_s30 + $0x570] sm:$0xff]  ;;  %v312_v47 = vld [vmem:[%s2560_s30 + $0x578] sm:$0xff] }
  0x90   : > { %v313_v48 = vld [vmem:[%s2560_s30 + $0x580] sm:$0xff]  ;;  %1335 = vst [vmem:[%s2569_s25 + $0x570] sm:$0xff] %v311_v46  ;;  %1336 = vst [vmem:[%s2569_s25 + $0x578] sm:$0xff] %v312_v47  ;;  %v314_v49 = vld [vmem:[%s2560_s30 + $0x588] sm:$0xff] }
  0x91   : > { %1337 = vst [vmem:[%s2569_s25 + $0x580] sm:$0xff] %v313_v48  ;;  %v315_v50 = vld [vmem:[%s2560_s30 + $0x590] sm:$0xff]  ;;  %v316_v51 = vld [vmem:[%s2560_s30 + $0x598] sm:$0xff]  ;;  %1338 = vst [vmem:[%s2569_s25 + $0x588] sm:$0xff] %v314_v49 }
  0x92   : > { %1339 = vst [vmem:[%s2569_s25 + $0x590] sm:$0xff] %v315_v50  ;;  %1340 = vst [vmem:[%s2569_s25 + $0x598] sm:$0xff] %v316_v51  ;;  %v317_v52 = vld [vmem:[%s2560_s30 + $0x5a0] sm:$0xff]  ;;  %v318_v53 = vld [vmem:[%s2560_s30 + $0x5a8] sm:$0xff] }
  0x93   : > { %v319_v54 = vld [vmem:[%s2560_s30 + $0x5b0] sm:$0xff]  ;;  %1341 = vst [vmem:[%s2569_s25 + $0x5a0] sm:$0xff] %v317_v52  ;;  %1342 = vst [vmem:[%s2569_s25 + $0x5a8] sm:$0xff] %v318_v53  ;;  %v320_v55 = vld [vmem:[%s2560_s30 + $0x5b8] sm:$0xff] }
  0x94   : > { %1343 = vst [vmem:[%s2569_s25 + $0x5b0] sm:$0xff] %v319_v54  ;;  %v321_v56 = vld [vmem:[%s2560_s30 + $0x5c0] sm:$0xff]  ;;  %v322_v57 = vld [vmem:[%s2560_s30 + $0x5c8] sm:$0xff]  ;;  %1344 = vst [vmem:[%s2569_s25 + $0x5b8] sm:$0xff] %v320_v55 }
  0x95   : > { %1345 = vst [vmem:[%s2569_s25 + $0x5c0] sm:$0xff] %v321_v56  ;;  %1346 = vst [vmem:[%s2569_s25 + $0x5c8] sm:$0xff] %v322_v57  ;;  %v323_v58 = vld [vmem:[%s2560_s30 + $0x5d0] sm:$0xff]  ;;  %v324_v59 = vld [vmem:[%s2560_s30 + $0x5d8] sm:$0xff] }
  0x96   : > { %v325_v60 = vld [vmem:[%s2560_s30 + $0x5e0] sm:$0xff]  ;;  %1347 = vst [vmem:[%s2569_s25 + $0x5d0] sm:$0xff] %v323_v58  ;;  %1348 = vst [vmem:[%s2569_s25 + $0x5d8] sm:$0xff] %v324_v59  ;;  %v326_v61 = vld [vmem:[%s2560_s30 + $0x5e8] sm:$0xff] }
  0x97   : > { %1349 = vst [vmem:[%s2569_s25 + $0x5e0] sm:$0xff] %v325_v60  ;;  %v327_v62 = vld [vmem:[%s2560_s30 + $0x5f0] sm:$0xff]  ;;  %v328_v63 = vld [vmem:[%s2560_s30 + $0x5f8] sm:$0xff]  ;;  %1350 = vst [vmem:[%s2569_s25 + $0x5e8] sm:$0xff] %v326_v61 }
  0x98   : > { %1351 = vst [vmem:[%s2569_s25 + $0x5f0] sm:$0xff] %v327_v62  ;;  %1352 = vst [vmem:[%s2569_s25 + $0x5f8] sm:$0xff] %v328_v63  ;;  %v329_v0 = vld [vmem:[%s2560_s30 + $0x600] sm:$0xff]  ;;  %v330_v1 = vld [vmem:[%s2560_s30 + $0x608] sm:$0xff] }
  0x99   : > { %v331_v2 = vld [vmem:[%s2560_s30 + $0x610] sm:$0xff]  ;;  %1353 = vst [vmem:[%s2569_s25 + $0x600] sm:$0xff] %v329_v0  ;;  %1354 = vst [vmem:[%s2569_s25 + $0x608] sm:$0xff] %v330_v1  ;;  %v332_v3 = vld [vmem:[%s2560_s30 + $0x618] sm:$0xff] }
  0x9a   : > { %1355 = vst [vmem:[%s2569_s25 + $0x610] sm:$0xff] %v331_v2  ;;  %v333_v4 = vld [vmem:[%s2560_s30 + $0x620] sm:$0xff]  ;;  %v334_v5 = vld [vmem:[%s2560_s30 + $0x628] sm:$0xff]  ;;  %1356 = vst [vmem:[%s2569_s25 + $0x618] sm:$0xff] %v332_v3 }
  0x9b   : > { %1357 = vst [vmem:[%s2569_s25 + $0x620] sm:$0xff] %v333_v4  ;;  %1358 = vst [vmem:[%s2569_s25 + $0x628] sm:$0xff] %v334_v5  ;;  %v335_v6 = vld [vmem:[%s2560_s30 + $0x630] sm:$0xff]  ;;  %v336_v7 = vld [vmem:[%s2560_s30 + $0x638] sm:$0xff] }
  0x9c   : > { %v337_v8 = vld [vmem:[%s2560_s30 + $0x640] sm:$0xff]  ;;  %1359 = vst [vmem:[%s2569_s25 + $0x630] sm:$0xff] %v335_v6  ;;  %1360 = vst [vmem:[%s2569_s25 + $0x638] sm:$0xff] %v336_v7  ;;  %v338_v9 = vld [vmem:[%s2560_s30 + $0x648] sm:$0xff] }
  0x9d   : > { %1361 = vst [vmem:[%s2569_s25 + $0x640] sm:$0xff] %v337_v8  ;;  %v339_v10 = vld [vmem:[%s2560_s30 + $0x650] sm:$0xff]  ;;  %v340_v11 = vld [vmem:[%s2560_s30 + $0x658] sm:$0xff]  ;;  %1362 = vst [vmem:[%s2569_s25 + $0x648] sm:$0xff] %v338_v9 }
  0x9e   : > { %1363 = vst [vmem:[%s2569_s25 + $0x650] sm:$0xff] %v339_v10  ;;  %1364 = vst [vmem:[%s2569_s25 + $0x658] sm:$0xff] %v340_v11  ;;  %v341_v12 = vld [vmem:[%s2560_s30 + $0x660] sm:$0xff]  ;;  %v342_v13 = vld [vmem:[%s2560_s30 + $0x668] sm:$0xff] }
  0x9f   : > { %v343_v14 = vld [vmem:[%s2560_s30 + $0x670] sm:$0xff]  ;;  %1365 = vst [vmem:[%s2569_s25 + $0x660] sm:$0xff] %v341_v12  ;;  %1366 = vst [vmem:[%s2569_s25 + $0x668] sm:$0xff] %v342_v13  ;;  %v344_v15 = vld [vmem:[%s2560_s30 + $0x678] sm:$0xff] }
  0xa0   : > { %1367 = vst [vmem:[%s2569_s25 + $0x670] sm:$0xff] %v343_v14  ;;  %v345_v16 = vld [vmem:[%s2560_s30 + $0x680] sm:$0xff]  ;;  %v346_v17 = vld [vmem:[%s2560_s30 + $0x688] sm:$0xff]  ;;  %1368 = vst [vmem:[%s2569_s25 + $0x678] sm:$0xff] %v344_v15 }
  0xa1   : > { %1369 = vst [vmem:[%s2569_s25 + $0x680] sm:$0xff] %v345_v16  ;;  %1370 = vst [vmem:[%s2569_s25 + $0x688] sm:$0xff] %v346_v17  ;;  %v347_v18 = vld [vmem:[%s2560_s30 + $0x690] sm:$0xff]  ;;  %v348_v19 = vld [vmem:[%s2560_s30 + $0x698] sm:$0xff] }
  0xa2   : > { %v349_v20 = vld [vmem:[%s2560_s30 + $0x6a0] sm:$0xff]  ;;  %1371 = vst [vmem:[%s2569_s25 + $0x690] sm:$0xff] %v347_v18  ;;  %1372 = vst [vmem:[%s2569_s25 + $0x698] sm:$0xff] %v348_v19  ;;  %v350_v21 = vld [vmem:[%s2560_s30 + $0x6a8] sm:$0xff] }
  0xa3   : > { %1373 = vst [vmem:[%s2569_s25 + $0x6a0] sm:$0xff] %v349_v20  ;;  %v351_v22 = vld [vmem:[%s2560_s30 + $0x6b0] sm:$0xff]  ;;  %v352_v23 = vld [vmem:[%s2560_s30 + $0x6b8] sm:$0xff]  ;;  %1374 = vst [vmem:[%s2569_s25 + $0x6a8] sm:$0xff] %v350_v21 }
  0xa4   : > { %1375 = vst [vmem:[%s2569_s25 + $0x6b0] sm:$0xff] %v351_v22  ;;  %1376 = vst [vmem:[%s2569_s25 + $0x6b8] sm:$0xff] %v352_v23  ;;  %v353_v24 = vld [vmem:[%s2560_s30 + $0x6c0] sm:$0xff]  ;;  %v354_v25 = vld [vmem:[%s2560_s30 + $0x6c8] sm:$0xff] }
  0xa5   : > { %v355_v26 = vld [vmem:[%s2560_s30 + $0x6d0] sm:$0xff]  ;;  %1377 = vst [vmem:[%s2569_s25 + $0x6c0] sm:$0xff] %v353_v24  ;;  %1378 = vst [vmem:[%s2569_s25 + $0x6c8] sm:$0xff] %v354_v25  ;;  %v356_v27 = vld [vmem:[%s2560_s30 + $0x6d8] sm:$0xff] }
  0xa6   : > { %1379 = vst [vmem:[%s2569_s25 + $0x6d0] sm:$0xff] %v355_v26  ;;  %v357_v28 = vld [vmem:[%s2560_s30 + $0x6e0] sm:$0xff]  ;;  %v358_v29 = vld [vmem:[%s2560_s30 + $0x6e8] sm:$0xff]  ;;  %1380 = vst [vmem:[%s2569_s25 + $0x6d8] sm:$0xff] %v356_v27 }
  0xa7   : > { %1381 = vst [vmem:[%s2569_s25 + $0x6e0] sm:$0xff] %v357_v28  ;;  %1382 = vst [vmem:[%s2569_s25 + $0x6e8] sm:$0xff] %v358_v29  ;;  %v359_v30 = vld [vmem:[%s2560_s30 + $0x6f0] sm:$0xff]  ;;  %v360_v31 = vld [vmem:[%s2560_s30 + $0x6f8] sm:$0xff] }
  0xa8   : > { %v361_v32 = vld [vmem:[%s2560_s30 + $0x700] sm:$0xff]  ;;  %1383 = vst [vmem:[%s2569_s25 + $0x6f0] sm:$0xff] %v359_v30  ;;  %1384 = vst [vmem:[%s2569_s25 + $0x6f8] sm:$0xff] %v360_v31  ;;  %v362_v33 = vld [vmem:[%s2560_s30 + $0x708] sm:$0xff] }
  0xa9   : > { %1385 = vst [vmem:[%s2569_s25 + $0x700] sm:$0xff] %v361_v32  ;;  %v363_v34 = vld [vmem:[%s2560_s30 + $0x710] sm:$0xff]  ;;  %v364_v35 = vld [vmem:[%s2560_s30 + $0x718] sm:$0xff]  ;;  %1386 = vst [vmem:[%s2569_s25 + $0x708] sm:$0xff] %v362_v33 }
  0xaa   : > { %1387 = vst [vmem:[%s2569_s25 + $0x710] sm:$0xff] %v363_v34  ;;  %1388 = vst [vmem:[%s2569_s25 + $0x718] sm:$0xff] %v364_v35  ;;  %v365_v36 = vld [vmem:[%s2560_s30 + $0x720] sm:$0xff]  ;;  %v366_v37 = vld [vmem:[%s2560_s30 + $0x728] sm:$0xff] }
  0xab   : > { %v367_v38 = vld [vmem:[%s2560_s30 + $0x730] sm:$0xff]  ;;  %1389 = vst [vmem:[%s2569_s25 + $0x720] sm:$0xff] %v365_v36  ;;  %1390 = vst [vmem:[%s2569_s25 + $0x728] sm:$0xff] %v366_v37  ;;  %v368_v39 = vld [vmem:[%s2560_s30 + $0x738] sm:$0xff] }
  0xac   : > { %1391 = vst [vmem:[%s2569_s25 + $0x730] sm:$0xff] %v367_v38  ;;  %v369_v40 = vld [vmem:[%s2560_s30 + $0x740] sm:$0xff]  ;;  %v370_v41 = vld [vmem:[%s2560_s30 + $0x748] sm:$0xff]  ;;  %1392 = vst [vmem:[%s2569_s25 + $0x738] sm:$0xff] %v368_v39 }
  0xad   : > { %1393 = vst [vmem:[%s2569_s25 + $0x740] sm:$0xff] %v369_v40  ;;  %1394 = vst [vmem:[%s2569_s25 + $0x748] sm:$0xff] %v370_v41  ;;  %v371_v42 = vld [vmem:[%s2560_s30 + $0x750] sm:$0xff]  ;;  %v372_v43 = vld [vmem:[%s2560_s30 + $0x758] sm:$0xff] }
  0xae   : > { %v373_v44 = vld [vmem:[%s2560_s30 + $0x760] sm:$0xff]  ;;  %1395 = vst [vmem:[%s2569_s25 + $0x750] sm:$0xff] %v371_v42  ;;  %1396 = vst [vmem:[%s2569_s25 + $0x758] sm:$0xff] %v372_v43  ;;  %v374_v45 = vld [vmem:[%s2560_s30 + $0x768] sm:$0xff] }
  0xaf   : > { %1397 = vst [vmem:[%s2569_s25 + $0x760] sm:$0xff] %v373_v44  ;;  %v375_v46 = vld [vmem:[%s2560_s30 + $0x770] sm:$0xff]  ;;  %v376_v47 = vld [vmem:[%s2560_s30 + $0x778] sm:$0xff]  ;;  %1398 = vst [vmem:[%s2569_s25 + $0x768] sm:$0xff] %v374_v45 }
  0xb0   : > { %1399 = vst [vmem:[%s2569_s25 + $0x770] sm:$0xff] %v375_v46  ;;  %1400 = vst [vmem:[%s2569_s25 + $0x778] sm:$0xff] %v376_v47  ;;  %v377_v48 = vld [vmem:[%s2560_s30 + $0x780] sm:$0xff]  ;;  %v378_v49 = vld [vmem:[%s2560_s30 + $0x788] sm:$0xff] }
  0xb1   : > { %v379_v50 = vld [vmem:[%s2560_s30 + $0x790] sm:$0xff]  ;;  %1401 = vst [vmem:[%s2569_s25 + $0x780] sm:$0xff] %v377_v48  ;;  %1402 = vst [vmem:[%s2569_s25 + $0x788] sm:$0xff] %v378_v49  ;;  %v380_v51 = vld [vmem:[%s2560_s30 + $0x798] sm:$0xff] }
  0xb2   : > { %1403 = vst [vmem:[%s2569_s25 + $0x790] sm:$0xff] %v379_v50  ;;  %v381_v52 = vld [vmem:[%s2560_s30 + $0x7a0] sm:$0xff]  ;;  %v382_v53 = vld [vmem:[%s2560_s30 + $0x7a8] sm:$0xff]  ;;  %1404 = vst [vmem:[%s2569_s25 + $0x798] sm:$0xff] %v380_v51 }
  0xb3   : > { %1405 = vst [vmem:[%s2569_s25 + $0x7a0] sm:$0xff] %v381_v52  ;;  %1406 = vst [vmem:[%s2569_s25 + $0x7a8] sm:$0xff] %v382_v53  ;;  %v383_v54 = vld [vmem:[%s2560_s30 + $0x7b0] sm:$0xff]  ;;  %v384_v55 = vld [vmem:[%s2560_s30 + $0x7b8] sm:$0xff] }
  0xb4   : > { %v385_v56 = vld [vmem:[%s2560_s30 + $0x7c0] sm:$0xff]  ;;  %1407 = vst [vmem:[%s2569_s25 + $0x7b0] sm:$0xff] %v383_v54  ;;  %1408 = vst [vmem:[%s2569_s25 + $0x7b8] sm:$0xff] %v384_v55  ;;  %v386_v57 = vld [vmem:[%s2560_s30 + $0x7c8] sm:$0xff] }
  0xb5   : > { %1409 = vst [vmem:[%s2569_s25 + $0x7c0] sm:$0xff] %v385_v56  ;;  %v387_v58 = vld [vmem:[%s2560_s30 + $0x7d0] sm:$0xff]  ;;  %v388_v59 = vld [vmem:[%s2560_s30 + $0x7d8] sm:$0xff]  ;;  %1410 = vst [vmem:[%s2569_s25 + $0x7c8] sm:$0xff] %v386_v57 }
  0xb6   : > { %1411 = vst [vmem:[%s2569_s25 + $0x7d0] sm:$0xff] %v387_v58  ;;  %1412 = vst [vmem:[%s2569_s25 + $0x7d8] sm:$0xff] %v388_v59  ;;  %v389_v60 = vld [vmem:[%s2560_s30 + $0x7e0] sm:$0xff]  ;;  %v390_v61 = vld [vmem:[%s2560_s30 + $0x7e8] sm:$0xff] }
  0xb7   : > { %v391_v62 = vld [vmem:[%s2560_s30 + $0x7f0] sm:$0xff]  ;;  %1413 = vst [vmem:[%s2569_s25 + $0x7e0] sm:$0xff] %v389_v60  ;;  %1414 = vst [vmem:[%s2569_s25 + $0x7e8] sm:$0xff] %v390_v61  ;;  %v392_v63 = vld [vmem:[%s2560_s30 + $0x7f8] sm:$0xff] }
  0xb8   : > { %1415 = vst [vmem:[%s2569_s25 + $0x7f0] sm:$0xff] %v391_v62  ;;  %v393_v0 = vld [vmem:[%s2560_s30 + $0x800] sm:$0xff]  ;;  %v394_v1 = vld [vmem:[%s2560_s30 + $0x808] sm:$0xff]  ;;  %1416 = vst [vmem:[%s2569_s25 + $0x7f8] sm:$0xff] %v392_v63 }
  0xb9   : > { %1417 = vst [vmem:[%s2569_s25 + $0x800] sm:$0xff] %v393_v0  ;;  %1418 = vst [vmem:[%s2569_s25 + $0x808] sm:$0xff] %v394_v1  ;;  %v395_v2 = vld [vmem:[%s2560_s30 + $0x810] sm:$0xff]  ;;  %v396_v3 = vld [vmem:[%s2560_s30 + $0x818] sm:$0xff] }
  0xba   : > { %v397_v4 = vld [vmem:[%s2560_s30 + $0x820] sm:$0xff]  ;;  %1419 = vst [vmem:[%s2569_s25 + $0x810] sm:$0xff] %v395_v2  ;;  %1420 = vst [vmem:[%s2569_s25 + $0x818] sm:$0xff] %v396_v3  ;;  %v398_v5 = vld [vmem:[%s2560_s30 + $0x828] sm:$0xff] }
  0xbb   : > { %1421 = vst [vmem:[%s2569_s25 + $0x820] sm:$0xff] %v397_v4  ;;  %v399_v6 = vld [vmem:[%s2560_s30 + $0x830] sm:$0xff]  ;;  %v400_v7 = vld [vmem:[%s2560_s30 + $0x838] sm:$0xff]  ;;  %1422 = vst [vmem:[%s2569_s25 + $0x828] sm:$0xff] %v398_v5 }
  0xbc   : > { %1423 = vst [vmem:[%s2569_s25 + $0x830] sm:$0xff] %v399_v6  ;;  %1424 = vst [vmem:[%s2569_s25 + $0x838] sm:$0xff] %v400_v7  ;;  %v401_v8 = vld [vmem:[%s2560_s30 + $0x840] sm:$0xff]  ;;  %v402_v9 = vld [vmem:[%s2560_s30 + $0x848] sm:$0xff] }
  0xbd   : > { %v403_v10 = vld [vmem:[%s2560_s30 + $0x850] sm:$0xff]  ;;  %1425 = vst [vmem:[%s2569_s25 + $0x840] sm:$0xff] %v401_v8  ;;  %1426 = vst [vmem:[%s2569_s25 + $0x848] sm:$0xff] %v402_v9  ;;  %v404_v11 = vld [vmem:[%s2560_s30 + $0x858] sm:$0xff] }
  0xbe   : > { %1427 = vst [vmem:[%s2569_s25 + $0x850] sm:$0xff] %v403_v10  ;;  %v405_v12 = vld [vmem:[%s2560_s30 + $0x860] sm:$0xff]  ;;  %v406_v13 = vld [vmem:[%s2560_s30 + $0x868] sm:$0xff]  ;;  %1428 = vst [vmem:[%s2569_s25 + $0x858] sm:$0xff] %v404_v11 }
  0xbf   : > { %1429 = vst [vmem:[%s2569_s25 + $0x860] sm:$0xff] %v405_v12  ;;  %1430 = vst [vmem:[%s2569_s25 + $0x868] sm:$0xff] %v406_v13  ;;  %v407_v14 = vld [vmem:[%s2560_s30 + $0x870] sm:$0xff]  ;;  %v408_v15 = vld [vmem:[%s2560_s30 + $0x878] sm:$0xff] }
  0xc0   : > { %v409_v16 = vld [vmem:[%s2560_s30 + $0x880] sm:$0xff]  ;;  %1431 = vst [vmem:[%s2569_s25 + $0x870] sm:$0xff] %v407_v14  ;;  %1432 = vst [vmem:[%s2569_s25 + $0x878] sm:$0xff] %v408_v15  ;;  %v410_v17 = vld [vmem:[%s2560_s30 + $0x888] sm:$0xff] }
  0xc1   : > { %1433 = vst [vmem:[%s2569_s25 + $0x880] sm:$0xff] %v409_v16  ;;  %v411_v18 = vld [vmem:[%s2560_s30 + $0x890] sm:$0xff]  ;;  %v412_v19 = vld [vmem:[%s2560_s30 + $0x898] sm:$0xff]  ;;  %1434 = vst [vmem:[%s2569_s25 + $0x888] sm:$0xff] %v410_v17 }
  0xc2   : > { %1435 = vst [vmem:[%s2569_s25 + $0x890] sm:$0xff] %v411_v18  ;;  %1436 = vst [vmem:[%s2569_s25 + $0x898] sm:$0xff] %v412_v19  ;;  %v413_v20 = vld [vmem:[%s2560_s30 + $0x8a0] sm:$0xff]  ;;  %v414_v21 = vld [vmem:[%s2560_s30 + $0x8a8] sm:$0xff] }
  0xc3   : > { %v415_v22 = vld [vmem:[%s2560_s30 + $0x8b0] sm:$0xff]  ;;  %1437 = vst [vmem:[%s2569_s25 + $0x8a0] sm:$0xff] %v413_v20  ;;  %1438 = vst [vmem:[%s2569_s25 + $0x8a8] sm:$0xff] %v414_v21  ;;  %v416_v23 = vld [vmem:[%s2560_s30 + $0x8b8] sm:$0xff] }
  0xc4   : > { %1439 = vst [vmem:[%s2569_s25 + $0x8b0] sm:$0xff] %v415_v22  ;;  %v417_v24 = vld [vmem:[%s2560_s30 + $0x8c0] sm:$0xff]  ;;  %v418_v25 = vld [vmem:[%s2560_s30 + $0x8c8] sm:$0xff]  ;;  %1440 = vst [vmem:[%s2569_s25 + $0x8b8] sm:$0xff] %v416_v23 }
  0xc5   : > { %1441 = vst [vmem:[%s2569_s25 + $0x8c0] sm:$0xff] %v417_v24  ;;  %1442 = vst [vmem:[%s2569_s25 + $0x8c8] sm:$0xff] %v418_v25  ;;  %v419_v26 = vld [vmem:[%s2560_s30 + $0x8d0] sm:$0xff]  ;;  %v420_v27 = vld [vmem:[%s2560_s30 + $0x8d8] sm:$0xff] }
  0xc6   : > { %v421_v28 = vld [vmem:[%s2560_s30 + $0x8e0] sm:$0xff]  ;;  %1443 = vst [vmem:[%s2569_s25 + $0x8d0] sm:$0xff] %v419_v26  ;;  %1444 = vst [vmem:[%s2569_s25 + $0x8d8] sm:$0xff] %v420_v27  ;;  %v422_v29 = vld [vmem:[%s2560_s30 + $0x8e8] sm:$0xff] }
  0xc7   : > { %1445 = vst [vmem:[%s2569_s25 + $0x8e0] sm:$0xff] %v421_v28  ;;  %v423_v30 = vld [vmem:[%s2560_s30 + $0x8f0] sm:$0xff]  ;;  %v424_v31 = vld [vmem:[%s2560_s30 + $0x8f8] sm:$0xff]  ;;  %1446 = vst [vmem:[%s2569_s25 + $0x8e8] sm:$0xff] %v422_v29 }
  0xc8   : > { %1447 = vst [vmem:[%s2569_s25 + $0x8f0] sm:$0xff] %v423_v30  ;;  %1448 = vst [vmem:[%s2569_s25 + $0x8f8] sm:$0xff] %v424_v31  ;;  %v425_v32 = vld [vmem:[%s2560_s30 + $0x900] sm:$0xff]  ;;  %v426_v33 = vld [vmem:[%s2560_s30 + $0x908] sm:$0xff] }
  0xc9   : > { %v427_v34 = vld [vmem:[%s2560_s30 + $0x910] sm:$0xff]  ;;  %1449 = vst [vmem:[%s2569_s25 + $0x900] sm:$0xff] %v425_v32  ;;  %1450 = vst [vmem:[%s2569_s25 + $0x908] sm:$0xff] %v426_v33  ;;  %v428_v35 = vld [vmem:[%s2560_s30 + $0x918] sm:$0xff] }
  0xca   : > { %1451 = vst [vmem:[%s2569_s25 + $0x910] sm:$0xff] %v427_v34  ;;  %v429_v36 = vld [vmem:[%s2560_s30 + $0x920] sm:$0xff]  ;;  %v430_v37 = vld [vmem:[%s2560_s30 + $0x928] sm:$0xff]  ;;  %1452 = vst [vmem:[%s2569_s25 + $0x918] sm:$0xff] %v428_v35 }
  0xcb   : > { %1453 = vst [vmem:[%s2569_s25 + $0x920] sm:$0xff] %v429_v36  ;;  %1454 = vst [vmem:[%s2569_s25 + $0x928] sm:$0xff] %v430_v37  ;;  %v431_v38 = vld [vmem:[%s2560_s30 + $0x930] sm:$0xff]  ;;  %v432_v39 = vld [vmem:[%s2560_s30 + $0x938] sm:$0xff] }
  0xcc   : > { %v433_v40 = vld [vmem:[%s2560_s30 + $0x940] sm:$0xff]  ;;  %1455 = vst [vmem:[%s2569_s25 + $0x930] sm:$0xff] %v431_v38  ;;  %1456 = vst [vmem:[%s2569_s25 + $0x938] sm:$0xff] %v432_v39  ;;  %v434_v41 = vld [vmem:[%s2560_s30 + $0x948] sm:$0xff] }
  0xcd   : > { %1457 = vst [vmem:[%s2569_s25 + $0x940] sm:$0xff] %v433_v40  ;;  %v435_v42 = vld [vmem:[%s2560_s30 + $0x950] sm:$0xff]  ;;  %v436_v43 = vld [vmem:[%s2560_s30 + $0x958] sm:$0xff]  ;;  %1458 = vst [vmem:[%s2569_s25 + $0x948] sm:$0xff] %v434_v41 }
  0xce   : > { %1459 = vst [vmem:[%s2569_s25 + $0x950] sm:$0xff] %v435_v42  ;;  %1460 = vst [vmem:[%s2569_s25 + $0x958] sm:$0xff] %v436_v43  ;;  %v437_v44 = vld [vmem:[%s2560_s30 + $0x960] sm:$0xff]  ;;  %v438_v45 = vld [vmem:[%s2560_s30 + $0x968] sm:$0xff] }
  0xcf   : > { %v439_v46 = vld [vmem:[%s2560_s30 + $0x970] sm:$0xff]  ;;  %1461 = vst [vmem:[%s2569_s25 + $0x960] sm:$0xff] %v437_v44  ;;  %1462 = vst [vmem:[%s2569_s25 + $0x968] sm:$0xff] %v438_v45  ;;  %v440_v47 = vld [vmem:[%s2560_s30 + $0x978] sm:$0xff] }
  0xd0   : > { %1463 = vst [vmem:[%s2569_s25 + $0x970] sm:$0xff] %v439_v46  ;;  %v441_v48 = vld [vmem:[%s2560_s30 + $0x980] sm:$0xff]  ;;  %v442_v49 = vld [vmem:[%s2560_s30 + $0x988] sm:$0xff]  ;;  %1464 = vst [vmem:[%s2569_s25 + $0x978] sm:$0xff] %v440_v47 }
  0xd1   : > { %1465 = vst [vmem:[%s2569_s25 + $0x980] sm:$0xff] %v441_v48  ;;  %1466 = vst [vmem:[%s2569_s25 + $0x988] sm:$0xff] %v442_v49  ;;  %v443_v50 = vld [vmem:[%s2560_s30 + $0x990] sm:$0xff]  ;;  %v444_v51 = vld [vmem:[%s2560_s30 + $0x998] sm:$0xff] }
  0xd2   : > { %v445_v52 = vld [vmem:[%s2560_s30 + $0x9a0] sm:$0xff]  ;;  %1467 = vst [vmem:[%s2569_s25 + $0x990] sm:$0xff] %v443_v50  ;;  %1468 = vst [vmem:[%s2569_s25 + $0x998] sm:$0xff] %v444_v51  ;;  %v446_v53 = vld [vmem:[%s2560_s30 + $0x9a8] sm:$0xff] }
  0xd3   : > { %1469 = vst [vmem:[%s2569_s25 + $0x9a0] sm:$0xff] %v445_v52  ;;  %v447_v54 = vld [vmem:[%s2560_s30 + $0x9b0] sm:$0xff]  ;;  %v448_v55 = vld [vmem:[%s2560_s30 + $0x9b8] sm:$0xff]  ;;  %1470 = vst [vmem:[%s2569_s25 + $0x9a8] sm:$0xff] %v446_v53 }
  0xd4   : > { %1471 = vst [vmem:[%s2569_s25 + $0x9b0] sm:$0xff] %v447_v54  ;;  %1472 = vst [vmem:[%s2569_s25 + $0x9b8] sm:$0xff] %v448_v55  ;;  %v449_v56 = vld [vmem:[%s2560_s30 + $0x9c0] sm:$0xff]  ;;  %v450_v57 = vld [vmem:[%s2560_s30 + $0x9c8] sm:$0xff] }
  0xd5   : > { %v451_v58 = vld [vmem:[%s2560_s30 + $0x9d0] sm:$0xff]  ;;  %1473 = vst [vmem:[%s2569_s25 + $0x9c0] sm:$0xff] %v449_v56  ;;  %1474 = vst [vmem:[%s2569_s25 + $0x9c8] sm:$0xff] %v450_v57  ;;  %v452_v59 = vld [vmem:[%s2560_s30 + $0x9d8] sm:$0xff] }
  0xd6   : > { %1475 = vst [vmem:[%s2569_s25 + $0x9d0] sm:$0xff] %v451_v58  ;;  %v453_v60 = vld [vmem:[%s2560_s30 + $0x9e0] sm:$0xff]  ;;  %v454_v61 = vld [vmem:[%s2560_s30 + $0x9e8] sm:$0xff]  ;;  %1476 = vst [vmem:[%s2569_s25 + $0x9d8] sm:$0xff] %v452_v59 }
  0xd7   : > { %1477 = vst [vmem:[%s2569_s25 + $0x9e0] sm:$0xff] %v453_v60  ;;  %1478 = vst [vmem:[%s2569_s25 + $0x9e8] sm:$0xff] %v454_v61  ;;  %v455_v62 = vld [vmem:[%s2560_s30 + $0x9f0] sm:$0xff]  ;;  %v456_v63 = vld [vmem:[%s2560_s30 + $0x9f8] sm:$0xff] }
  0xd8   : > { %v457_v0 = vld [vmem:[%s2560_s30 + $0xa00] sm:$0xff]  ;;  %1479 = vst [vmem:[%s2569_s25 + $0x9f0] sm:$0xff] %v455_v62  ;;  %1480 = vst [vmem:[%s2569_s25 + $0x9f8] sm:$0xff] %v456_v63  ;;  %v458_v1 = vld [vmem:[%s2560_s30 + $0xa08] sm:$0xff] }
  0xd9   : > { %1481 = vst [vmem:[%s2569_s25 + $0xa00] sm:$0xff] %v457_v0  ;;  %v459_v2 = vld [vmem:[%s2560_s30 + $0xa10] sm:$0xff]  ;;  %v460_v3 = vld [vmem:[%s2560_s30 + $0xa18] sm:$0xff]  ;;  %1482 = vst [vmem:[%s2569_s25 + $0xa08] sm:$0xff] %v458_v1 }
  0xda   : > { %1483 = vst [vmem:[%s2569_s25 + $0xa10] sm:$0xff] %v459_v2  ;;  %1484 = vst [vmem:[%s2569_s25 + $0xa18] sm:$0xff] %v460_v3  ;;  %v461_v4 = vld [vmem:[%s2560_s30 + $0xa20] sm:$0xff]  ;;  %v462_v5 = vld [vmem:[%s2560_s30 + $0xa28] sm:$0xff] }
  0xdb   : > { %v463_v6 = vld [vmem:[%s2560_s30 + $0xa30] sm:$0xff]  ;;  %1485 = vst [vmem:[%s2569_s25 + $0xa20] sm:$0xff] %v461_v4  ;;  %1486 = vst [vmem:[%s2569_s25 + $0xa28] sm:$0xff] %v462_v5  ;;  %v464_v7 = vld [vmem:[%s2560_s30 + $0xa38] sm:$0xff] }
  0xdc   : > { %1487 = vst [vmem:[%s2569_s25 + $0xa30] sm:$0xff] %v463_v6  ;;  %v465_v8 = vld [vmem:[%s2560_s30 + $0xa40] sm:$0xff]  ;;  %v466_v9 = vld [vmem:[%s2560_s30 + $0xa48] sm:$0xff]  ;;  %1488 = vst [vmem:[%s2569_s25 + $0xa38] sm:$0xff] %v464_v7 }
  0xdd   : > { %1489 = vst [vmem:[%s2569_s25 + $0xa40] sm:$0xff] %v465_v8  ;;  %1490 = vst [vmem:[%s2569_s25 + $0xa48] sm:$0xff] %v466_v9  ;;  %v467_v10 = vld [vmem:[%s2560_s30 + $0xa50] sm:$0xff]  ;;  %v468_v11 = vld [vmem:[%s2560_s30 + $0xa58] sm:$0xff] }
  0xde   : > { %v469_v12 = vld [vmem:[%s2560_s30 + $0xa60] sm:$0xff]  ;;  %1491 = vst [vmem:[%s2569_s25 + $0xa50] sm:$0xff] %v467_v10  ;;  %1492 = vst [vmem:[%s2569_s25 + $0xa58] sm:$0xff] %v468_v11  ;;  %v470_v13 = vld [vmem:[%s2560_s30 + $0xa68] sm:$0xff] }
  0xdf   : > { %1493 = vst [vmem:[%s2569_s25 + $0xa60] sm:$0xff] %v469_v12  ;;  %v471_v14 = vld [vmem:[%s2560_s30 + $0xa70] sm:$0xff]  ;;  %v472_v15 = vld [vmem:[%s2560_s30 + $0xa78] sm:$0xff]  ;;  %1494 = vst [vmem:[%s2569_s25 + $0xa68] sm:$0xff] %v470_v13 }
  0xe0   : > { %1495 = vst [vmem:[%s2569_s25 + $0xa70] sm:$0xff] %v471_v14  ;;  %1496 = vst [vmem:[%s2569_s25 + $0xa78] sm:$0xff] %v472_v15  ;;  %v473_v16 = vld [vmem:[%s2560_s30 + $0xa80] sm:$0xff]  ;;  %v474_v17 = vld [vmem:[%s2560_s30 + $0xa88] sm:$0xff] }
  0xe1   : > { %v475_v18 = vld [vmem:[%s2560_s30 + $0xa90] sm:$0xff]  ;;  %1497 = vst [vmem:[%s2569_s25 + $0xa80] sm:$0xff] %v473_v16  ;;  %1498 = vst [vmem:[%s2569_s25 + $0xa88] sm:$0xff] %v474_v17  ;;  %v476_v19 = vld [vmem:[%s2560_s30 + $0xa98] sm:$0xff] }
  0xe2   : > { %1499 = vst [vmem:[%s2569_s25 + $0xa90] sm:$0xff] %v475_v18  ;;  %v477_v20 = vld [vmem:[%s2560_s30 + $0xaa0] sm:$0xff]  ;;  %v478_v21 = vld [vmem:[%s2560_s30 + $0xaa8] sm:$0xff]  ;;  %1500 = vst [vmem:[%s2569_s25 + $0xa98] sm:$0xff] %v476_v19 }
  0xe3   : > { %1501 = vst [vmem:[%s2569_s25 + $0xaa0] sm:$0xff] %v477_v20  ;;  %1502 = vst [vmem:[%s2569_s25 + $0xaa8] sm:$0xff] %v478_v21  ;;  %v479_v22 = vld [vmem:[%s2560_s30 + $0xab0] sm:$0xff]  ;;  %v480_v23 = vld [vmem:[%s2560_s30 + $0xab8] sm:$0xff] }
  0xe4   : > { %v481_v24 = vld [vmem:[%s2560_s30 + $0xac0] sm:$0xff]  ;;  %1503 = vst [vmem:[%s2569_s25 + $0xab0] sm:$0xff] %v479_v22  ;;  %1504 = vst [vmem:[%s2569_s25 + $0xab8] sm:$0xff] %v480_v23  ;;  %v482_v25 = vld [vmem:[%s2560_s30 + $0xac8] sm:$0xff] }
  0xe5   : > { %1505 = vst [vmem:[%s2569_s25 + $0xac0] sm:$0xff] %v481_v24  ;;  %v483_v26 = vld [vmem:[%s2560_s30 + $0xad0] sm:$0xff]  ;;  %v484_v27 = vld [vmem:[%s2560_s30 + $0xad8] sm:$0xff]  ;;  %1506 = vst [vmem:[%s2569_s25 + $0xac8] sm:$0xff] %v482_v25 }
  0xe6   : > { %1507 = vst [vmem:[%s2569_s25 + $0xad0] sm:$0xff] %v483_v26  ;;  %1508 = vst [vmem:[%s2569_s25 + $0xad8] sm:$0xff] %v484_v27  ;;  %v485_v28 = vld [vmem:[%s2560_s30 + $0xae0] sm:$0xff]  ;;  %v486_v29 = vld [vmem:[%s2560_s30 + $0xae8] sm:$0xff] }
  0xe7   : > { %v487_v30 = vld [vmem:[%s2560_s30 + $0xaf0] sm:$0xff]  ;;  %1509 = vst [vmem:[%s2569_s25 + $0xae0] sm:$0xff] %v485_v28  ;;  %1510 = vst [vmem:[%s2569_s25 + $0xae8] sm:$0xff] %v486_v29  ;;  %v488_v31 = vld [vmem:[%s2560_s30 + $0xaf8] sm:$0xff] }
  0xe8   : > { %1511 = vst [vmem:[%s2569_s25 + $0xaf0] sm:$0xff] %v487_v30  ;;  %v489_v32 = vld [vmem:[%s2560_s30 + $0xb00] sm:$0xff]  ;;  %v490_v33 = vld [vmem:[%s2560_s30 + $0xb08] sm:$0xff]  ;;  %1512 = vst [vmem:[%s2569_s25 + $0xaf8] sm:$0xff] %v488_v31 }
  0xe9   : > { %1513 = vst [vmem:[%s2569_s25 + $0xb00] sm:$0xff] %v489_v32  ;;  %1514 = vst [vmem:[%s2569_s25 + $0xb08] sm:$0xff] %v490_v33  ;;  %v491_v34 = vld [vmem:[%s2560_s30 + $0xb10] sm:$0xff]  ;;  %v492_v35 = vld [vmem:[%s2560_s30 + $0xb18] sm:$0xff] }
  0xea   : > { %v493_v36 = vld [vmem:[%s2560_s30 + $0xb20] sm:$0xff]  ;;  %1515 = vst [vmem:[%s2569_s25 + $0xb10] sm:$0xff] %v491_v34  ;;  %1516 = vst [vmem:[%s2569_s25 + $0xb18] sm:$0xff] %v492_v35  ;;  %v494_v37 = vld [vmem:[%s2560_s30 + $0xb28] sm:$0xff] }
  0xeb   : > { %1517 = vst [vmem:[%s2569_s25 + $0xb20] sm:$0xff] %v493_v36  ;;  %v495_v38 = vld [vmem:[%s2560_s30 + $0xb30] sm:$0xff]  ;;  %v496_v39 = vld [vmem:[%s2560_s30 + $0xb38] sm:$0xff]  ;;  %1518 = vst [vmem:[%s2569_s25 + $0xb28] sm:$0xff] %v494_v37 }
  0xec   : > { %1519 = vst [vmem:[%s2569_s25 + $0xb30] sm:$0xff] %v495_v38  ;;  %1520 = vst [vmem:[%s2569_s25 + $0xb38] sm:$0xff] %v496_v39  ;;  %v497_v40 = vld [vmem:[%s2560_s30 + $0xb40] sm:$0xff]  ;;  %v498_v41 = vld [vmem:[%s2560_s30 + $0xb48] sm:$0xff] }
  0xed   : > { %v499_v42 = vld [vmem:[%s2560_s30 + $0xb50] sm:$0xff]  ;;  %1521 = vst [vmem:[%s2569_s25 + $0xb40] sm:$0xff] %v497_v40  ;;  %1522 = vst [vmem:[%s2569_s25 + $0xb48] sm:$0xff] %v498_v41  ;;  %v500_v43 = vld [vmem:[%s2560_s30 + $0xb58] sm:$0xff] }
  0xee   : > { %1523 = vst [vmem:[%s2569_s25 + $0xb50] sm:$0xff] %v499_v42  ;;  %v501_v44 = vld [vmem:[%s2560_s30 + $0xb60] sm:$0xff]  ;;  %v502_v45 = vld [vmem:[%s2560_s30 + $0xb68] sm:$0xff]  ;;  %1524 = vst [vmem:[%s2569_s25 + $0xb58] sm:$0xff] %v500_v43 }
  0xef   : > { %1525 = vst [vmem:[%s2569_s25 + $0xb60] sm:$0xff] %v501_v44  ;;  %1526 = vst [vmem:[%s2569_s25 + $0xb68] sm:$0xff] %v502_v45  ;;  %v503_v46 = vld [vmem:[%s2560_s30 + $0xb70] sm:$0xff]  ;;  %v504_v47 = vld [vmem:[%s2560_s30 + $0xb78] sm:$0xff] }
  0xf0   : > { %v505_v48 = vld [vmem:[%s2560_s30 + $0xb80] sm:$0xff]  ;;  %1527 = vst [vmem:[%s2569_s25 + $0xb70] sm:$0xff] %v503_v46  ;;  %1528 = vst [vmem:[%s2569_s25 + $0xb78] sm:$0xff] %v504_v47  ;;  %v506_v49 = vld [vmem:[%s2560_s30 + $0xb88] sm:$0xff] }
  0xf1   : > { %1529 = vst [vmem:[%s2569_s25 + $0xb80] sm:$0xff] %v505_v48  ;;  %v507_v50 = vld [vmem:[%s2560_s30 + $0xb90] sm:$0xff]  ;;  %v508_v51 = vld [vmem:[%s2560_s30 + $0xb98] sm:$0xff]  ;;  %1530 = vst [vmem:[%s2569_s25 + $0xb88] sm:$0xff] %v506_v49 }
  0xf2   : > { %1531 = vst [vmem:[%s2569_s25 + $0xb90] sm:$0xff] %v507_v50  ;;  %1532 = vst [vmem:[%s2569_s25 + $0xb98] sm:$0xff] %v508_v51  ;;  %v509_v52 = vld [vmem:[%s2560_s30 + $0xba0] sm:$0xff]  ;;  %v510_v53 = vld [vmem:[%s2560_s30 + $0xba8] sm:$0xff] }
  0xf3   : > { %v511_v54 = vld [vmem:[%s2560_s30 + $0xbb0] sm:$0xff]  ;;  %1533 = vst [vmem:[%s2569_s25 + $0xba0] sm:$0xff] %v509_v52  ;;  %1534 = vst [vmem:[%s2569_s25 + $0xba8] sm:$0xff] %v510_v53  ;;  %v512_v55 = vld [vmem:[%s2560_s30 + $0xbb8] sm:$0xff] }
  0xf4   : > { %1535 = vst [vmem:[%s2569_s25 + $0xbb0] sm:$0xff] %v511_v54  ;;  %v513_v56 = vld [vmem:[%s2560_s30 + $0xbc0] sm:$0xff]  ;;  %v514_v57 = vld [vmem:[%s2560_s30 + $0xbc8] sm:$0xff]  ;;  %1536 = vst [vmem:[%s2569_s25 + $0xbb8] sm:$0xff] %v512_v55 }
  0xf5   : > { %1537 = vst [vmem:[%s2569_s25 + $0xbc0] sm:$0xff] %v513_v56  ;;  %1538 = vst [vmem:[%s2569_s25 + $0xbc8] sm:$0xff] %v514_v57  ;;  %v515_v58 = vld [vmem:[%s2560_s30 + $0xbd0] sm:$0xff]  ;;  %v516_v59 = vld [vmem:[%s2560_s30 + $0xbd8] sm:$0xff] }
  0xf6   : > { %v517_v60 = vld [vmem:[%s2560_s30 + $0xbe0] sm:$0xff]  ;;  %1539 = vst [vmem:[%s2569_s25 + $0xbd0] sm:$0xff] %v515_v58  ;;  %1540 = vst [vmem:[%s2569_s25 + $0xbd8] sm:$0xff] %v516_v59  ;;  %v518_v61 = vld [vmem:[%s2560_s30 + $0xbe8] sm:$0xff] }
  0xf7   : > { %1541 = vst [vmem:[%s2569_s25 + $0xbe0] sm:$0xff] %v517_v60  ;;  %v519_v62 = vld [vmem:[%s2560_s30 + $0xbf0] sm:$0xff]  ;;  %v520_v63 = vld [vmem:[%s2560_s30 + $0xbf8] sm:$0xff]  ;;  %1542 = vst [vmem:[%s2569_s25 + $0xbe8] sm:$0xff] %v518_v61 }
  0xf8   : > { %1543 = vst [vmem:[%s2569_s25 + $0xbf0] sm:$0xff] %v519_v62  ;;  %1544 = vst [vmem:[%s2569_s25 + $0xbf8] sm:$0xff] %v520_v63  ;;  %v521_v0 = vld [vmem:[%s2560_s30 + $0xc00] sm:$0xff]  ;;  %v522_v1 = vld [vmem:[%s2560_s30 + $0xc08] sm:$0xff] }
  0xf9   : > { %v523_v2 = vld [vmem:[%s2560_s30 + $0xc10] sm:$0xff]  ;;  %1545 = vst [vmem:[%s2569_s25 + $0xc00] sm:$0xff] %v521_v0  ;;  %1546 = vst [vmem:[%s2569_s25 + $0xc08] sm:$0xff] %v522_v1  ;;  %v524_v3 = vld [vmem:[%s2560_s30 + $0xc18] sm:$0xff] }
  0xfa   : > { %1547 = vst [vmem:[%s2569_s25 + $0xc10] sm:$0xff] %v523_v2  ;;  %v525_v4 = vld [vmem:[%s2560_s30 + $0xc20] sm:$0xff]  ;;  %v526_v5 = vld [vmem:[%s2560_s30 + $0xc28] sm:$0xff]  ;;  %1548 = vst [vmem:[%s2569_s25 + $0xc18] sm:$0xff] %v524_v3 }
  0xfb   : > { %1549 = vst [vmem:[%s2569_s25 + $0xc20] sm:$0xff] %v525_v4  ;;  %1550 = vst [vmem:[%s2569_s25 + $0xc28] sm:$0xff] %v526_v5  ;;  %v527_v6 = vld [vmem:[%s2560_s30 + $0xc30] sm:$0xff]  ;;  %v528_v7 = vld [vmem:[%s2560_s30 + $0xc38] sm:$0xff] }
  0xfc   : > { %v529_v8 = vld [vmem:[%s2560_s30 + $0xc40] sm:$0xff]  ;;  %1551 = vst [vmem:[%s2569_s25 + $0xc30] sm:$0xff] %v527_v6  ;;  %1552 = vst [vmem:[%s2569_s25 + $0xc38] sm:$0xff] %v528_v7  ;;  %v530_v9 = vld [vmem:[%s2560_s30 + $0xc48] sm:$0xff] }
  0xfd   : > { %1553 = vst [vmem:[%s2569_s25 + $0xc40] sm:$0xff] %v529_v8  ;;  %v531_v10 = vld [vmem:[%s2560_s30 + $0xc50] sm:$0xff]  ;;  %v532_v11 = vld [vmem:[%s2560_s30 + $0xc58] sm:$0xff]  ;;  %1554 = vst [vmem:[%s2569_s25 + $0xc48] sm:$0xff] %v530_v9 }
  0xfe   : > { %1555 = vst [vmem:[%s2569_s25 + $0xc50] sm:$0xff] %v531_v10  ;;  %1556 = vst [vmem:[%s2569_s25 + $0xc58] sm:$0xff] %v532_v11  ;;  %v533_v12 = vld [vmem:[%s2560_s30 + $0xc60] sm:$0xff]  ;;  %v534_v13 = vld [vmem:[%s2560_s30 + $0xc68] sm:$0xff] }
  0xff   : > { %v535_v14 = vld [vmem:[%s2560_s30 + $0xc70] sm:$0xff]  ;;  %1557 = vst [vmem:[%s2569_s25 + $0xc60] sm:$0xff] %v533_v12  ;;  %1558 = vst [vmem:[%s2569_s25 + $0xc68] sm:$0xff] %v534_v13  ;;  %v536_v15 = vld [vmem:[%s2560_s30 + $0xc78] sm:$0xff] }
 0x100   : > { %1559 = vst [vmem:[%s2569_s25 + $0xc70] sm:$0xff] %v535_v14  ;;  %v537_v16 = vld [vmem:[%s2560_s30 + $0xc80] sm:$0xff]  ;;  %v538_v17 = vld [vmem:[%s2560_s30 + $0xc88] sm:$0xff]  ;;  %1560 = vst [vmem:[%s2569_s25 + $0xc78] sm:$0xff] %v536_v15 }
 0x101   : > { %1561 = vst [vmem:[%s2569_s25 + $0xc80] sm:$0xff] %v537_v16  ;;  %1562 = vst [vmem:[%s2569_s25 + $0xc88] sm:$0xff] %v538_v17  ;;  %v539_v18 = vld [vmem:[%s2560_s30 + $0xc90] sm:$0xff]  ;;  %v540_v19 = vld [vmem:[%s2560_s30 + $0xc98] sm:$0xff] }
 0x102   : > { %v541_v20 = vld [vmem:[%s2560_s30 + $0xca0] sm:$0xff]  ;;  %1563 = vst [vmem:[%s2569_s25 + $0xc90] sm:$0xff] %v539_v18  ;;  %1564 = vst [vmem:[%s2569_s25 + $0xc98] sm:$0xff] %v540_v19  ;;  %v542_v21 = vld [vmem:[%s2560_s30 + $0xca8] sm:$0xff] }
 0x103   : > { %1565 = vst [vmem:[%s2569_s25 + $0xca0] sm:$0xff] %v541_v20  ;;  %v543_v22 = vld [vmem:[%s2560_s30 + $0xcb0] sm:$0xff]  ;;  %v544_v23 = vld [vmem:[%s2560_s30 + $0xcb8] sm:$0xff]  ;;  %1566 = vst [vmem:[%s2569_s25 + $0xca8] sm:$0xff] %v542_v21 }
 0x104   : > { %1567 = vst [vmem:[%s2569_s25 + $0xcb0] sm:$0xff] %v543_v22  ;;  %1568 = vst [vmem:[%s2569_s25 + $0xcb8] sm:$0xff] %v544_v23  ;;  %v545_v24 = vld [vmem:[%s2560_s30 + $0xcc0] sm:$0xff]  ;;  %v546_v25 = vld [vmem:[%s2560_s30 + $0xcc8] sm:$0xff] }
 0x105   : > { %v547_v26 = vld [vmem:[%s2560_s30 + $0xcd0] sm:$0xff]  ;;  %1569 = vst [vmem:[%s2569_s25 + $0xcc0] sm:$0xff] %v545_v24  ;;  %1570 = vst [vmem:[%s2569_s25 + $0xcc8] sm:$0xff] %v546_v25  ;;  %v548_v27 = vld [vmem:[%s2560_s30 + $0xcd8] sm:$0xff] }
 0x106   : > { %1571 = vst [vmem:[%s2569_s25 + $0xcd0] sm:$0xff] %v547_v26  ;;  %v549_v28 = vld [vmem:[%s2560_s30 + $0xce0] sm:$0xff]  ;;  %v550_v29 = vld [vmem:[%s2560_s30 + $0xce8] sm:$0xff]  ;;  %1572 = vst [vmem:[%s2569_s25 + $0xcd8] sm:$0xff] %v548_v27 }
 0x107   : > { %1573 = vst [vmem:[%s2569_s25 + $0xce0] sm:$0xff] %v549_v28  ;;  %1574 = vst [vmem:[%s2569_s25 + $0xce8] sm:$0xff] %v550_v29  ;;  %v551_v30 = vld [vmem:[%s2560_s30 + $0xcf0] sm:$0xff]  ;;  %v552_v31 = vld [vmem:[%s2560_s30 + $0xcf8] sm:$0xff] }
 0x108   : > { %v553_v32 = vld [vmem:[%s2560_s30 + $0xd00] sm:$0xff]  ;;  %1575 = vst [vmem:[%s2569_s25 + $0xcf0] sm:$0xff] %v551_v30  ;;  %1576 = vst [vmem:[%s2569_s25 + $0xcf8] sm:$0xff] %v552_v31  ;;  %v554_v33 = vld [vmem:[%s2560_s30 + $0xd08] sm:$0xff] }
 0x109   : > { %1577 = vst [vmem:[%s2569_s25 + $0xd00] sm:$0xff] %v553_v32  ;;  %v555_v34 = vld [vmem:[%s2560_s30 + $0xd10] sm:$0xff]  ;;  %v556_v35 = vld [vmem:[%s2560_s30 + $0xd18] sm:$0xff]  ;;  %1578 = vst [vmem:[%s2569_s25 + $0xd08] sm:$0xff] %v554_v33 }
 0x10a   : > { %1579 = vst [vmem:[%s2569_s25 + $0xd10] sm:$0xff] %v555_v34  ;;  %1580 = vst [vmem:[%s2569_s25 + $0xd18] sm:$0xff] %v556_v35  ;;  %v557_v36 = vld [vmem:[%s2560_s30 + $0xd20] sm:$0xff]  ;;  %v558_v37 = vld [vmem:[%s2560_s30 + $0xd28] sm:$0xff] }
 0x10b   : > { %v559_v38 = vld [vmem:[%s2560_s30 + $0xd30] sm:$0xff]  ;;  %1581 = vst [vmem:[%s2569_s25 + $0xd20] sm:$0xff] %v557_v36  ;;  %1582 = vst [vmem:[%s2569_s25 + $0xd28] sm:$0xff] %v558_v37  ;;  %v560_v39 = vld [vmem:[%s2560_s30 + $0xd38] sm:$0xff] }
 0x10c   : > { %1583 = vst [vmem:[%s2569_s25 + $0xd30] sm:$0xff] %v559_v38  ;;  %v561_v40 = vld [vmem:[%s2560_s30 + $0xd40] sm:$0xff]  ;;  %v562_v41 = vld [vmem:[%s2560_s30 + $0xd48] sm:$0xff]  ;;  %1584 = vst [vmem:[%s2569_s25 + $0xd38] sm:$0xff] %v560_v39 }
 0x10d   : > { %1585 = vst [vmem:[%s2569_s25 + $0xd40] sm:$0xff] %v561_v40  ;;  %1586 = vst [vmem:[%s2569_s25 + $0xd48] sm:$0xff] %v562_v41  ;;  %v563_v42 = vld [vmem:[%s2560_s30 + $0xd50] sm:$0xff]  ;;  %v564_v43 = vld [vmem:[%s2560_s30 + $0xd58] sm:$0xff] }
 0x10e   : > { %v565_v44 = vld [vmem:[%s2560_s30 + $0xd60] sm:$0xff]  ;;  %1587 = vst [vmem:[%s2569_s25 + $0xd50] sm:$0xff] %v563_v42  ;;  %1588 = vst [vmem:[%s2569_s25 + $0xd58] sm:$0xff] %v564_v43  ;;  %v566_v45 = vld [vmem:[%s2560_s30 + $0xd68] sm:$0xff] }
 0x10f   : > { %1589 = vst [vmem:[%s2569_s25 + $0xd60] sm:$0xff] %v565_v44  ;;  %v567_v46 = vld [vmem:[%s2560_s30 + $0xd70] sm:$0xff]  ;;  %v568_v47 = vld [vmem:[%s2560_s30 + $0xd78] sm:$0xff]  ;;  %1590 = vst [vmem:[%s2569_s25 + $0xd68] sm:$0xff] %v566_v45 }
 0x110   : > { %1591 = vst [vmem:[%s2569_s25 + $0xd70] sm:$0xff] %v567_v46  ;;  %1592 = vst [vmem:[%s2569_s25 + $0xd78] sm:$0xff] %v568_v47  ;;  %v569_v48 = vld [vmem:[%s2560_s30 + $0xd80] sm:$0xff]  ;;  %v570_v49 = vld [vmem:[%s2560_s30 + $0xd88] sm:$0xff] }
 0x111   : > { %v571_v50 = vld [vmem:[%s2560_s30 + $0xd90] sm:$0xff]  ;;  %1593 = vst [vmem:[%s2569_s25 + $0xd80] sm:$0xff] %v569_v48  ;;  %1594 = vst [vmem:[%s2569_s25 + $0xd88] sm:$0xff] %v570_v49  ;;  %v572_v51 = vld [vmem:[%s2560_s30 + $0xd98] sm:$0xff] }
 0x112   : > { %1595 = vst [vmem:[%s2569_s25 + $0xd90] sm:$0xff] %v571_v50  ;;  %v573_v52 = vld [vmem:[%s2560_s30 + $0xda0] sm:$0xff]  ;;  %v574_v53 = vld [vmem:[%s2560_s30 + $0xda8] sm:$0xff]  ;;  %1596 = vst [vmem:[%s2569_s25 + $0xd98] sm:$0xff] %v572_v51 }
 0x113   : > { %1597 = vst [vmem:[%s2569_s25 + $0xda0] sm:$0xff] %v573_v52  ;;  %1598 = vst [vmem:[%s2569_s25 + $0xda8] sm:$0xff] %v574_v53  ;;  %v575_v54 = vld [vmem:[%s2560_s30 + $0xdb0] sm:$0xff]  ;;  %v576_v55 = vld [vmem:[%s2560_s30 + $0xdb8] sm:$0xff] }
 0x114   : > { %v577_v56 = vld [vmem:[%s2560_s30 + $0xdc0] sm:$0xff]  ;;  %1599 = vst [vmem:[%s2569_s25 + $0xdb0] sm:$0xff] %v575_v54  ;;  %1600 = vst [vmem:[%s2569_s25 + $0xdb8] sm:$0xff] %v576_v55  ;;  %v578_v57 = vld [vmem:[%s2560_s30 + $0xdc8] sm:$0xff] }
 0x115   : > { %1601 = vst [vmem:[%s2569_s25 + $0xdc0] sm:$0xff] %v577_v56  ;;  %v579_v58 = vld [vmem:[%s2560_s30 + $0xdd0] sm:$0xff]  ;;  %v580_v59 = vld [vmem:[%s2560_s30 + $0xdd8] sm:$0xff]  ;;  %1602 = vst [vmem:[%s2569_s25 + $0xdc8] sm:$0xff] %v578_v57 }
 0x116   : > { %1603 = vst [vmem:[%s2569_s25 + $0xdd0] sm:$0xff] %v579_v58  ;;  %1604 = vst [vmem:[%s2569_s25 + $0xdd8] sm:$0xff] %v580_v59  ;;  %v581_v60 = vld [vmem:[%s2560_s30 + $0xde0] sm:$0xff]  ;;  %v582_v61 = vld [vmem:[%s2560_s30 + $0xde8] sm:$0xff] }
 0x117   : > { %v583_v62 = vld [vmem:[%s2560_s30 + $0xdf0] sm:$0xff]  ;;  %1605 = vst [vmem:[%s2569_s25 + $0xde0] sm:$0xff] %v581_v60  ;;  %1606 = vst [vmem:[%s2569_s25 + $0xde8] sm:$0xff] %v582_v61  ;;  %v584_v63 = vld [vmem:[%s2560_s30 + $0xdf8] sm:$0xff] }
 0x118   : > { %1607 = vst [vmem:[%s2569_s25 + $0xdf0] sm:$0xff] %v583_v62  ;;  %v585_v0 = vld [vmem:[%s2560_s30 + $0xe00] sm:$0xff]  ;;  %v586_v1 = vld [vmem:[%s2560_s30 + $0xe08] sm:$0xff]  ;;  %1608 = vst [vmem:[%s2569_s25 + $0xdf8] sm:$0xff] %v584_v63 }
 0x119   : > { %1609 = vst [vmem:[%s2569_s25 + $0xe00] sm:$0xff] %v585_v0  ;;  %1610 = vst [vmem:[%s2569_s25 + $0xe08] sm:$0xff] %v586_v1  ;;  %v587_v2 = vld [vmem:[%s2560_s30 + $0xe10] sm:$0xff]  ;;  %v588_v3 = vld [vmem:[%s2560_s30 + $0xe18] sm:$0xff] }
 0x11a   : > { %v589_v4 = vld [vmem:[%s2560_s30 + $0xe20] sm:$0xff]  ;;  %1611 = vst [vmem:[%s2569_s25 + $0xe10] sm:$0xff] %v587_v2  ;;  %1612 = vst [vmem:[%s2569_s25 + $0xe18] sm:$0xff] %v588_v3  ;;  %v590_v5 = vld [vmem:[%s2560_s30 + $0xe28] sm:$0xff] }
 0x11b   : > { %1613 = vst [vmem:[%s2569_s25 + $0xe20] sm:$0xff] %v589_v4  ;;  %v591_v6 = vld [vmem:[%s2560_s30 + $0xe30] sm:$0xff]  ;;  %v592_v7 = vld [vmem:[%s2560_s30 + $0xe38] sm:$0xff]  ;;  %1614 = vst [vmem:[%s2569_s25 + $0xe28] sm:$0xff] %v590_v5 }
 0x11c   : > { %1615 = vst [vmem:[%s2569_s25 + $0xe30] sm:$0xff] %v591_v6  ;;  %1616 = vst [vmem:[%s2569_s25 + $0xe38] sm:$0xff] %v592_v7  ;;  %v593_v8 = vld [vmem:[%s2560_s30 + $0xe40] sm:$0xff]  ;;  %v594_v9 = vld [vmem:[%s2560_s30 + $0xe48] sm:$0xff] }
 0x11d   : > { %v595_v10 = vld [vmem:[%s2560_s30 + $0xe50] sm:$0xff]  ;;  %1617 = vst [vmem:[%s2569_s25 + $0xe40] sm:$0xff] %v593_v8  ;;  %1618 = vst [vmem:[%s2569_s25 + $0xe48] sm:$0xff] %v594_v9  ;;  %v596_v11 = vld [vmem:[%s2560_s30 + $0xe58] sm:$0xff] }
 0x11e   : > { %1619 = vst [vmem:[%s2569_s25 + $0xe50] sm:$0xff] %v595_v10  ;;  %v597_v12 = vld [vmem:[%s2560_s30 + $0xe60] sm:$0xff]  ;;  %v598_v13 = vld [vmem:[%s2560_s30 + $0xe68] sm:$0xff]  ;;  %1620 = vst [vmem:[%s2569_s25 + $0xe58] sm:$0xff] %v596_v11 }
 0x11f   : > { %1621 = vst [vmem:[%s2569_s25 + $0xe60] sm:$0xff] %v597_v12  ;;  %1622 = vst [vmem:[%s2569_s25 + $0xe68] sm:$0xff] %v598_v13  ;;  %v599_v14 = vld [vmem:[%s2560_s30 + $0xe70] sm:$0xff]  ;;  %v600_v15 = vld [vmem:[%s2560_s30 + $0xe78] sm:$0xff] }
 0x120   : > { %v601_v16 = vld [vmem:[%s2560_s30 + $0xe80] sm:$0xff]  ;;  %1623 = vst [vmem:[%s2569_s25 + $0xe70] sm:$0xff] %v599_v14  ;;  %1624 = vst [vmem:[%s2569_s25 + $0xe78] sm:$0xff] %v600_v15  ;;  %v602_v17 = vld [vmem:[%s2560_s30 + $0xe88] sm:$0xff] }
 0x121   : > { %1625 = vst [vmem:[%s2569_s25 + $0xe80] sm:$0xff] %v601_v16  ;;  %v603_v18 = vld [vmem:[%s2560_s30 + $0xe90] sm:$0xff]  ;;  %v604_v19 = vld [vmem:[%s2560_s30 + $0xe98] sm:$0xff]  ;;  %1626 = vst [vmem:[%s2569_s25 + $0xe88] sm:$0xff] %v602_v17 }
 0x122   : > { %1627 = vst [vmem:[%s2569_s25 + $0xe90] sm:$0xff] %v603_v18  ;;  %1628 = vst [vmem:[%s2569_s25 + $0xe98] sm:$0xff] %v604_v19  ;;  %v605_v20 = vld [vmem:[%s2560_s30 + $0xea0] sm:$0xff]  ;;  %v606_v21 = vld [vmem:[%s2560_s30 + $0xea8] sm:$0xff] }
 0x123   : > { %v607_v22 = vld [vmem:[%s2560_s30 + $0xeb0] sm:$0xff]  ;;  %1629 = vst [vmem:[%s2569_s25 + $0xea0] sm:$0xff] %v605_v20  ;;  %1630 = vst [vmem:[%s2569_s25 + $0xea8] sm:$0xff] %v606_v21  ;;  %v608_v23 = vld [vmem:[%s2560_s30 + $0xeb8] sm:$0xff] }
 0x124   : > { %1631 = vst [vmem:[%s2569_s25 + $0xeb0] sm:$0xff] %v607_v22  ;;  %v609_v24 = vld [vmem:[%s2560_s30 + $0xec0] sm:$0xff]  ;;  %v610_v25 = vld [vmem:[%s2560_s30 + $0xec8] sm:$0xff]  ;;  %1632 = vst [vmem:[%s2569_s25 + $0xeb8] sm:$0xff] %v608_v23 }
 0x125   : > { %1633 = vst [vmem:[%s2569_s25 + $0xec0] sm:$0xff] %v609_v24  ;;  %1634 = vst [vmem:[%s2569_s25 + $0xec8] sm:$0xff] %v610_v25  ;;  %v611_v26 = vld [vmem:[%s2560_s30 + $0xed0] sm:$0xff]  ;;  %v612_v27 = vld [vmem:[%s2560_s30 + $0xed8] sm:$0xff] }
 0x126   : > { %v613_v28 = vld [vmem:[%s2560_s30 + $0xee0] sm:$0xff]  ;;  %1635 = vst [vmem:[%s2569_s25 + $0xed0] sm:$0xff] %v611_v26  ;;  %1636 = vst [vmem:[%s2569_s25 + $0xed8] sm:$0xff] %v612_v27  ;;  %v614_v29 = vld [vmem:[%s2560_s30 + $0xee8] sm:$0xff] }
 0x127   : > { %1637 = vst [vmem:[%s2569_s25 + $0xee0] sm:$0xff] %v613_v28  ;;  %v615_v30 = vld [vmem:[%s2560_s30 + $0xef0] sm:$0xff]  ;;  %v616_v31 = vld [vmem:[%s2560_s30 + $0xef8] sm:$0xff]  ;;  %1638 = vst [vmem:[%s2569_s25 + $0xee8] sm:$0xff] %v614_v29 }
 0x128   : > { %1639 = vst [vmem:[%s2569_s25 + $0xef0] sm:$0xff] %v615_v30  ;;  %1640 = vst [vmem:[%s2569_s25 + $0xef8] sm:$0xff] %v616_v31  ;;  %v617_v32 = vld [vmem:[%s2560_s30 + $0xf00] sm:$0xff]  ;;  %v618_v33 = vld [vmem:[%s2560_s30 + $0xf08] sm:$0xff] }
 0x129   : > { %v619_v34 = vld [vmem:[%s2560_s30 + $0xf10] sm:$0xff]  ;;  %1641 = vst [vmem:[%s2569_s25 + $0xf00] sm:$0xff] %v617_v32  ;;  %1642 = vst [vmem:[%s2569_s25 + $0xf08] sm:$0xff] %v618_v33  ;;  %v620_v35 = vld [vmem:[%s2560_s30 + $0xf18] sm:$0xff] }
 0x12a   : > { %1643 = vst [vmem:[%s2569_s25 + $0xf10] sm:$0xff] %v619_v34  ;;  %v621_v36 = vld [vmem:[%s2560_s30 + $0xf20] sm:$0xff]  ;;  %v622_v37 = vld [vmem:[%s2560_s30 + $0xf28] sm:$0xff]  ;;  %1644 = vst [vmem:[%s2569_s25 + $0xf18] sm:$0xff] %v620_v35 }
 0x12b   : > { %1645 = vst [vmem:[%s2569_s25 + $0xf20] sm:$0xff] %v621_v36  ;;  %1646 = vst [vmem:[%s2569_s25 + $0xf28] sm:$0xff] %v622_v37  ;;  %v623_v38 = vld [vmem:[%s2560_s30 + $0xf30] sm:$0xff]  ;;  %v624_v39 = vld [vmem:[%s2560_s30 + $0xf38] sm:$0xff] }
 0x12c   : > { %v625_v40 = vld [vmem:[%s2560_s30 + $0xf40] sm:$0xff]  ;;  %1647 = vst [vmem:[%s2569_s25 + $0xf30] sm:$0xff] %v623_v38  ;;  %1648 = vst [vmem:[%s2569_s25 + $0xf38] sm:$0xff] %v624_v39  ;;  %v626_v41 = vld [vmem:[%s2560_s30 + $0xf48] sm:$0xff] }
 0x12d   : > { %1649 = vst [vmem:[%s2569_s25 + $0xf40] sm:$0xff] %v625_v40  ;;  %v627_v42 = vld [vmem:[%s2560_s30 + $0xf50] sm:$0xff]  ;;  %v628_v43 = vld [vmem:[%s2560_s30 + $0xf58] sm:$0xff]  ;;  %1650 = vst [vmem:[%s2569_s25 + $0xf48] sm:$0xff] %v626_v41 }
 0x12e   : > { %1651 = vst [vmem:[%s2569_s25 + $0xf50] sm:$0xff] %v627_v42  ;;  %1652 = vst [vmem:[%s2569_s25 + $0xf58] sm:$0xff] %v628_v43  ;;  %v629_v44 = vld [vmem:[%s2560_s30 + $0xf60] sm:$0xff]  ;;  %v630_v45 = vld [vmem:[%s2560_s30 + $0xf68] sm:$0xff] }
 0x12f   : > { %v631_v46 = vld [vmem:[%s2560_s30 + $0xf70] sm:$0xff]  ;;  %1653 = vst [vmem:[%s2569_s25 + $0xf60] sm:$0xff] %v629_v44  ;;  %1654 = vst [vmem:[%s2569_s25 + $0xf68] sm:$0xff] %v630_v45  ;;  %v632_v47 = vld [vmem:[%s2560_s30 + $0xf78] sm:$0xff] }
 0x130   : > { %1655 = vst [vmem:[%s2569_s25 + $0xf70] sm:$0xff] %v631_v46  ;;  %v633_v48 = vld [vmem:[%s2560_s30 + $0xf80] sm:$0xff]  ;;  %v634_v49 = vld [vmem:[%s2560_s30 + $0xf88] sm:$0xff]  ;;  %1656 = vst [vmem:[%s2569_s25 + $0xf78] sm:$0xff] %v632_v47 }
 0x131   : > { %1657 = vst [vmem:[%s2569_s25 + $0xf80] sm:$0xff] %v633_v48  ;;  %1658 = vst [vmem:[%s2569_s25 + $0xf88] sm:$0xff] %v634_v49  ;;  %v635_v50 = vld [vmem:[%s2560_s30 + $0xf90] sm:$0xff]  ;;  %v636_v51 = vld [vmem:[%s2560_s30 + $0xf98] sm:$0xff] }
 0x132   : > { %v637_v52 = vld [vmem:[%s2560_s30 + $0xfa0] sm:$0xff]  ;;  %1659 = vst [vmem:[%s2569_s25 + $0xf90] sm:$0xff] %v635_v50  ;;  %1660 = vst [vmem:[%s2569_s25 + $0xf98] sm:$0xff] %v636_v51  ;;  %v638_v53 = vld [vmem:[%s2560_s30 + $0xfa8] sm:$0xff] }
 0x133   : > { %1661 = vst [vmem:[%s2569_s25 + $0xfa0] sm:$0xff] %v637_v52  ;;  %v639_v54 = vld [vmem:[%s2560_s30 + $0xfb0] sm:$0xff]  ;;  %v640_v55 = vld [vmem:[%s2560_s30 + $0xfb8] sm:$0xff]  ;;  %1662 = vst [vmem:[%s2569_s25 + $0xfa8] sm:$0xff] %v638_v53 }
 0x134   : > { %1663 = vst [vmem:[%s2569_s25 + $0xfb0] sm:$0xff] %v639_v54  ;;  %1664 = vst [vmem:[%s2569_s25 + $0xfb8] sm:$0xff] %v640_v55  ;;  %v641_v56 = vld [vmem:[%s2560_s30 + $0xfc0] sm:$0xff]  ;;  %v642_v57 = vld [vmem:[%s2560_s30 + $0xfc8] sm:$0xff] }
 0x135   : > { %v643_v58 = vld [vmem:[%s2560_s30 + $0xfd0] sm:$0xff]  ;;  %1665 = vst [vmem:[%s2569_s25 + $0xfc0] sm:$0xff] %v641_v56  ;;  %1666 = vst [vmem:[%s2569_s25 + $0xfc8] sm:$0xff] %v642_v57  ;;  %v644_v59 = vld [vmem:[%s2560_s30 + $0xfd8] sm:$0xff] }
 0x136   : > { %1667 = vst [vmem:[%s2569_s25 + $0xfd0] sm:$0xff] %v643_v58  ;;  %v645_v60 = vld [vmem:[%s2560_s30 + $0xfe0] sm:$0xff]  ;;  %v646_v61 = vld [vmem:[%s2560_s30 + $0xfe8] sm:$0xff]  ;;  %1668 = vst [vmem:[%s2569_s25 + $0xfd8] sm:$0xff] %v644_v59 }
 0x137   : > { %1669 = vst [vmem:[%s2569_s25 + $0xfe0] sm:$0xff] %v645_v60  ;;  %1670 = vst [vmem:[%s2569_s25 + $0xfe8] sm:$0xff] %v646_v61  ;;  %v647_v62 = vld [vmem:[%s2560_s30 + $0xff0] sm:$0xff]  ;;  %v648_v63 = vld [vmem:[%s2560_s30 + $0xff8] sm:$0xff] }
 0x138   : > { %v649_v0 = vld [vmem:[%s2560_s30 + $0x1000] sm:$0xff]  ;;  %1671 = vst [vmem:[%s2569_s25 + $0xff0] sm:$0xff] %v647_v62  ;;  %1672 = vst [vmem:[%s2569_s25 + $0xff8] sm:$0xff] %v648_v63  ;;  %v650_v1 = vld [vmem:[%s2560_s30 + $0x1008] sm:$0xff] }
 0x139   : > { %1673 = vst [vmem:[%s2569_s25 + $0x1000] sm:$0xff] %v649_v0  ;;  %v651_v2 = vld [vmem:[%s2560_s30 + $0x1010] sm:$0xff]  ;;  %v652_v3 = vld [vmem:[%s2560_s30 + $0x1018] sm:$0xff]  ;;  %1674 = vst [vmem:[%s2569_s25 + $0x1008] sm:$0xff] %v650_v1 }
 0x13a   : > { %1675 = vst [vmem:[%s2569_s25 + $0x1010] sm:$0xff] %v651_v2  ;;  %1676 = vst [vmem:[%s2569_s25 + $0x1018] sm:$0xff] %v652_v3  ;;  %v653_v4 = vld [vmem:[%s2560_s30 + $0x1020] sm:$0xff]  ;;  %v654_v5 = vld [vmem:[%s2560_s30 + $0x1028] sm:$0xff] }
 0x13b   : > { %v655_v6 = vld [vmem:[%s2560_s30 + $0x1030] sm:$0xff]  ;;  %1677 = vst [vmem:[%s2569_s25 + $0x1020] sm:$0xff] %v653_v4  ;;  %1678 = vst [vmem:[%s2569_s25 + $0x1028] sm:$0xff] %v654_v5  ;;  %v656_v7 = vld [vmem:[%s2560_s30 + $0x1038] sm:$0xff] }
 0x13c   : > { %1679 = vst [vmem:[%s2569_s25 + $0x1030] sm:$0xff] %v655_v6  ;;  %v657_v8 = vld [vmem:[%s2560_s30 + $0x1040] sm:$0xff]  ;;  %v658_v9 = vld [vmem:[%s2560_s30 + $0x1048] sm:$0xff]  ;;  %1680 = vst [vmem:[%s2569_s25 + $0x1038] sm:$0xff] %v656_v7 }
 0x13d   : > { %1681 = vst [vmem:[%s2569_s25 + $0x1040] sm:$0xff] %v657_v8  ;;  %1682 = vst [vmem:[%s2569_s25 + $0x1048] sm:$0xff] %v658_v9  ;;  %v659_v10 = vld [vmem:[%s2560_s30 + $0x1050] sm:$0xff]  ;;  %v660_v11 = vld [vmem:[%s2560_s30 + $0x1058] sm:$0xff] }
 0x13e   : > { %v661_v12 = vld [vmem:[%s2560_s30 + $0x1060] sm:$0xff]  ;;  %1683 = vst [vmem:[%s2569_s25 + $0x1050] sm:$0xff] %v659_v10  ;;  %1684 = vst [vmem:[%s2569_s25 + $0x1058] sm:$0xff] %v660_v11  ;;  %v662_v13 = vld [vmem:[%s2560_s30 + $0x1068] sm:$0xff] }
 0x13f   : > { %1685 = vst [vmem:[%s2569_s25 + $0x1060] sm:$0xff] %v661_v12  ;;  %v663_v14 = vld [vmem:[%s2560_s30 + $0x1070] sm:$0xff]  ;;  %v664_v15 = vld [vmem:[%s2560_s30 + $0x1078] sm:$0xff]  ;;  %1686 = vst [vmem:[%s2569_s25 + $0x1068] sm:$0xff] %v662_v13 }
 0x140   : > { %1687 = vst [vmem:[%s2569_s25 + $0x1070] sm:$0xff] %v663_v14  ;;  %1688 = vst [vmem:[%s2569_s25 + $0x1078] sm:$0xff] %v664_v15  ;;  %v665_v16 = vld [vmem:[%s2560_s30 + $0x1080] sm:$0xff]  ;;  %v666_v17 = vld [vmem:[%s2560_s30 + $0x1088] sm:$0xff] }
 0x141   : > { %v667_v18 = vld [vmem:[%s2560_s30 + $0x1090] sm:$0xff]  ;;  %1689 = vst [vmem:[%s2569_s25 + $0x1080] sm:$0xff] %v665_v16  ;;  %1690 = vst [vmem:[%s2569_s25 + $0x1088] sm:$0xff] %v666_v17  ;;  %v668_v19 = vld [vmem:[%s2560_s30 + $0x1098] sm:$0xff] }
 0x142   : > { %1691 = vst [vmem:[%s2569_s25 + $0x1090] sm:$0xff] %v667_v18  ;;  %v669_v20 = vld [vmem:[%s2560_s30 + $0x10a0] sm:$0xff]  ;;  %v670_v21 = vld [vmem:[%s2560_s30 + $0x10a8] sm:$0xff]  ;;  %1692 = vst [vmem:[%s2569_s25 + $0x1098] sm:$0xff] %v668_v19 }
 0x143   : > { %1693 = vst [vmem:[%s2569_s25 + $0x10a0] sm:$0xff] %v669_v20  ;;  %1694 = vst [vmem:[%s2569_s25 + $0x10a8] sm:$0xff] %v670_v21  ;;  %v671_v22 = vld [vmem:[%s2560_s30 + $0x10b0] sm:$0xff]  ;;  %v672_v23 = vld [vmem:[%s2560_s30 + $0x10b8] sm:$0xff] }
 0x144   : > { %v673_v24 = vld [vmem:[%s2560_s30 + $0x10c0] sm:$0xff]  ;;  %1695 = vst [vmem:[%s2569_s25 + $0x10b0] sm:$0xff] %v671_v22  ;;  %1696 = vst [vmem:[%s2569_s25 + $0x10b8] sm:$0xff] %v672_v23  ;;  %v674_v25 = vld [vmem:[%s2560_s30 + $0x10c8] sm:$0xff] }
 0x145   : > { %1697 = vst [vmem:[%s2569_s25 + $0x10c0] sm:$0xff] %v673_v24  ;;  %v675_v26 = vld [vmem:[%s2560_s30 + $0x10d0] sm:$0xff]  ;;  %v676_v27 = vld [vmem:[%s2560_s30 + $0x10d8] sm:$0xff]  ;;  %1698 = vst [vmem:[%s2569_s25 + $0x10c8] sm:$0xff] %v674_v25 }
 0x146   : > { %1699 = vst [vmem:[%s2569_s25 + $0x10d0] sm:$0xff] %v675_v26  ;;  %1700 = vst [vmem:[%s2569_s25 + $0x10d8] sm:$0xff] %v676_v27  ;;  %v677_v28 = vld [vmem:[%s2560_s30 + $0x10e0] sm:$0xff]  ;;  %v678_v29 = vld [vmem:[%s2560_s30 + $0x10e8] sm:$0xff] }
 0x147   : > { %v679_v30 = vld [vmem:[%s2560_s30 + $0x10f0] sm:$0xff]  ;;  %1701 = vst [vmem:[%s2569_s25 + $0x10e0] sm:$0xff] %v677_v28  ;;  %1702 = vst [vmem:[%s2569_s25 + $0x10e8] sm:$0xff] %v678_v29  ;;  %v680_v31 = vld [vmem:[%s2560_s30 + $0x10f8] sm:$0xff] }
 0x148   : > { %1703 = vst [vmem:[%s2569_s25 + $0x10f0] sm:$0xff] %v679_v30  ;;  %v681_v32 = vld [vmem:[%s2560_s30 + $0x1100] sm:$0xff]  ;;  %v682_v33 = vld [vmem:[%s2560_s30 + $0x1108] sm:$0xff]  ;;  %1704 = vst [vmem:[%s2569_s25 + $0x10f8] sm:$0xff] %v680_v31 }
 0x149   : > { %1705 = vst [vmem:[%s2569_s25 + $0x1100] sm:$0xff] %v681_v32  ;;  %1706 = vst [vmem:[%s2569_s25 + $0x1108] sm:$0xff] %v682_v33  ;;  %v683_v34 = vld [vmem:[%s2560_s30 + $0x1110] sm:$0xff]  ;;  %v684_v35 = vld [vmem:[%s2560_s30 + $0x1118] sm:$0xff] }
 0x14a   : > { %v685_v36 = vld [vmem:[%s2560_s30 + $0x1120] sm:$0xff]  ;;  %1707 = vst [vmem:[%s2569_s25 + $0x1110] sm:$0xff] %v683_v34  ;;  %1708 = vst [vmem:[%s2569_s25 + $0x1118] sm:$0xff] %v684_v35  ;;  %v686_v37 = vld [vmem:[%s2560_s30 + $0x1128] sm:$0xff] }
 0x14b   : > { %1709 = vst [vmem:[%s2569_s25 + $0x1120] sm:$0xff] %v685_v36  ;;  %v687_v38 = vld [vmem:[%s2560_s30 + $0x1130] sm:$0xff]  ;;  %v688_v39 = vld [vmem:[%s2560_s30 + $0x1138] sm:$0xff]  ;;  %1710 = vst [vmem:[%s2569_s25 + $0x1128] sm:$0xff] %v686_v37 }
 0x14c   : > { %1711 = vst [vmem:[%s2569_s25 + $0x1130] sm:$0xff] %v687_v38  ;;  %1712 = vst [vmem:[%s2569_s25 + $0x1138] sm:$0xff] %v688_v39  ;;  %v689_v40 = vld [vmem:[%s2560_s30 + $0x1140] sm:$0xff]  ;;  %v690_v41 = vld [vmem:[%s2560_s30 + $0x1148] sm:$0xff] }
 0x14d   : > { %v691_v42 = vld [vmem:[%s2560_s30 + $0x1150] sm:$0xff]  ;;  %1713 = vst [vmem:[%s2569_s25 + $0x1140] sm:$0xff] %v689_v40  ;;  %1714 = vst [vmem:[%s2569_s25 + $0x1148] sm:$0xff] %v690_v41  ;;  %v692_v43 = vld [vmem:[%s2560_s30 + $0x1158] sm:$0xff] }
 0x14e   : > { %1715 = vst [vmem:[%s2569_s25 + $0x1150] sm:$0xff] %v691_v42  ;;  %v693_v44 = vld [vmem:[%s2560_s30 + $0x1160] sm:$0xff]  ;;  %v694_v45 = vld [vmem:[%s2560_s30 + $0x1168] sm:$0xff]  ;;  %1716 = vst [vmem:[%s2569_s25 + $0x1158] sm:$0xff] %v692_v43 }
 0x14f   : > { %1717 = vst [vmem:[%s2569_s25 + $0x1160] sm:$0xff] %v693_v44  ;;  %1718 = vst [vmem:[%s2569_s25 + $0x1168] sm:$0xff] %v694_v45  ;;  %v695_v46 = vld [vmem:[%s2560_s30 + $0x1170] sm:$0xff]  ;;  %v696_v47 = vld [vmem:[%s2560_s30 + $0x1178] sm:$0xff] }
 0x150   : > { %v697_v48 = vld [vmem:[%s2560_s30 + $0x1180] sm:$0xff]  ;;  %1719 = vst [vmem:[%s2569_s25 + $0x1170] sm:$0xff] %v695_v46  ;;  %1720 = vst [vmem:[%s2569_s25 + $0x1178] sm:$0xff] %v696_v47  ;;  %v698_v49 = vld [vmem:[%s2560_s30 + $0x1188] sm:$0xff] }
 0x151   : > { %1721 = vst [vmem:[%s2569_s25 + $0x1180] sm:$0xff] %v697_v48  ;;  %v699_v50 = vld [vmem:[%s2560_s30 + $0x1190] sm:$0xff]  ;;  %v700_v51 = vld [vmem:[%s2560_s30 + $0x1198] sm:$0xff]  ;;  %1722 = vst [vmem:[%s2569_s25 + $0x1188] sm:$0xff] %v698_v49 }
 0x152   : > { %1723 = vst [vmem:[%s2569_s25 + $0x1190] sm:$0xff] %v699_v50  ;;  %1724 = vst [vmem:[%s2569_s25 + $0x1198] sm:$0xff] %v700_v51  ;;  %v701_v52 = vld [vmem:[%s2560_s30 + $0x11a0] sm:$0xff]  ;;  %v702_v53 = vld [vmem:[%s2560_s30 + $0x11a8] sm:$0xff] }
 0x153   : > { %v703_v54 = vld [vmem:[%s2560_s30 + $0x11b0] sm:$0xff]  ;;  %1725 = vst [vmem:[%s2569_s25 + $0x11a0] sm:$0xff] %v701_v52  ;;  %1726 = vst [vmem:[%s2569_s25 + $0x11a8] sm:$0xff] %v702_v53  ;;  %v704_v55 = vld [vmem:[%s2560_s30 + $0x11b8] sm:$0xff] }
 0x154   : > { %1727 = vst [vmem:[%s2569_s25 + $0x11b0] sm:$0xff] %v703_v54  ;;  %v705_v56 = vld [vmem:[%s2560_s30 + $0x11c0] sm:$0xff]  ;;  %v706_v57 = vld [vmem:[%s2560_s30 + $0x11c8] sm:$0xff]  ;;  %1728 = vst [vmem:[%s2569_s25 + $0x11b8] sm:$0xff] %v704_v55 }
 0x155   : > { %1729 = vst [vmem:[%s2569_s25 + $0x11c0] sm:$0xff] %v705_v56  ;;  %1730 = vst [vmem:[%s2569_s25 + $0x11c8] sm:$0xff] %v706_v57  ;;  %v707_v58 = vld [vmem:[%s2560_s30 + $0x11d0] sm:$0xff]  ;;  %v708_v59 = vld [vmem:[%s2560_s30 + $0x11d8] sm:$0xff] }
 0x156   : > { %v709_v60 = vld [vmem:[%s2560_s30 + $0x11e0] sm:$0xff]  ;;  %1731 = vst [vmem:[%s2569_s25 + $0x11d0] sm:$0xff] %v707_v58  ;;  %1732 = vst [vmem:[%s2569_s25 + $0x11d8] sm:$0xff] %v708_v59  ;;  %v710_v61 = vld [vmem:[%s2560_s30 + $0x11e8] sm:$0xff] }
 0x157   : > { %1733 = vst [vmem:[%s2569_s25 + $0x11e0] sm:$0xff] %v709_v60  ;;  %v711_v62 = vld [vmem:[%s2560_s30 + $0x11f0] sm:$0xff]  ;;  %v712_v63 = vld [vmem:[%s2560_s30 + $0x11f8] sm:$0xff]  ;;  %1734 = vst [vmem:[%s2569_s25 + $0x11e8] sm:$0xff] %v710_v61 }
 0x158   : > { %1735 = vst [vmem:[%s2569_s25 + $0x11f0] sm:$0xff] %v711_v62  ;;  %1736 = vst [vmem:[%s2569_s25 + $0x11f8] sm:$0xff] %v712_v63  ;;  %v713_v0 = vld [vmem:[%s2560_s30 + $0x1200] sm:$0xff]  ;;  %v714_v1 = vld [vmem:[%s2560_s30 + $0x1208] sm:$0xff] }
 0x159   : > { %v715_v2 = vld [vmem:[%s2560_s30 + $0x1210] sm:$0xff]  ;;  %1737 = vst [vmem:[%s2569_s25 + $0x1200] sm:$0xff] %v713_v0  ;;  %1738 = vst [vmem:[%s2569_s25 + $0x1208] sm:$0xff] %v714_v1  ;;  %v716_v3 = vld [vmem:[%s2560_s30 + $0x1218] sm:$0xff] }
 0x15a   : > { %1739 = vst [vmem:[%s2569_s25 + $0x1210] sm:$0xff] %v715_v2  ;;  %v717_v4 = vld [vmem:[%s2560_s30 + $0x1220] sm:$0xff]  ;;  %v718_v5 = vld [vmem:[%s2560_s30 + $0x1228] sm:$0xff]  ;;  %1740 = vst [vmem:[%s2569_s25 + $0x1218] sm:$0xff] %v716_v3 }
 0x15b   : > { %1741 = vst [vmem:[%s2569_s25 + $0x1220] sm:$0xff] %v717_v4  ;;  %1742 = vst [vmem:[%s2569_s25 + $0x1228] sm:$0xff] %v718_v5  ;;  %v719_v6 = vld [vmem:[%s2560_s30 + $0x1230] sm:$0xff]  ;;  %v720_v7 = vld [vmem:[%s2560_s30 + $0x1238] sm:$0xff] }
 0x15c   : > { %v721_v8 = vld [vmem:[%s2560_s30 + $0x1240] sm:$0xff]  ;;  %1743 = vst [vmem:[%s2569_s25 + $0x1230] sm:$0xff] %v719_v6  ;;  %1744 = vst [vmem:[%s2569_s25 + $0x1238] sm:$0xff] %v720_v7  ;;  %v722_v9 = vld [vmem:[%s2560_s30 + $0x1248] sm:$0xff] }
 0x15d   : > { %1745 = vst [vmem:[%s2569_s25 + $0x1240] sm:$0xff] %v721_v8  ;;  %v723_v10 = vld [vmem:[%s2560_s30 + $0x1250] sm:$0xff]  ;;  %v724_v11 = vld [vmem:[%s2560_s30 + $0x1258] sm:$0xff]  ;;  %1746 = vst [vmem:[%s2569_s25 + $0x1248] sm:$0xff] %v722_v9 }
 0x15e   : > { %1747 = vst [vmem:[%s2569_s25 + $0x1250] sm:$0xff] %v723_v10  ;;  %1748 = vst [vmem:[%s2569_s25 + $0x1258] sm:$0xff] %v724_v11  ;;  %v725_v12 = vld [vmem:[%s2560_s30 + $0x1260] sm:$0xff]  ;;  %v726_v13 = vld [vmem:[%s2560_s30 + $0x1268] sm:$0xff] }
 0x15f   : > { %v727_v14 = vld [vmem:[%s2560_s30 + $0x1270] sm:$0xff]  ;;  %1749 = vst [vmem:[%s2569_s25 + $0x1260] sm:$0xff] %v725_v12  ;;  %1750 = vst [vmem:[%s2569_s25 + $0x1268] sm:$0xff] %v726_v13  ;;  %v728_v15 = vld [vmem:[%s2560_s30 + $0x1278] sm:$0xff] }
 0x160   : > { %1751 = vst [vmem:[%s2569_s25 + $0x1270] sm:$0xff] %v727_v14  ;;  %v729_v16 = vld [vmem:[%s2560_s30 + $0x1280] sm:$0xff]  ;;  %v730_v17 = vld [vmem:[%s2560_s30 + $0x1288] sm:$0xff]  ;;  %1752 = vst [vmem:[%s2569_s25 + $0x1278] sm:$0xff] %v728_v15 }
 0x161   : > { %1753 = vst [vmem:[%s2569_s25 + $0x1280] sm:$0xff] %v729_v16  ;;  %1754 = vst [vmem:[%s2569_s25 + $0x1288] sm:$0xff] %v730_v17  ;;  %v731_v18 = vld [vmem:[%s2560_s30 + $0x1290] sm:$0xff]  ;;  %v732_v19 = vld [vmem:[%s2560_s30 + $0x1298] sm:$0xff] }
 0x162   : > { %v733_v20 = vld [vmem:[%s2560_s30 + $0x12a0] sm:$0xff]  ;;  %1755 = vst [vmem:[%s2569_s25 + $0x1290] sm:$0xff] %v731_v18  ;;  %1756 = vst [vmem:[%s2569_s25 + $0x1298] sm:$0xff] %v732_v19  ;;  %v734_v21 = vld [vmem:[%s2560_s30 + $0x12a8] sm:$0xff] }
 0x163   : > { %1757 = vst [vmem:[%s2569_s25 + $0x12a0] sm:$0xff] %v733_v20  ;;  %v735_v22 = vld [vmem:[%s2560_s30 + $0x12b0] sm:$0xff]  ;;  %v736_v23 = vld [vmem:[%s2560_s30 + $0x12b8] sm:$0xff]  ;;  %1758 = vst [vmem:[%s2569_s25 + $0x12a8] sm:$0xff] %v734_v21 }
 0x164   : > { %1759 = vst [vmem:[%s2569_s25 + $0x12b0] sm:$0xff] %v735_v22  ;;  %1760 = vst [vmem:[%s2569_s25 + $0x12b8] sm:$0xff] %v736_v23  ;;  %v737_v24 = vld [vmem:[%s2560_s30 + $0x12c0] sm:$0xff]  ;;  %v738_v25 = vld [vmem:[%s2560_s30 + $0x12c8] sm:$0xff] }
 0x165   : > { %v739_v26 = vld [vmem:[%s2560_s30 + $0x12d0] sm:$0xff]  ;;  %1761 = vst [vmem:[%s2569_s25 + $0x12c0] sm:$0xff] %v737_v24  ;;  %1762 = vst [vmem:[%s2569_s25 + $0x12c8] sm:$0xff] %v738_v25  ;;  %v740_v27 = vld [vmem:[%s2560_s30 + $0x12d8] sm:$0xff] }
 0x166   : > { %1763 = vst [vmem:[%s2569_s25 + $0x12d0] sm:$0xff] %v739_v26  ;;  %v741_v28 = vld [vmem:[%s2560_s30 + $0x12e0] sm:$0xff]  ;;  %v742_v29 = vld [vmem:[%s2560_s30 + $0x12e8] sm:$0xff]  ;;  %1764 = vst [vmem:[%s2569_s25 + $0x12d8] sm:$0xff] %v740_v27 }
 0x167   : > { %1765 = vst [vmem:[%s2569_s25 + $0x12e0] sm:$0xff] %v741_v28  ;;  %1766 = vst [vmem:[%s2569_s25 + $0x12e8] sm:$0xff] %v742_v29  ;;  %v743_v30 = vld [vmem:[%s2560_s30 + $0x12f0] sm:$0xff]  ;;  %v744_v31 = vld [vmem:[%s2560_s30 + $0x12f8] sm:$0xff] }
 0x168   : > { %v745_v32 = vld [vmem:[%s2560_s30 + $0x1300] sm:$0xff]  ;;  %1767 = vst [vmem:[%s2569_s25 + $0x12f0] sm:$0xff] %v743_v30  ;;  %1768 = vst [vmem:[%s2569_s25 + $0x12f8] sm:$0xff] %v744_v31  ;;  %v746_v33 = vld [vmem:[%s2560_s30 + $0x1308] sm:$0xff] }
 0x169   : > { %1769 = vst [vmem:[%s2569_s25 + $0x1300] sm:$0xff] %v745_v32  ;;  %v747_v34 = vld [vmem:[%s2560_s30 + $0x1310] sm:$0xff]  ;;  %v748_v35 = vld [vmem:[%s2560_s30 + $0x1318] sm:$0xff]  ;;  %1770 = vst [vmem:[%s2569_s25 + $0x1308] sm:$0xff] %v746_v33 }
 0x16a   : > { %1771 = vst [vmem:[%s2569_s25 + $0x1310] sm:$0xff] %v747_v34  ;;  %1772 = vst [vmem:[%s2569_s25 + $0x1318] sm:$0xff] %v748_v35  ;;  %v749_v36 = vld [vmem:[%s2560_s30 + $0x1320] sm:$0xff]  ;;  %v750_v37 = vld [vmem:[%s2560_s30 + $0x1328] sm:$0xff] }
 0x16b   : > { %v751_v38 = vld [vmem:[%s2560_s30 + $0x1330] sm:$0xff]  ;;  %1773 = vst [vmem:[%s2569_s25 + $0x1320] sm:$0xff] %v749_v36  ;;  %1774 = vst [vmem:[%s2569_s25 + $0x1328] sm:$0xff] %v750_v37  ;;  %v752_v39 = vld [vmem:[%s2560_s30 + $0x1338] sm:$0xff] }
 0x16c   : > { %1775 = vst [vmem:[%s2569_s25 + $0x1330] sm:$0xff] %v751_v38  ;;  %v753_v40 = vld [vmem:[%s2560_s30 + $0x1340] sm:$0xff]  ;;  %v754_v41 = vld [vmem:[%s2560_s30 + $0x1348] sm:$0xff]  ;;  %1776 = vst [vmem:[%s2569_s25 + $0x1338] sm:$0xff] %v752_v39 }
 0x16d   : > { %1777 = vst [vmem:[%s2569_s25 + $0x1340] sm:$0xff] %v753_v40  ;;  %1778 = vst [vmem:[%s2569_s25 + $0x1348] sm:$0xff] %v754_v41  ;;  %v755_v42 = vld [vmem:[%s2560_s30 + $0x1350] sm:$0xff]  ;;  %v756_v43 = vld [vmem:[%s2560_s30 + $0x1358] sm:$0xff] }
 0x16e   : > { %v757_v44 = vld [vmem:[%s2560_s30 + $0x1360] sm:$0xff]  ;;  %1779 = vst [vmem:[%s2569_s25 + $0x1350] sm:$0xff] %v755_v42  ;;  %1780 = vst [vmem:[%s2569_s25 + $0x1358] sm:$0xff] %v756_v43  ;;  %v758_v45 = vld [vmem:[%s2560_s30 + $0x1368] sm:$0xff] }
 0x16f   : > { %1781 = vst [vmem:[%s2569_s25 + $0x1360] sm:$0xff] %v757_v44  ;;  %v759_v46 = vld [vmem:[%s2560_s30 + $0x1370] sm:$0xff]  ;;  %v760_v47 = vld [vmem:[%s2560_s30 + $0x1378] sm:$0xff]  ;;  %1782 = vst [vmem:[%s2569_s25 + $0x1368] sm:$0xff] %v758_v45 }
 0x170   : > { %1783 = vst [vmem:[%s2569_s25 + $0x1370] sm:$0xff] %v759_v46  ;;  %1784 = vst [vmem:[%s2569_s25 + $0x1378] sm:$0xff] %v760_v47  ;;  %v761_v48 = vld [vmem:[%s2560_s30 + $0x1380] sm:$0xff]  ;;  %v762_v49 = vld [vmem:[%s2560_s30 + $0x1388] sm:$0xff] }
 0x171   : > { %v763_v50 = vld [vmem:[%s2560_s30 + $0x1390] sm:$0xff]  ;;  %1785 = vst [vmem:[%s2569_s25 + $0x1380] sm:$0xff] %v761_v48  ;;  %1786 = vst [vmem:[%s2569_s25 + $0x1388] sm:$0xff] %v762_v49  ;;  %v764_v51 = vld [vmem:[%s2560_s30 + $0x1398] sm:$0xff] }
 0x172   : > { %1787 = vst [vmem:[%s2569_s25 + $0x1390] sm:$0xff] %v763_v50  ;;  %v765_v52 = vld [vmem:[%s2560_s30 + $0x13a0] sm:$0xff]  ;;  %v766_v53 = vld [vmem:[%s2560_s30 + $0x13a8] sm:$0xff]  ;;  %1788 = vst [vmem:[%s2569_s25 + $0x1398] sm:$0xff] %v764_v51 }
 0x173   : > { %1789 = vst [vmem:[%s2569_s25 + $0x13a0] sm:$0xff] %v765_v52  ;;  %1790 = vst [vmem:[%s2569_s25 + $0x13a8] sm:$0xff] %v766_v53  ;;  %v767_v54 = vld [vmem:[%s2560_s30 + $0x13b0] sm:$0xff]  ;;  %v768_v55 = vld [vmem:[%s2560_s30 + $0x13b8] sm:$0xff] }
 0x174   : > { %v769_v56 = vld [vmem:[%s2560_s30 + $0x13c0] sm:$0xff]  ;;  %1791 = vst [vmem:[%s2569_s25 + $0x13b0] sm:$0xff] %v767_v54  ;;  %1792 = vst [vmem:[%s2569_s25 + $0x13b8] sm:$0xff] %v768_v55  ;;  %v770_v57 = vld [vmem:[%s2560_s30 + $0x13c8] sm:$0xff] }
 0x175   : > { %1793 = vst [vmem:[%s2569_s25 + $0x13c0] sm:$0xff] %v769_v56  ;;  %v771_v58 = vld [vmem:[%s2560_s30 + $0x13d0] sm:$0xff]  ;;  %v772_v59 = vld [vmem:[%s2560_s30 + $0x13d8] sm:$0xff]  ;;  %1794 = vst [vmem:[%s2569_s25 + $0x13c8] sm:$0xff] %v770_v57 }
 0x176   : > { %1795 = vst [vmem:[%s2569_s25 + $0x13d0] sm:$0xff] %v771_v58  ;;  %1796 = vst [vmem:[%s2569_s25 + $0x13d8] sm:$0xff] %v772_v59  ;;  %v773_v60 = vld [vmem:[%s2560_s30 + $0x13e0] sm:$0xff]  ;;  %v774_v61 = vld [vmem:[%s2560_s30 + $0x13e8] sm:$0xff] }
 0x177   : > { %v775_v62 = vld [vmem:[%s2560_s30 + $0x13f0] sm:$0xff]  ;;  %1797 = vst [vmem:[%s2569_s25 + $0x13e0] sm:$0xff] %v773_v60  ;;  %1798 = vst [vmem:[%s2569_s25 + $0x13e8] sm:$0xff] %v774_v61  ;;  %v776_v63 = vld [vmem:[%s2560_s30 + $0x13f8] sm:$0xff] }
 0x178   : > { %1799 = vst [vmem:[%s2569_s25 + $0x13f0] sm:$0xff] %v775_v62  ;;  %v777_v0 = vld [vmem:[%s2560_s30 + $0x1400] sm:$0xff]  ;;  %v778_v1 = vld [vmem:[%s2560_s30 + $0x1408] sm:$0xff]  ;;  %1800 = vst [vmem:[%s2569_s25 + $0x13f8] sm:$0xff] %v776_v63 }
 0x179   : > { %1801 = vst [vmem:[%s2569_s25 + $0x1400] sm:$0xff] %v777_v0  ;;  %1802 = vst [vmem:[%s2569_s25 + $0x1408] sm:$0xff] %v778_v1  ;;  %v779_v2 = vld [vmem:[%s2560_s30 + $0x1410] sm:$0xff]  ;;  %v780_v3 = vld [vmem:[%s2560_s30 + $0x1418] sm:$0xff] }
 0x17a   : > { %v781_v4 = vld [vmem:[%s2560_s30 + $0x1420] sm:$0xff]  ;;  %1803 = vst [vmem:[%s2569_s25 + $0x1410] sm:$0xff] %v779_v2  ;;  %1804 = vst [vmem:[%s2569_s25 + $0x1418] sm:$0xff] %v780_v3  ;;  %v782_v5 = vld [vmem:[%s2560_s30 + $0x1428] sm:$0xff] }
 0x17b   : > { %1805 = vst [vmem:[%s2569_s25 + $0x1420] sm:$0xff] %v781_v4  ;;  %v783_v6 = vld [vmem:[%s2560_s30 + $0x1430] sm:$0xff]  ;;  %v784_v7 = vld [vmem:[%s2560_s30 + $0x1438] sm:$0xff]  ;;  %1806 = vst [vmem:[%s2569_s25 + $0x1428] sm:$0xff] %v782_v5 }
 0x17c   : > { %1807 = vst [vmem:[%s2569_s25 + $0x1430] sm:$0xff] %v783_v6  ;;  %1808 = vst [vmem:[%s2569_s25 + $0x1438] sm:$0xff] %v784_v7  ;;  %v785_v8 = vld [vmem:[%s2560_s30 + $0x1440] sm:$0xff]  ;;  %v786_v9 = vld [vmem:[%s2560_s30 + $0x1448] sm:$0xff] }
 0x17d   : > { %v787_v10 = vld [vmem:[%s2560_s30 + $0x1450] sm:$0xff]  ;;  %1809 = vst [vmem:[%s2569_s25 + $0x1440] sm:$0xff] %v785_v8  ;;  %1810 = vst [vmem:[%s2569_s25 + $0x1448] sm:$0xff] %v786_v9  ;;  %v788_v11 = vld [vmem:[%s2560_s30 + $0x1458] sm:$0xff] }
 0x17e   : > { %1811 = vst [vmem:[%s2569_s25 + $0x1450] sm:$0xff] %v787_v10  ;;  %v789_v12 = vld [vmem:[%s2560_s30 + $0x1460] sm:$0xff]  ;;  %v790_v13 = vld [vmem:[%s2560_s30 + $0x1468] sm:$0xff]  ;;  %1812 = vst [vmem:[%s2569_s25 + $0x1458] sm:$0xff] %v788_v11 }
 0x17f   : > { %1813 = vst [vmem:[%s2569_s25 + $0x1460] sm:$0xff] %v789_v12  ;;  %1814 = vst [vmem:[%s2569_s25 + $0x1468] sm:$0xff] %v790_v13  ;;  %v791_v14 = vld [vmem:[%s2560_s30 + $0x1470] sm:$0xff]  ;;  %v792_v15 = vld [vmem:[%s2560_s30 + $0x1478] sm:$0xff] }
 0x180   : > { %v793_v16 = vld [vmem:[%s2560_s30 + $0x1480] sm:$0xff]  ;;  %1815 = vst [vmem:[%s2569_s25 + $0x1470] sm:$0xff] %v791_v14  ;;  %1816 = vst [vmem:[%s2569_s25 + $0x1478] sm:$0xff] %v792_v15  ;;  %v794_v17 = vld [vmem:[%s2560_s30 + $0x1488] sm:$0xff] }
 0x181   : > { %1817 = vst [vmem:[%s2569_s25 + $0x1480] sm:$0xff] %v793_v16  ;;  %v795_v18 = vld [vmem:[%s2560_s30 + $0x1490] sm:$0xff]  ;;  %v796_v19 = vld [vmem:[%s2560_s30 + $0x1498] sm:$0xff]  ;;  %1818 = vst [vmem:[%s2569_s25 + $0x1488] sm:$0xff] %v794_v17 }
 0x182   : > { %1819 = vst [vmem:[%s2569_s25 + $0x1490] sm:$0xff] %v795_v18  ;;  %1820 = vst [vmem:[%s2569_s25 + $0x1498] sm:$0xff] %v796_v19  ;;  %v797_v20 = vld [vmem:[%s2560_s30 + $0x14a0] sm:$0xff]  ;;  %v798_v21 = vld [vmem:[%s2560_s30 + $0x14a8] sm:$0xff] }
 0x183   : > { %v799_v22 = vld [vmem:[%s2560_s30 + $0x14b0] sm:$0xff]  ;;  %1821 = vst [vmem:[%s2569_s25 + $0x14a0] sm:$0xff] %v797_v20  ;;  %1822 = vst [vmem:[%s2569_s25 + $0x14a8] sm:$0xff] %v798_v21  ;;  %v800_v23 = vld [vmem:[%s2560_s30 + $0x14b8] sm:$0xff] }
 0x184   : > { %1823 = vst [vmem:[%s2569_s25 + $0x14b0] sm:$0xff] %v799_v22  ;;  %v801_v24 = vld [vmem:[%s2560_s30 + $0x14c0] sm:$0xff]  ;;  %v802_v25 = vld [vmem:[%s2560_s30 + $0x14c8] sm:$0xff]  ;;  %1824 = vst [vmem:[%s2569_s25 + $0x14b8] sm:$0xff] %v800_v23 }
 0x185   : > { %1825 = vst [vmem:[%s2569_s25 + $0x14c0] sm:$0xff] %v801_v24  ;;  %1826 = vst [vmem:[%s2569_s25 + $0x14c8] sm:$0xff] %v802_v25  ;;  %v803_v26 = vld [vmem:[%s2560_s30 + $0x14d0] sm:$0xff]  ;;  %v804_v27 = vld [vmem:[%s2560_s30 + $0x14d8] sm:$0xff] }
 0x186   : > { %v805_v28 = vld [vmem:[%s2560_s30 + $0x14e0] sm:$0xff]  ;;  %1827 = vst [vmem:[%s2569_s25 + $0x14d0] sm:$0xff] %v803_v26  ;;  %1828 = vst [vmem:[%s2569_s25 + $0x14d8] sm:$0xff] %v804_v27  ;;  %v806_v29 = vld [vmem:[%s2560_s30 + $0x14e8] sm:$0xff] }
 0x187   : > { %1829 = vst [vmem:[%s2569_s25 + $0x14e0] sm:$0xff] %v805_v28  ;;  %v807_v30 = vld [vmem:[%s2560_s30 + $0x14f0] sm:$0xff]  ;;  %v808_v31 = vld [vmem:[%s2560_s30 + $0x14f8] sm:$0xff]  ;;  %1830 = vst [vmem:[%s2569_s25 + $0x14e8] sm:$0xff] %v806_v29 }
 0x188   : > { %1831 = vst [vmem:[%s2569_s25 + $0x14f0] sm:$0xff] %v807_v30  ;;  %1832 = vst [vmem:[%s2569_s25 + $0x14f8] sm:$0xff] %v808_v31  ;;  %v809_v32 = vld [vmem:[%s2560_s30 + $0x1500] sm:$0xff]  ;;  %v810_v33 = vld [vmem:[%s2560_s30 + $0x1508] sm:$0xff] }
 0x189   : > { %v811_v34 = vld [vmem:[%s2560_s30 + $0x1510] sm:$0xff]  ;;  %1833 = vst [vmem:[%s2569_s25 + $0x1500] sm:$0xff] %v809_v32  ;;  %1834 = vst [vmem:[%s2569_s25 + $0x1508] sm:$0xff] %v810_v33  ;;  %v812_v35 = vld [vmem:[%s2560_s30 + $0x1518] sm:$0xff] }
 0x18a   : > { %1835 = vst [vmem:[%s2569_s25 + $0x1510] sm:$0xff] %v811_v34  ;;  %v813_v36 = vld [vmem:[%s2560_s30 + $0x1520] sm:$0xff]  ;;  %v814_v37 = vld [vmem:[%s2560_s30 + $0x1528] sm:$0xff]  ;;  %1836 = vst [vmem:[%s2569_s25 + $0x1518] sm:$0xff] %v812_v35 }
 0x18b   : > { %1837 = vst [vmem:[%s2569_s25 + $0x1520] sm:$0xff] %v813_v36  ;;  %1838 = vst [vmem:[%s2569_s25 + $0x1528] sm:$0xff] %v814_v37  ;;  %v815_v38 = vld [vmem:[%s2560_s30 + $0x1530] sm:$0xff]  ;;  %v816_v39 = vld [vmem:[%s2560_s30 + $0x1538] sm:$0xff] }
 0x18c   : > { %v817_v40 = vld [vmem:[%s2560_s30 + $0x1540] sm:$0xff]  ;;  %1839 = vst [vmem:[%s2569_s25 + $0x1530] sm:$0xff] %v815_v38  ;;  %1840 = vst [vmem:[%s2569_s25 + $0x1538] sm:$0xff] %v816_v39  ;;  %v818_v41 = vld [vmem:[%s2560_s30 + $0x1548] sm:$0xff] }
 0x18d   : > { %1841 = vst [vmem:[%s2569_s25 + $0x1540] sm:$0xff] %v817_v40  ;;  %v819_v42 = vld [vmem:[%s2560_s30 + $0x1550] sm:$0xff]  ;;  %v820_v43 = vld [vmem:[%s2560_s30 + $0x1558] sm:$0xff]  ;;  %1842 = vst [vmem:[%s2569_s25 + $0x1548] sm:$0xff] %v818_v41 }
 0x18e   : > { %1843 = vst [vmem:[%s2569_s25 + $0x1550] sm:$0xff] %v819_v42  ;;  %1844 = vst [vmem:[%s2569_s25 + $0x1558] sm:$0xff] %v820_v43  ;;  %v821_v44 = vld [vmem:[%s2560_s30 + $0x1560] sm:$0xff]  ;;  %v822_v45 = vld [vmem:[%s2560_s30 + $0x1568] sm:$0xff] }
 0x18f   : > { %v823_v46 = vld [vmem:[%s2560_s30 + $0x1570] sm:$0xff]  ;;  %1845 = vst [vmem:[%s2569_s25 + $0x1560] sm:$0xff] %v821_v44  ;;  %1846 = vst [vmem:[%s2569_s25 + $0x1568] sm:$0xff] %v822_v45  ;;  %v824_v47 = vld [vmem:[%s2560_s30 + $0x1578] sm:$0xff] }
 0x190   : > { %1847 = vst [vmem:[%s2569_s25 + $0x1570] sm:$0xff] %v823_v46  ;;  %v825_v48 = vld [vmem:[%s2560_s30 + $0x1580] sm:$0xff]  ;;  %v826_v49 = vld [vmem:[%s2560_s30 + $0x1588] sm:$0xff]  ;;  %1848 = vst [vmem:[%s2569_s25 + $0x1578] sm:$0xff] %v824_v47 }
 0x191   : > { %1849 = vst [vmem:[%s2569_s25 + $0x1580] sm:$0xff] %v825_v48  ;;  %1850 = vst [vmem:[%s2569_s25 + $0x1588] sm:$0xff] %v826_v49  ;;  %v827_v50 = vld [vmem:[%s2560_s30 + $0x1590] sm:$0xff]  ;;  %v828_v51 = vld [vmem:[%s2560_s30 + $0x1598] sm:$0xff] }
 0x192   : > { %v829_v52 = vld [vmem:[%s2560_s30 + $0x15a0] sm:$0xff]  ;;  %1851 = vst [vmem:[%s2569_s25 + $0x1590] sm:$0xff] %v827_v50  ;;  %1852 = vst [vmem:[%s2569_s25 + $0x1598] sm:$0xff] %v828_v51  ;;  %v830_v53 = vld [vmem:[%s2560_s30 + $0x15a8] sm:$0xff] }
 0x193   : > { %1853 = vst [vmem:[%s2569_s25 + $0x15a0] sm:$0xff] %v829_v52  ;;  %v831_v54 = vld [vmem:[%s2560_s30 + $0x15b0] sm:$0xff]  ;;  %v832_v55 = vld [vmem:[%s2560_s30 + $0x15b8] sm:$0xff]  ;;  %1854 = vst [vmem:[%s2569_s25 + $0x15a8] sm:$0xff] %v830_v53 }
 0x194   : > { %1855 = vst [vmem:[%s2569_s25 + $0x15b0] sm:$0xff] %v831_v54  ;;  %1856 = vst [vmem:[%s2569_s25 + $0x15b8] sm:$0xff] %v832_v55  ;;  %v833_v56 = vld [vmem:[%s2560_s30 + $0x15c0] sm:$0xff]  ;;  %v834_v57 = vld [vmem:[%s2560_s30 + $0x15c8] sm:$0xff] }
 0x195   : > { %v835_v58 = vld [vmem:[%s2560_s30 + $0x15d0] sm:$0xff]  ;;  %1857 = vst [vmem:[%s2569_s25 + $0x15c0] sm:$0xff] %v833_v56  ;;  %1858 = vst [vmem:[%s2569_s25 + $0x15c8] sm:$0xff] %v834_v57  ;;  %v836_v59 = vld [vmem:[%s2560_s30 + $0x15d8] sm:$0xff] }
 0x196   : > { %1859 = vst [vmem:[%s2569_s25 + $0x15d0] sm:$0xff] %v835_v58  ;;  %v837_v60 = vld [vmem:[%s2560_s30 + $0x15e0] sm:$0xff]  ;;  %v838_v61 = vld [vmem:[%s2560_s30 + $0x15e8] sm:$0xff]  ;;  %1860 = vst [vmem:[%s2569_s25 + $0x15d8] sm:$0xff] %v836_v59 }
 0x197   : > { %1861 = vst [vmem:[%s2569_s25 + $0x15e0] sm:$0xff] %v837_v60  ;;  %1862 = vst [vmem:[%s2569_s25 + $0x15e8] sm:$0xff] %v838_v61  ;;  %v839_v62 = vld [vmem:[%s2560_s30 + $0x15f0] sm:$0xff]  ;;  %v840_v63 = vld [vmem:[%s2560_s30 + $0x15f8] sm:$0xff] }
 0x198   : > { %v841_v0 = vld [vmem:[%s2560_s30 + $0x1600] sm:$0xff]  ;;  %1863 = vst [vmem:[%s2569_s25 + $0x15f0] sm:$0xff] %v839_v62  ;;  %1864 = vst [vmem:[%s2569_s25 + $0x15f8] sm:$0xff] %v840_v63  ;;  %v842_v1 = vld [vmem:[%s2560_s30 + $0x1608] sm:$0xff] }
 0x199   : > { %1865 = vst [vmem:[%s2569_s25 + $0x1600] sm:$0xff] %v841_v0  ;;  %v843_v2 = vld [vmem:[%s2560_s30 + $0x1610] sm:$0xff]  ;;  %v844_v3 = vld [vmem:[%s2560_s30 + $0x1618] sm:$0xff]  ;;  %1866 = vst [vmem:[%s2569_s25 + $0x1608] sm:$0xff] %v842_v1 }
 0x19a   : > { %1867 = vst [vmem:[%s2569_s25 + $0x1610] sm:$0xff] %v843_v2  ;;  %1868 = vst [vmem:[%s2569_s25 + $0x1618] sm:$0xff] %v844_v3  ;;  %v845_v4 = vld [vmem:[%s2560_s30 + $0x1620] sm:$0xff]  ;;  %v846_v5 = vld [vmem:[%s2560_s30 + $0x1628] sm:$0xff] }
 0x19b   : > { %v847_v6 = vld [vmem:[%s2560_s30 + $0x1630] sm:$0xff]  ;;  %1869 = vst [vmem:[%s2569_s25 + $0x1620] sm:$0xff] %v845_v4  ;;  %1870 = vst [vmem:[%s2569_s25 + $0x1628] sm:$0xff] %v846_v5  ;;  %v848_v7 = vld [vmem:[%s2560_s30 + $0x1638] sm:$0xff] }
 0x19c   : > { %1871 = vst [vmem:[%s2569_s25 + $0x1630] sm:$0xff] %v847_v6  ;;  %v849_v8 = vld [vmem:[%s2560_s30 + $0x1640] sm:$0xff]  ;;  %v850_v9 = vld [vmem:[%s2560_s30 + $0x1648] sm:$0xff]  ;;  %1872 = vst [vmem:[%s2569_s25 + $0x1638] sm:$0xff] %v848_v7 }
 0x19d   : > { %1873 = vst [vmem:[%s2569_s25 + $0x1640] sm:$0xff] %v849_v8  ;;  %1874 = vst [vmem:[%s2569_s25 + $0x1648] sm:$0xff] %v850_v9  ;;  %v851_v10 = vld [vmem:[%s2560_s30 + $0x1650] sm:$0xff]  ;;  %v852_v11 = vld [vmem:[%s2560_s30 + $0x1658] sm:$0xff] }
 0x19e   : > { %v853_v12 = vld [vmem:[%s2560_s30 + $0x1660] sm:$0xff]  ;;  %1875 = vst [vmem:[%s2569_s25 + $0x1650] sm:$0xff] %v851_v10  ;;  %1876 = vst [vmem:[%s2569_s25 + $0x1658] sm:$0xff] %v852_v11  ;;  %v854_v13 = vld [vmem:[%s2560_s30 + $0x1668] sm:$0xff] }
 0x19f   : > { %1877 = vst [vmem:[%s2569_s25 + $0x1660] sm:$0xff] %v853_v12  ;;  %v855_v14 = vld [vmem:[%s2560_s30 + $0x1670] sm:$0xff]  ;;  %v856_v15 = vld [vmem:[%s2560_s30 + $0x1678] sm:$0xff]  ;;  %1878 = vst [vmem:[%s2569_s25 + $0x1668] sm:$0xff] %v854_v13 }
 0x1a0   : > { %1879 = vst [vmem:[%s2569_s25 + $0x1670] sm:$0xff] %v855_v14  ;;  %1880 = vst [vmem:[%s2569_s25 + $0x1678] sm:$0xff] %v856_v15  ;;  %v857_v16 = vld [vmem:[%s2560_s30 + $0x1680] sm:$0xff]  ;;  %v858_v17 = vld [vmem:[%s2560_s30 + $0x1688] sm:$0xff] }
 0x1a1   : > { %v859_v18 = vld [vmem:[%s2560_s30 + $0x1690] sm:$0xff]  ;;  %1881 = vst [vmem:[%s2569_s25 + $0x1680] sm:$0xff] %v857_v16  ;;  %1882 = vst [vmem:[%s2569_s25 + $0x1688] sm:$0xff] %v858_v17  ;;  %v860_v19 = vld [vmem:[%s2560_s30 + $0x1698] sm:$0xff] }
 0x1a2   : > { %1883 = vst [vmem:[%s2569_s25 + $0x1690] sm:$0xff] %v859_v18  ;;  %v861_v20 = vld [vmem:[%s2560_s30 + $0x16a0] sm:$0xff]  ;;  %v862_v21 = vld [vmem:[%s2560_s30 + $0x16a8] sm:$0xff]  ;;  %1884 = vst [vmem:[%s2569_s25 + $0x1698] sm:$0xff] %v860_v19 }
 0x1a3   : > { %1885 = vst [vmem:[%s2569_s25 + $0x16a0] sm:$0xff] %v861_v20  ;;  %1886 = vst [vmem:[%s2569_s25 + $0x16a8] sm:$0xff] %v862_v21  ;;  %v863_v22 = vld [vmem:[%s2560_s30 + $0x16b0] sm:$0xff]  ;;  %v864_v23 = vld [vmem:[%s2560_s30 + $0x16b8] sm:$0xff] }
 0x1a4   : > { %v865_v24 = vld [vmem:[%s2560_s30 + $0x16c0] sm:$0xff]  ;;  %1887 = vst [vmem:[%s2569_s25 + $0x16b0] sm:$0xff] %v863_v22  ;;  %1888 = vst [vmem:[%s2569_s25 + $0x16b8] sm:$0xff] %v864_v23  ;;  %v866_v25 = vld [vmem:[%s2560_s30 + $0x16c8] sm:$0xff] }
 0x1a5   : > { %1889 = vst [vmem:[%s2569_s25 + $0x16c0] sm:$0xff] %v865_v24  ;;  %v867_v26 = vld [vmem:[%s2560_s30 + $0x16d0] sm:$0xff]  ;;  %v868_v27 = vld [vmem:[%s2560_s30 + $0x16d8] sm:$0xff]  ;;  %1890 = vst [vmem:[%s2569_s25 + $0x16c8] sm:$0xff] %v866_v25 }
 0x1a6   : > { %1891 = vst [vmem:[%s2569_s25 + $0x16d0] sm:$0xff] %v867_v26  ;;  %1892 = vst [vmem:[%s2569_s25 + $0x16d8] sm:$0xff] %v868_v27  ;;  %v869_v28 = vld [vmem:[%s2560_s30 + $0x16e0] sm:$0xff]  ;;  %v870_v29 = vld [vmem:[%s2560_s30 + $0x16e8] sm:$0xff] }
 0x1a7   : > { %v871_v30 = vld [vmem:[%s2560_s30 + $0x16f0] sm:$0xff]  ;;  %1893 = vst [vmem:[%s2569_s25 + $0x16e0] sm:$0xff] %v869_v28  ;;  %1894 = vst [vmem:[%s2569_s25 + $0x16e8] sm:$0xff] %v870_v29  ;;  %v872_v31 = vld [vmem:[%s2560_s30 + $0x16f8] sm:$0xff] }
 0x1a8   : > { %1895 = vst [vmem:[%s2569_s25 + $0x16f0] sm:$0xff] %v871_v30  ;;  %v873_v32 = vld [vmem:[%s2560_s30 + $0x1700] sm:$0xff]  ;;  %v874_v33 = vld [vmem:[%s2560_s30 + $0x1708] sm:$0xff]  ;;  %1896 = vst [vmem:[%s2569_s25 + $0x16f8] sm:$0xff] %v872_v31 }
 0x1a9   : > { %1897 = vst [vmem:[%s2569_s25 + $0x1700] sm:$0xff] %v873_v32  ;;  %1898 = vst [vmem:[%s2569_s25 + $0x1708] sm:$0xff] %v874_v33  ;;  %v875_v34 = vld [vmem:[%s2560_s30 + $0x1710] sm:$0xff]  ;;  %v876_v35 = vld [vmem:[%s2560_s30 + $0x1718] sm:$0xff] }
 0x1aa   : > { %v877_v36 = vld [vmem:[%s2560_s30 + $0x1720] sm:$0xff]  ;;  %1899 = vst [vmem:[%s2569_s25 + $0x1710] sm:$0xff] %v875_v34  ;;  %1900 = vst [vmem:[%s2569_s25 + $0x1718] sm:$0xff] %v876_v35  ;;  %v878_v37 = vld [vmem:[%s2560_s30 + $0x1728] sm:$0xff] }
 0x1ab   : > { %1901 = vst [vmem:[%s2569_s25 + $0x1720] sm:$0xff] %v877_v36  ;;  %v879_v38 = vld [vmem:[%s2560_s30 + $0x1730] sm:$0xff]  ;;  %v880_v39 = vld [vmem:[%s2560_s30 + $0x1738] sm:$0xff]  ;;  %1902 = vst [vmem:[%s2569_s25 + $0x1728] sm:$0xff] %v878_v37 }
 0x1ac   : > { %1903 = vst [vmem:[%s2569_s25 + $0x1730] sm:$0xff] %v879_v38  ;;  %1904 = vst [vmem:[%s2569_s25 + $0x1738] sm:$0xff] %v880_v39  ;;  %v881_v40 = vld [vmem:[%s2560_s30 + $0x1740] sm:$0xff]  ;;  %v882_v41 = vld [vmem:[%s2560_s30 + $0x1748] sm:$0xff] }
 0x1ad   : > { %v883_v42 = vld [vmem:[%s2560_s30 + $0x1750] sm:$0xff]  ;;  %1905 = vst [vmem:[%s2569_s25 + $0x1740] sm:$0xff] %v881_v40  ;;  %1906 = vst [vmem:[%s2569_s25 + $0x1748] sm:$0xff] %v882_v41  ;;  %v884_v43 = vld [vmem:[%s2560_s30 + $0x1758] sm:$0xff] }
 0x1ae   : > { %1907 = vst [vmem:[%s2569_s25 + $0x1750] sm:$0xff] %v883_v42  ;;  %v885_v44 = vld [vmem:[%s2560_s30 + $0x1760] sm:$0xff]  ;;  %v886_v45 = vld [vmem:[%s2560_s30 + $0x1768] sm:$0xff]  ;;  %1908 = vst [vmem:[%s2569_s25 + $0x1758] sm:$0xff] %v884_v43 }
 0x1af   : > { %1909 = vst [vmem:[%s2569_s25 + $0x1760] sm:$0xff] %v885_v44  ;;  %1910 = vst [vmem:[%s2569_s25 + $0x1768] sm:$0xff] %v886_v45  ;;  %v887_v46 = vld [vmem:[%s2560_s30 + $0x1770] sm:$0xff]  ;;  %v888_v47 = vld [vmem:[%s2560_s30 + $0x1778] sm:$0xff] }
 0x1b0   : > { %v889_v48 = vld [vmem:[%s2560_s30 + $0x1780] sm:$0xff]  ;;  %1911 = vst [vmem:[%s2569_s25 + $0x1770] sm:$0xff] %v887_v46  ;;  %1912 = vst [vmem:[%s2569_s25 + $0x1778] sm:$0xff] %v888_v47  ;;  %v890_v49 = vld [vmem:[%s2560_s30 + $0x1788] sm:$0xff] }
 0x1b1   : > { %1913 = vst [vmem:[%s2569_s25 + $0x1780] sm:$0xff] %v889_v48  ;;  %v891_v50 = vld [vmem:[%s2560_s30 + $0x1790] sm:$0xff]  ;;  %v892_v51 = vld [vmem:[%s2560_s30 + $0x1798] sm:$0xff]  ;;  %1914 = vst [vmem:[%s2569_s25 + $0x1788] sm:$0xff] %v890_v49 }
 0x1b2   : > { %1915 = vst [vmem:[%s2569_s25 + $0x1790] sm:$0xff] %v891_v50  ;;  %1916 = vst [vmem:[%s2569_s25 + $0x1798] sm:$0xff] %v892_v51  ;;  %v893_v52 = vld [vmem:[%s2560_s30 + $0x17a0] sm:$0xff]  ;;  %v894_v53 = vld [vmem:[%s2560_s30 + $0x17a8] sm:$0xff] }
 0x1b3   : > { %v895_v54 = vld [vmem:[%s2560_s30 + $0x17b0] sm:$0xff]  ;;  %1917 = vst [vmem:[%s2569_s25 + $0x17a0] sm:$0xff] %v893_v52  ;;  %1918 = vst [vmem:[%s2569_s25 + $0x17a8] sm:$0xff] %v894_v53  ;;  %v896_v55 = vld [vmem:[%s2560_s30 + $0x17b8] sm:$0xff] }
 0x1b4   : > { %1919 = vst [vmem:[%s2569_s25 + $0x17b0] sm:$0xff] %v895_v54  ;;  %v897_v56 = vld [vmem:[%s2560_s30 + $0x17c0] sm:$0xff]  ;;  %v898_v57 = vld [vmem:[%s2560_s30 + $0x17c8] sm:$0xff]  ;;  %1920 = vst [vmem:[%s2569_s25 + $0x17b8] sm:$0xff] %v896_v55 }
 0x1b5   : > { %1921 = vst [vmem:[%s2569_s25 + $0x17c0] sm:$0xff] %v897_v56  ;;  %1922 = vst [vmem:[%s2569_s25 + $0x17c8] sm:$0xff] %v898_v57  ;;  %v899_v58 = vld [vmem:[%s2560_s30 + $0x17d0] sm:$0xff]  ;;  %v900_v59 = vld [vmem:[%s2560_s30 + $0x17d8] sm:$0xff] }
 0x1b6   : > { %v901_v60 = vld [vmem:[%s2560_s30 + $0x17e0] sm:$0xff]  ;;  %1923 = vst [vmem:[%s2569_s25 + $0x17d0] sm:$0xff] %v899_v58  ;;  %1924 = vst [vmem:[%s2569_s25 + $0x17d8] sm:$0xff] %v900_v59  ;;  %v902_v61 = vld [vmem:[%s2560_s30 + $0x17e8] sm:$0xff] }
 0x1b7   : > { %1925 = vst [vmem:[%s2569_s25 + $0x17e0] sm:$0xff] %v901_v60  ;;  %v903_v62 = vld [vmem:[%s2560_s30 + $0x17f0] sm:$0xff]  ;;  %v904_v63 = vld [vmem:[%s2560_s30 + $0x17f8] sm:$0xff]  ;;  %1926 = vst [vmem:[%s2569_s25 + $0x17e8] sm:$0xff] %v902_v61 }
 0x1b8   : > { %1927 = vst [vmem:[%s2569_s25 + $0x17f0] sm:$0xff] %v903_v62  ;;  %1928 = vst [vmem:[%s2569_s25 + $0x17f8] sm:$0xff] %v904_v63  ;;  %v905_v0 = vld [vmem:[%s2560_s30 + $0x1800] sm:$0xff]  ;;  %v906_v1 = vld [vmem:[%s2560_s30 + $0x1808] sm:$0xff] }
 0x1b9   : > { %v907_v2 = vld [vmem:[%s2560_s30 + $0x1810] sm:$0xff]  ;;  %1929 = vst [vmem:[%s2569_s25 + $0x1800] sm:$0xff] %v905_v0  ;;  %1930 = vst [vmem:[%s2569_s25 + $0x1808] sm:$0xff] %v906_v1  ;;  %v908_v3 = vld [vmem:[%s2560_s30 + $0x1818] sm:$0xff] }
 0x1ba   : > { %1931 = vst [vmem:[%s2569_s25 + $0x1810] sm:$0xff] %v907_v2  ;;  %v909_v4 = vld [vmem:[%s2560_s30 + $0x1820] sm:$0xff]  ;;  %v910_v5 = vld [vmem:[%s2560_s30 + $0x1828] sm:$0xff]  ;;  %1932 = vst [vmem:[%s2569_s25 + $0x1818] sm:$0xff] %v908_v3 }
 0x1bb   : > { %1933 = vst [vmem:[%s2569_s25 + $0x1820] sm:$0xff] %v909_v4  ;;  %1934 = vst [vmem:[%s2569_s25 + $0x1828] sm:$0xff] %v910_v5  ;;  %v911_v6 = vld [vmem:[%s2560_s30 + $0x1830] sm:$0xff]  ;;  %v912_v7 = vld [vmem:[%s2560_s30 + $0x1838] sm:$0xff] }
 0x1bc   : > { %v913_v8 = vld [vmem:[%s2560_s30 + $0x1840] sm:$0xff]  ;;  %1935 = vst [vmem:[%s2569_s25 + $0x1830] sm:$0xff] %v911_v6  ;;  %1936 = vst [vmem:[%s2569_s25 + $0x1838] sm:$0xff] %v912_v7  ;;  %v914_v9 = vld [vmem:[%s2560_s30 + $0x1848] sm:$0xff] }
 0x1bd   : > { %1937 = vst [vmem:[%s2569_s25 + $0x1840] sm:$0xff] %v913_v8  ;;  %v915_v10 = vld [vmem:[%s2560_s30 + $0x1850] sm:$0xff]  ;;  %v916_v11 = vld [vmem:[%s2560_s30 + $0x1858] sm:$0xff]  ;;  %1938 = vst [vmem:[%s2569_s25 + $0x1848] sm:$0xff] %v914_v9 }
 0x1be   : > { %1939 = vst [vmem:[%s2569_s25 + $0x1850] sm:$0xff] %v915_v10  ;;  %1940 = vst [vmem:[%s2569_s25 + $0x1858] sm:$0xff] %v916_v11  ;;  %v917_v12 = vld [vmem:[%s2560_s30 + $0x1860] sm:$0xff]  ;;  %v918_v13 = vld [vmem:[%s2560_s30 + $0x1868] sm:$0xff] }
 0x1bf   : > { %v919_v14 = vld [vmem:[%s2560_s30 + $0x1870] sm:$0xff]  ;;  %1941 = vst [vmem:[%s2569_s25 + $0x1860] sm:$0xff] %v917_v12  ;;  %1942 = vst [vmem:[%s2569_s25 + $0x1868] sm:$0xff] %v918_v13  ;;  %v920_v15 = vld [vmem:[%s2560_s30 + $0x1878] sm:$0xff] }
 0x1c0   : > { %1943 = vst [vmem:[%s2569_s25 + $0x1870] sm:$0xff] %v919_v14  ;;  %v921_v16 = vld [vmem:[%s2560_s30 + $0x1880] sm:$0xff]  ;;  %v922_v17 = vld [vmem:[%s2560_s30 + $0x1888] sm:$0xff]  ;;  %1944 = vst [vmem:[%s2569_s25 + $0x1878] sm:$0xff] %v920_v15 }
 0x1c1   : > { %1945 = vst [vmem:[%s2569_s25 + $0x1880] sm:$0xff] %v921_v16  ;;  %1946 = vst [vmem:[%s2569_s25 + $0x1888] sm:$0xff] %v922_v17  ;;  %v923_v18 = vld [vmem:[%s2560_s30 + $0x1890] sm:$0xff]  ;;  %v924_v19 = vld [vmem:[%s2560_s30 + $0x1898] sm:$0xff] }
 0x1c2   : > { %v925_v20 = vld [vmem:[%s2560_s30 + $0x18a0] sm:$0xff]  ;;  %1947 = vst [vmem:[%s2569_s25 + $0x1890] sm:$0xff] %v923_v18  ;;  %1948 = vst [vmem:[%s2569_s25 + $0x1898] sm:$0xff] %v924_v19  ;;  %v926_v21 = vld [vmem:[%s2560_s30 + $0x18a8] sm:$0xff] }
 0x1c3   : > { %1949 = vst [vmem:[%s2569_s25 + $0x18a0] sm:$0xff] %v925_v20  ;;  %v927_v22 = vld [vmem:[%s2560_s30 + $0x18b0] sm:$0xff]  ;;  %v928_v23 = vld [vmem:[%s2560_s30 + $0x18b8] sm:$0xff]  ;;  %1950 = vst [vmem:[%s2569_s25 + $0x18a8] sm:$0xff] %v926_v21 }
 0x1c4   : > { %1951 = vst [vmem:[%s2569_s25 + $0x18b0] sm:$0xff] %v927_v22  ;;  %1952 = vst [vmem:[%s2569_s25 + $0x18b8] sm:$0xff] %v928_v23  ;;  %v929_v24 = vld [vmem:[%s2560_s30 + $0x18c0] sm:$0xff]  ;;  %v930_v25 = vld [vmem:[%s2560_s30 + $0x18c8] sm:$0xff] }
 0x1c5   : > { %v931_v26 = vld [vmem:[%s2560_s30 + $0x18d0] sm:$0xff]  ;;  %1953 = vst [vmem:[%s2569_s25 + $0x18c0] sm:$0xff] %v929_v24  ;;  %1954 = vst [vmem:[%s2569_s25 + $0x18c8] sm:$0xff] %v930_v25  ;;  %v932_v27 = vld [vmem:[%s2560_s30 + $0x18d8] sm:$0xff] }
 0x1c6   : > { %1955 = vst [vmem:[%s2569_s25 + $0x18d0] sm:$0xff] %v931_v26  ;;  %v933_v28 = vld [vmem:[%s2560_s30 + $0x18e0] sm:$0xff]  ;;  %v934_v29 = vld [vmem:[%s2560_s30 + $0x18e8] sm:$0xff]  ;;  %1956 = vst [vmem:[%s2569_s25 + $0x18d8] sm:$0xff] %v932_v27 }
 0x1c7   : > { %1957 = vst [vmem:[%s2569_s25 + $0x18e0] sm:$0xff] %v933_v28  ;;  %1958 = vst [vmem:[%s2569_s25 + $0x18e8] sm:$0xff] %v934_v29  ;;  %v935_v30 = vld [vmem:[%s2560_s30 + $0x18f0] sm:$0xff]  ;;  %v936_v31 = vld [vmem:[%s2560_s30 + $0x18f8] sm:$0xff] }
 0x1c8   : > { %v937_v32 = vld [vmem:[%s2560_s30 + $0x1900] sm:$0xff]  ;;  %1959 = vst [vmem:[%s2569_s25 + $0x18f0] sm:$0xff] %v935_v30  ;;  %1960 = vst [vmem:[%s2569_s25 + $0x18f8] sm:$0xff] %v936_v31  ;;  %v938_v33 = vld [vmem:[%s2560_s30 + $0x1908] sm:$0xff] }
 0x1c9   : > { %1961 = vst [vmem:[%s2569_s25 + $0x1900] sm:$0xff] %v937_v32  ;;  %v939_v34 = vld [vmem:[%s2560_s30 + $0x1910] sm:$0xff]  ;;  %v940_v35 = vld [vmem:[%s2560_s30 + $0x1918] sm:$0xff]  ;;  %1962 = vst [vmem:[%s2569_s25 + $0x1908] sm:$0xff] %v938_v33 }
 0x1ca   : > { %1963 = vst [vmem:[%s2569_s25 + $0x1910] sm:$0xff] %v939_v34  ;;  %1964 = vst [vmem:[%s2569_s25 + $0x1918] sm:$0xff] %v940_v35  ;;  %v941_v36 = vld [vmem:[%s2560_s30 + $0x1920] sm:$0xff]  ;;  %v942_v37 = vld [vmem:[%s2560_s30 + $0x1928] sm:$0xff] }
 0x1cb   : > { %v943_v38 = vld [vmem:[%s2560_s30 + $0x1930] sm:$0xff]  ;;  %1965 = vst [vmem:[%s2569_s25 + $0x1920] sm:$0xff] %v941_v36  ;;  %1966 = vst [vmem:[%s2569_s25 + $0x1928] sm:$0xff] %v942_v37  ;;  %v944_v39 = vld [vmem:[%s2560_s30 + $0x1938] sm:$0xff] }
 0x1cc   : > { %1967 = vst [vmem:[%s2569_s25 + $0x1930] sm:$0xff] %v943_v38  ;;  %v945_v40 = vld [vmem:[%s2560_s30 + $0x1940] sm:$0xff]  ;;  %v946_v41 = vld [vmem:[%s2560_s30 + $0x1948] sm:$0xff]  ;;  %1968 = vst [vmem:[%s2569_s25 + $0x1938] sm:$0xff] %v944_v39 }
 0x1cd   : > { %1969 = vst [vmem:[%s2569_s25 + $0x1940] sm:$0xff] %v945_v40  ;;  %1970 = vst [vmem:[%s2569_s25 + $0x1948] sm:$0xff] %v946_v41  ;;  %v947_v42 = vld [vmem:[%s2560_s30 + $0x1950] sm:$0xff]  ;;  %v948_v43 = vld [vmem:[%s2560_s30 + $0x1958] sm:$0xff] }
 0x1ce   : > { %v949_v44 = vld [vmem:[%s2560_s30 + $0x1960] sm:$0xff]  ;;  %1971 = vst [vmem:[%s2569_s25 + $0x1950] sm:$0xff] %v947_v42  ;;  %1972 = vst [vmem:[%s2569_s25 + $0x1958] sm:$0xff] %v948_v43  ;;  %v950_v45 = vld [vmem:[%s2560_s30 + $0x1968] sm:$0xff] }
 0x1cf   : > { %1973 = vst [vmem:[%s2569_s25 + $0x1960] sm:$0xff] %v949_v44  ;;  %v951_v46 = vld [vmem:[%s2560_s30 + $0x1970] sm:$0xff]  ;;  %v952_v47 = vld [vmem:[%s2560_s30 + $0x1978] sm:$0xff]  ;;  %1974 = vst [vmem:[%s2569_s25 + $0x1968] sm:$0xff] %v950_v45 }
 0x1d0   : > { %1975 = vst [vmem:[%s2569_s25 + $0x1970] sm:$0xff] %v951_v46  ;;  %1976 = vst [vmem:[%s2569_s25 + $0x1978] sm:$0xff] %v952_v47  ;;  %v953_v48 = vld [vmem:[%s2560_s30 + $0x1980] sm:$0xff]  ;;  %v954_v49 = vld [vmem:[%s2560_s30 + $0x1988] sm:$0xff] }
 0x1d1   : > { %v955_v50 = vld [vmem:[%s2560_s30 + $0x1990] sm:$0xff]  ;;  %1977 = vst [vmem:[%s2569_s25 + $0x1980] sm:$0xff] %v953_v48  ;;  %1978 = vst [vmem:[%s2569_s25 + $0x1988] sm:$0xff] %v954_v49  ;;  %v956_v51 = vld [vmem:[%s2560_s30 + $0x1998] sm:$0xff] }
 0x1d2   : > { %1979 = vst [vmem:[%s2569_s25 + $0x1990] sm:$0xff] %v955_v50  ;;  %v957_v52 = vld [vmem:[%s2560_s30 + $0x19a0] sm:$0xff]  ;;  %v958_v53 = vld [vmem:[%s2560_s30 + $0x19a8] sm:$0xff]  ;;  %1980 = vst [vmem:[%s2569_s25 + $0x1998] sm:$0xff] %v956_v51 }
 0x1d3   : > { %1981 = vst [vmem:[%s2569_s25 + $0x19a0] sm:$0xff] %v957_v52  ;;  %1982 = vst [vmem:[%s2569_s25 + $0x19a8] sm:$0xff] %v958_v53  ;;  %v959_v54 = vld [vmem:[%s2560_s30 + $0x19b0] sm:$0xff]  ;;  %v960_v55 = vld [vmem:[%s2560_s30 + $0x19b8] sm:$0xff] }
 0x1d4   : > { %v961_v56 = vld [vmem:[%s2560_s30 + $0x19c0] sm:$0xff]  ;;  %1983 = vst [vmem:[%s2569_s25 + $0x19b0] sm:$0xff] %v959_v54  ;;  %1984 = vst [vmem:[%s2569_s25 + $0x19b8] sm:$0xff] %v960_v55  ;;  %v962_v57 = vld [vmem:[%s2560_s30 + $0x19c8] sm:$0xff] }
 0x1d5   : > { %1985 = vst [vmem:[%s2569_s25 + $0x19c0] sm:$0xff] %v961_v56  ;;  %v963_v58 = vld [vmem:[%s2560_s30 + $0x19d0] sm:$0xff]  ;;  %v964_v59 = vld [vmem:[%s2560_s30 + $0x19d8] sm:$0xff]  ;;  %1986 = vst [vmem:[%s2569_s25 + $0x19c8] sm:$0xff] %v962_v57 }
 0x1d6   : > { %1987 = vst [vmem:[%s2569_s25 + $0x19d0] sm:$0xff] %v963_v58  ;;  %1988 = vst [vmem:[%s2569_s25 + $0x19d8] sm:$0xff] %v964_v59  ;;  %v965_v60 = vld [vmem:[%s2560_s30 + $0x19e0] sm:$0xff]  ;;  %v966_v61 = vld [vmem:[%s2560_s30 + $0x19e8] sm:$0xff] }
 0x1d7   : > { %v967_v62 = vld [vmem:[%s2560_s30 + $0x19f0] sm:$0xff]  ;;  %1989 = vst [vmem:[%s2569_s25 + $0x19e0] sm:$0xff] %v965_v60  ;;  %1990 = vst [vmem:[%s2569_s25 + $0x19e8] sm:$0xff] %v966_v61  ;;  %v968_v63 = vld [vmem:[%s2560_s30 + $0x19f8] sm:$0xff] }
 0x1d8   : > { %1991 = vst [vmem:[%s2569_s25 + $0x19f0] sm:$0xff] %v967_v62  ;;  %v969_v0 = vld [vmem:[%s2560_s30 + $0x1a00] sm:$0xff]  ;;  %v970_v1 = vld [vmem:[%s2560_s30 + $0x1a08] sm:$0xff]  ;;  %1992 = vst [vmem:[%s2569_s25 + $0x19f8] sm:$0xff] %v968_v63 }
 0x1d9   : > { %1993 = vst [vmem:[%s2569_s25 + $0x1a00] sm:$0xff] %v969_v0  ;;  %1994 = vst [vmem:[%s2569_s25 + $0x1a08] sm:$0xff] %v970_v1  ;;  %v971_v2 = vld [vmem:[%s2560_s30 + $0x1a10] sm:$0xff]  ;;  %v972_v3 = vld [vmem:[%s2560_s30 + $0x1a18] sm:$0xff] }
 0x1da   : > { %v973_v4 = vld [vmem:[%s2560_s30 + $0x1a20] sm:$0xff]  ;;  %1995 = vst [vmem:[%s2569_s25 + $0x1a10] sm:$0xff] %v971_v2  ;;  %1996 = vst [vmem:[%s2569_s25 + $0x1a18] sm:$0xff] %v972_v3  ;;  %v974_v5 = vld [vmem:[%s2560_s30 + $0x1a28] sm:$0xff] }
 0x1db   : > { %1997 = vst [vmem:[%s2569_s25 + $0x1a20] sm:$0xff] %v973_v4  ;;  %v975_v6 = vld [vmem:[%s2560_s30 + $0x1a30] sm:$0xff]  ;;  %v976_v7 = vld [vmem:[%s2560_s30 + $0x1a38] sm:$0xff]  ;;  %1998 = vst [vmem:[%s2569_s25 + $0x1a28] sm:$0xff] %v974_v5 }
 0x1dc   : > { %1999 = vst [vmem:[%s2569_s25 + $0x1a30] sm:$0xff] %v975_v6  ;;  %2000 = vst [vmem:[%s2569_s25 + $0x1a38] sm:$0xff] %v976_v7  ;;  %v977_v8 = vld [vmem:[%s2560_s30 + $0x1a40] sm:$0xff]  ;;  %v978_v9 = vld [vmem:[%s2560_s30 + $0x1a48] sm:$0xff] }
 0x1dd   : > { %v979_v10 = vld [vmem:[%s2560_s30 + $0x1a50] sm:$0xff]  ;;  %2001 = vst [vmem:[%s2569_s25 + $0x1a40] sm:$0xff] %v977_v8  ;;  %2002 = vst [vmem:[%s2569_s25 + $0x1a48] sm:$0xff] %v978_v9  ;;  %v980_v11 = vld [vmem:[%s2560_s30 + $0x1a58] sm:$0xff] }
 0x1de   : > { %2003 = vst [vmem:[%s2569_s25 + $0x1a50] sm:$0xff] %v979_v10  ;;  %v981_v12 = vld [vmem:[%s2560_s30 + $0x1a60] sm:$0xff]  ;;  %v982_v13 = vld [vmem:[%s2560_s30 + $0x1a68] sm:$0xff]  ;;  %2004 = vst [vmem:[%s2569_s25 + $0x1a58] sm:$0xff] %v980_v11 }
 0x1df   : > { %2005 = vst [vmem:[%s2569_s25 + $0x1a60] sm:$0xff] %v981_v12  ;;  %2006 = vst [vmem:[%s2569_s25 + $0x1a68] sm:$0xff] %v982_v13  ;;  %v983_v14 = vld [vmem:[%s2560_s30 + $0x1a70] sm:$0xff]  ;;  %v984_v15 = vld [vmem:[%s2560_s30 + $0x1a78] sm:$0xff] }
 0x1e0   : > { %v985_v16 = vld [vmem:[%s2560_s30 + $0x1a80] sm:$0xff]  ;;  %2007 = vst [vmem:[%s2569_s25 + $0x1a70] sm:$0xff] %v983_v14  ;;  %2008 = vst [vmem:[%s2569_s25 + $0x1a78] sm:$0xff] %v984_v15  ;;  %v986_v17 = vld [vmem:[%s2560_s30 + $0x1a88] sm:$0xff] }
 0x1e1   : > { %2009 = vst [vmem:[%s2569_s25 + $0x1a80] sm:$0xff] %v985_v16  ;;  %v987_v18 = vld [vmem:[%s2560_s30 + $0x1a90] sm:$0xff]  ;;  %v988_v19 = vld [vmem:[%s2560_s30 + $0x1a98] sm:$0xff]  ;;  %2010 = vst [vmem:[%s2569_s25 + $0x1a88] sm:$0xff] %v986_v17 }
 0x1e2   : > { %2011 = vst [vmem:[%s2569_s25 + $0x1a90] sm:$0xff] %v987_v18  ;;  %2012 = vst [vmem:[%s2569_s25 + $0x1a98] sm:$0xff] %v988_v19  ;;  %v989_v20 = vld [vmem:[%s2560_s30 + $0x1aa0] sm:$0xff]  ;;  %v990_v21 = vld [vmem:[%s2560_s30 + $0x1aa8] sm:$0xff] }
 0x1e3   : > { %v991_v22 = vld [vmem:[%s2560_s30 + $0x1ab0] sm:$0xff]  ;;  %2013 = vst [vmem:[%s2569_s25 + $0x1aa0] sm:$0xff] %v989_v20  ;;  %2014 = vst [vmem:[%s2569_s25 + $0x1aa8] sm:$0xff] %v990_v21  ;;  %v992_v23 = vld [vmem:[%s2560_s30 + $0x1ab8] sm:$0xff] }
 0x1e4   : > { %2015 = vst [vmem:[%s2569_s25 + $0x1ab0] sm:$0xff] %v991_v22  ;;  %v993_v24 = vld [vmem:[%s2560_s30 + $0x1ac0] sm:$0xff]  ;;  %v994_v25 = vld [vmem:[%s2560_s30 + $0x1ac8] sm:$0xff]  ;;  %2016 = vst [vmem:[%s2569_s25 + $0x1ab8] sm:$0xff] %v992_v23 }
 0x1e5   : > { %2017 = vst [vmem:[%s2569_s25 + $0x1ac0] sm:$0xff] %v993_v24  ;;  %2018 = vst [vmem:[%s2569_s25 + $0x1ac8] sm:$0xff] %v994_v25  ;;  %v995_v26 = vld [vmem:[%s2560_s30 + $0x1ad0] sm:$0xff]  ;;  %v996_v27 = vld [vmem:[%s2560_s30 + $0x1ad8] sm:$0xff] }
 0x1e6   : > { %v997_v28 = vld [vmem:[%s2560_s30 + $0x1ae0] sm:$0xff]  ;;  %2019 = vst [vmem:[%s2569_s25 + $0x1ad0] sm:$0xff] %v995_v26  ;;  %2020 = vst [vmem:[%s2569_s25 + $0x1ad8] sm:$0xff] %v996_v27  ;;  %v998_v29 = vld [vmem:[%s2560_s30 + $0x1ae8] sm:$0xff] }
 0x1e7   : > { %2021 = vst [vmem:[%s2569_s25 + $0x1ae0] sm:$0xff] %v997_v28  ;;  %v999_v30 = vld [vmem:[%s2560_s30 + $0x1af0] sm:$0xff]  ;;  %v1000_v31 = vld [vmem:[%s2560_s30 + $0x1af8] sm:$0xff]  ;;  %2022 = vst [vmem:[%s2569_s25 + $0x1ae8] sm:$0xff] %v998_v29 }
 0x1e8   : > { %2023 = vst [vmem:[%s2569_s25 + $0x1af0] sm:$0xff] %v999_v30  ;;  %2024 = vst [vmem:[%s2569_s25 + $0x1af8] sm:$0xff] %v1000_v31  ;;  %v1001_v32 = vld [vmem:[%s2560_s30 + $0x1b00] sm:$0xff]  ;;  %v1002_v33 = vld [vmem:[%s2560_s30 + $0x1b08] sm:$0xff] }
 0x1e9   : > { %v1003_v34 = vld [vmem:[%s2560_s30 + $0x1b10] sm:$0xff]  ;;  %2025 = vst [vmem:[%s2569_s25 + $0x1b00] sm:$0xff] %v1001_v32  ;;  %2026 = vst [vmem:[%s2569_s25 + $0x1b08] sm:$0xff] %v1002_v33  ;;  %v1004_v35 = vld [vmem:[%s2560_s30 + $0x1b18] sm:$0xff] }
 0x1ea   : > { %2027 = vst [vmem:[%s2569_s25 + $0x1b10] sm:$0xff] %v1003_v34  ;;  %v1005_v36 = vld [vmem:[%s2560_s30 + $0x1b20] sm:$0xff]  ;;  %v1006_v37 = vld [vmem:[%s2560_s30 + $0x1b28] sm:$0xff]  ;;  %2028 = vst [vmem:[%s2569_s25 + $0x1b18] sm:$0xff] %v1004_v35 }
 0x1eb   : > { %2029 = vst [vmem:[%s2569_s25 + $0x1b20] sm:$0xff] %v1005_v36  ;;  %2030 = vst [vmem:[%s2569_s25 + $0x1b28] sm:$0xff] %v1006_v37  ;;  %v1007_v38 = vld [vmem:[%s2560_s30 + $0x1b30] sm:$0xff]  ;;  %v1008_v39 = vld [vmem:[%s2560_s30 + $0x1b38] sm:$0xff] }
 0x1ec   : > { %v1009_v40 = vld [vmem:[%s2560_s30 + $0x1b40] sm:$0xff]  ;;  %2031 = vst [vmem:[%s2569_s25 + $0x1b30] sm:$0xff] %v1007_v38  ;;  %2032 = vst [vmem:[%s2569_s25 + $0x1b38] sm:$0xff] %v1008_v39  ;;  %v1010_v41 = vld [vmem:[%s2560_s30 + $0x1b48] sm:$0xff] }
 0x1ed   : > { %2033 = vst [vmem:[%s2569_s25 + $0x1b40] sm:$0xff] %v1009_v40  ;;  %v1011_v42 = vld [vmem:[%s2560_s30 + $0x1b50] sm:$0xff]  ;;  %v1012_v43 = vld [vmem:[%s2560_s30 + $0x1b58] sm:$0xff]  ;;  %2034 = vst [vmem:[%s2569_s25 + $0x1b48] sm:$0xff] %v1010_v41 }
 0x1ee   : > { %2035 = vst [vmem:[%s2569_s25 + $0x1b50] sm:$0xff] %v1011_v42  ;;  %2036 = vst [vmem:[%s2569_s25 + $0x1b58] sm:$0xff] %v1012_v43  ;;  %v1013_v44 = vld [vmem:[%s2560_s30 + $0x1b60] sm:$0xff]  ;;  %v1014_v45 = vld [vmem:[%s2560_s30 + $0x1b68] sm:$0xff] }
 0x1ef   : > { %v1015_v46 = vld [vmem:[%s2560_s30 + $0x1b70] sm:$0xff]  ;;  %2037 = vst [vmem:[%s2569_s25 + $0x1b60] sm:$0xff] %v1013_v44  ;;  %2038 = vst [vmem:[%s2569_s25 + $0x1b68] sm:$0xff] %v1014_v45  ;;  %v1016_v47 = vld [vmem:[%s2560_s30 + $0x1b78] sm:$0xff] }
 0x1f0   : > { %2039 = vst [vmem:[%s2569_s25 + $0x1b70] sm:$0xff] %v1015_v46  ;;  %v1017_v48 = vld [vmem:[%s2560_s30 + $0x1b80] sm:$0xff]  ;;  %v1018_v49 = vld [vmem:[%s2560_s30 + $0x1b88] sm:$0xff]  ;;  %2040 = vst [vmem:[%s2569_s25 + $0x1b78] sm:$0xff] %v1016_v47 }
 0x1f1   : > { %2041 = vst [vmem:[%s2569_s25 + $0x1b80] sm:$0xff] %v1017_v48  ;;  %2042 = vst [vmem:[%s2569_s25 + $0x1b88] sm:$0xff] %v1018_v49  ;;  %v1019_v50 = vld [vmem:[%s2560_s30 + $0x1b90] sm:$0xff]  ;;  %v1020_v51 = vld [vmem:[%s2560_s30 + $0x1b98] sm:$0xff] }
 0x1f2   : > { %v1021_v52 = vld [vmem:[%s2560_s30 + $0x1ba0] sm:$0xff]  ;;  %2043 = vst [vmem:[%s2569_s25 + $0x1b90] sm:$0xff] %v1019_v50  ;;  %2044 = vst [vmem:[%s2569_s25 + $0x1b98] sm:$0xff] %v1020_v51  ;;  %v1022_v53 = vld [vmem:[%s2560_s30 + $0x1ba8] sm:$0xff] }
 0x1f3   : > { %2045 = vst [vmem:[%s2569_s25 + $0x1ba0] sm:$0xff] %v1021_v52  ;;  %v1023_v54 = vld [vmem:[%s2560_s30 + $0x1bb0] sm:$0xff]  ;;  %v1024_v55 = vld [vmem:[%s2560_s30 + $0x1bb8] sm:$0xff]  ;;  %2046 = vst [vmem:[%s2569_s25 + $0x1ba8] sm:$0xff] %v1022_v53 }
 0x1f4   : > { %2047 = vst [vmem:[%s2569_s25 + $0x1bb0] sm:$0xff] %v1023_v54  ;;  %2048 = vst [vmem:[%s2569_s25 + $0x1bb8] sm:$0xff] %v1024_v55  ;;  %v1025_v56 = vld [vmem:[%s2560_s30 + $0x1bc0] sm:$0xff]  ;;  %v1026_v57 = vld [vmem:[%s2560_s30 + $0x1bc8] sm:$0xff] }
 0x1f5   : > { %v1027_v58 = vld [vmem:[%s2560_s30 + $0x1bd0] sm:$0xff]  ;;  %2049 = vst [vmem:[%s2569_s25 + $0x1bc0] sm:$0xff] %v1025_v56  ;;  %2050 = vst [vmem:[%s2569_s25 + $0x1bc8] sm:$0xff] %v1026_v57  ;;  %v1028_v59 = vld [vmem:[%s2560_s30 + $0x1bd8] sm:$0xff] }
 0x1f6   : > { %2051 = vst [vmem:[%s2569_s25 + $0x1bd0] sm:$0xff] %v1027_v58  ;;  %v1029_v60 = vld [vmem:[%s2560_s30 + $0x1be0] sm:$0xff]  ;;  %v1030_v61 = vld [vmem:[%s2560_s30 + $0x1be8] sm:$0xff]  ;;  %2052 = vst [vmem:[%s2569_s25 + $0x1bd8] sm:$0xff] %v1028_v59 }
 0x1f7   : > { %2053 = vst [vmem:[%s2569_s25 + $0x1be0] sm:$0xff] %v1029_v60  ;;  %2054 = vst [vmem:[%s2569_s25 + $0x1be8] sm:$0xff] %v1030_v61  ;;  %v1031_v62 = vld [vmem:[%s2560_s30 + $0x1bf0] sm:$0xff]  ;;  %v1032_v63 = vld [vmem:[%s2560_s30 + $0x1bf8] sm:$0xff] }
 0x1f8   : > { %v1033_v0 = vld [vmem:[%s2560_s30 + $0x1c00] sm:$0xff]  ;;  %2055 = vst [vmem:[%s2569_s25 + $0x1bf0] sm:$0xff] %v1031_v62  ;;  %2056 = vst [vmem:[%s2569_s25 + $0x1bf8] sm:$0xff] %v1032_v63  ;;  %v1034_v1 = vld [vmem:[%s2560_s30 + $0x1c08] sm:$0xff] }
 0x1f9   : > { %2057 = vst [vmem:[%s2569_s25 + $0x1c00] sm:$0xff] %v1033_v0  ;;  %v1035_v2 = vld [vmem:[%s2560_s30 + $0x1c10] sm:$0xff]  ;;  %v1036_v3 = vld [vmem:[%s2560_s30 + $0x1c18] sm:$0xff]  ;;  %2058 = vst [vmem:[%s2569_s25 + $0x1c08] sm:$0xff] %v1034_v1 }
 0x1fa   : > { %2059 = vst [vmem:[%s2569_s25 + $0x1c10] sm:$0xff] %v1035_v2  ;;  %2060 = vst [vmem:[%s2569_s25 + $0x1c18] sm:$0xff] %v1036_v3  ;;  %v1037_v4 = vld [vmem:[%s2560_s30 + $0x1c20] sm:$0xff]  ;;  %v1038_v5 = vld [vmem:[%s2560_s30 + $0x1c28] sm:$0xff] }
 0x1fb   : > { %v1039_v6 = vld [vmem:[%s2560_s30 + $0x1c30] sm:$0xff]  ;;  %2061 = vst [vmem:[%s2569_s25 + $0x1c20] sm:$0xff] %v1037_v4  ;;  %2062 = vst [vmem:[%s2569_s25 + $0x1c28] sm:$0xff] %v1038_v5  ;;  %v1040_v7 = vld [vmem:[%s2560_s30 + $0x1c38] sm:$0xff] }
 0x1fc   : > { %2063 = vst [vmem:[%s2569_s25 + $0x1c30] sm:$0xff] %v1039_v6  ;;  %v1041_v8 = vld [vmem:[%s2560_s30 + $0x1c40] sm:$0xff]  ;;  %v1042_v9 = vld [vmem:[%s2560_s30 + $0x1c48] sm:$0xff]  ;;  %2064 = vst [vmem:[%s2569_s25 + $0x1c38] sm:$0xff] %v1040_v7 }
 0x1fd   : > { %2065 = vst [vmem:[%s2569_s25 + $0x1c40] sm:$0xff] %v1041_v8  ;;  %2066 = vst [vmem:[%s2569_s25 + $0x1c48] sm:$0xff] %v1042_v9  ;;  %v1043_v10 = vld [vmem:[%s2560_s30 + $0x1c50] sm:$0xff]  ;;  %v1044_v11 = vld [vmem:[%s2560_s30 + $0x1c58] sm:$0xff] }
 0x1fe   : > { %v1045_v12 = vld [vmem:[%s2560_s30 + $0x1c60] sm:$0xff]  ;;  %2067 = vst [vmem:[%s2569_s25 + $0x1c50] sm:$0xff] %v1043_v10  ;;  %2068 = vst [vmem:[%s2569_s25 + $0x1c58] sm:$0xff] %v1044_v11  ;;  %v1046_v13 = vld [vmem:[%s2560_s30 + $0x1c68] sm:$0xff] }
 0x1ff   : > { %2069 = vst [vmem:[%s2569_s25 + $0x1c60] sm:$0xff] %v1045_v12  ;;  %v1047_v14 = vld [vmem:[%s2560_s30 + $0x1c70] sm:$0xff]  ;;  %v1048_v15 = vld [vmem:[%s2560_s30 + $0x1c78] sm:$0xff]  ;;  %2070 = vst [vmem:[%s2569_s25 + $0x1c68] sm:$0xff] %v1046_v13 }
 0x200   : > { %2071 = vst [vmem:[%s2569_s25 + $0x1c70] sm:$0xff] %v1047_v14  ;;  %2072 = vst [vmem:[%s2569_s25 + $0x1c78] sm:$0xff] %v1048_v15  ;;  %v1049_v16 = vld [vmem:[%s2560_s30 + $0x1c80] sm:$0xff]  ;;  %v1050_v17 = vld [vmem:[%s2560_s30 + $0x1c88] sm:$0xff] }
 0x201   : > { %v1051_v18 = vld [vmem:[%s2560_s30 + $0x1c90] sm:$0xff]  ;;  %2073 = vst [vmem:[%s2569_s25 + $0x1c80] sm:$0xff] %v1049_v16  ;;  %2074 = vst [vmem:[%s2569_s25 + $0x1c88] sm:$0xff] %v1050_v17  ;;  %v1052_v19 = vld [vmem:[%s2560_s30 + $0x1c98] sm:$0xff] }
 0x202   : > { %2075 = vst [vmem:[%s2569_s25 + $0x1c90] sm:$0xff] %v1051_v18  ;;  %v1053_v20 = vld [vmem:[%s2560_s30 + $0x1ca0] sm:$0xff]  ;;  %v1054_v21 = vld [vmem:[%s2560_s30 + $0x1ca8] sm:$0xff]  ;;  %2076 = vst [vmem:[%s2569_s25 + $0x1c98] sm:$0xff] %v1052_v19 }
 0x203   : > { %2077 = vst [vmem:[%s2569_s25 + $0x1ca0] sm:$0xff] %v1053_v20  ;;  %2078 = vst [vmem:[%s2569_s25 + $0x1ca8] sm:$0xff] %v1054_v21  ;;  %v1055_v22 = vld [vmem:[%s2560_s30 + $0x1cb0] sm:$0xff]  ;;  %v1056_v23 = vld [vmem:[%s2560_s30 + $0x1cb8] sm:$0xff] }
 0x204   : > { %v1057_v24 = vld [vmem:[%s2560_s30 + $0x1cc0] sm:$0xff]  ;;  %2079 = vst [vmem:[%s2569_s25 + $0x1cb0] sm:$0xff] %v1055_v22  ;;  %2080 = vst [vmem:[%s2569_s25 + $0x1cb8] sm:$0xff] %v1056_v23  ;;  %v1058_v25 = vld [vmem:[%s2560_s30 + $0x1cc8] sm:$0xff] }
 0x205   : > { %2081 = vst [vmem:[%s2569_s25 + $0x1cc0] sm:$0xff] %v1057_v24  ;;  %v1059_v26 = vld [vmem:[%s2560_s30 + $0x1cd0] sm:$0xff]  ;;  %v1060_v27 = vld [vmem:[%s2560_s30 + $0x1cd8] sm:$0xff]  ;;  %2082 = vst [vmem:[%s2569_s25 + $0x1cc8] sm:$0xff] %v1058_v25 }
 0x206   : > { %2083 = vst [vmem:[%s2569_s25 + $0x1cd0] sm:$0xff] %v1059_v26  ;;  %2084 = vst [vmem:[%s2569_s25 + $0x1cd8] sm:$0xff] %v1060_v27  ;;  %v1061_v28 = vld [vmem:[%s2560_s30 + $0x1ce0] sm:$0xff]  ;;  %v1062_v29 = vld [vmem:[%s2560_s30 + $0x1ce8] sm:$0xff] }
 0x207   : > { %v1063_v30 = vld [vmem:[%s2560_s30 + $0x1cf0] sm:$0xff]  ;;  %2085 = vst [vmem:[%s2569_s25 + $0x1ce0] sm:$0xff] %v1061_v28  ;;  %2086 = vst [vmem:[%s2569_s25 + $0x1ce8] sm:$0xff] %v1062_v29  ;;  %v1064_v31 = vld [vmem:[%s2560_s30 + $0x1cf8] sm:$0xff] }
 0x208   : > { %2087 = vst [vmem:[%s2569_s25 + $0x1cf0] sm:$0xff] %v1063_v30  ;;  %v1065_v32 = vld [vmem:[%s2560_s30 + $0x1d00] sm:$0xff]  ;;  %v1066_v33 = vld [vmem:[%s2560_s30 + $0x1d08] sm:$0xff]  ;;  %2088 = vst [vmem:[%s2569_s25 + $0x1cf8] sm:$0xff] %v1064_v31 }
 0x209   : > { %2089 = vst [vmem:[%s2569_s25 + $0x1d00] sm:$0xff] %v1065_v32  ;;  %2090 = vst [vmem:[%s2569_s25 + $0x1d08] sm:$0xff] %v1066_v33  ;;  %v1067_v34 = vld [vmem:[%s2560_s30 + $0x1d10] sm:$0xff]  ;;  %v1068_v35 = vld [vmem:[%s2560_s30 + $0x1d18] sm:$0xff] }
 0x20a   : > { %v1069_v36 = vld [vmem:[%s2560_s30 + $0x1d20] sm:$0xff]  ;;  %2091 = vst [vmem:[%s2569_s25 + $0x1d10] sm:$0xff] %v1067_v34  ;;  %2092 = vst [vmem:[%s2569_s25 + $0x1d18] sm:$0xff] %v1068_v35  ;;  %v1070_v37 = vld [vmem:[%s2560_s30 + $0x1d28] sm:$0xff] }
 0x20b   : > { %2093 = vst [vmem:[%s2569_s25 + $0x1d20] sm:$0xff] %v1069_v36  ;;  %v1071_v38 = vld [vmem:[%s2560_s30 + $0x1d30] sm:$0xff]  ;;  %v1072_v39 = vld [vmem:[%s2560_s30 + $0x1d38] sm:$0xff]  ;;  %2094 = vst [vmem:[%s2569_s25 + $0x1d28] sm:$0xff] %v1070_v37 }
 0x20c   : > { %2095 = vst [vmem:[%s2569_s25 + $0x1d30] sm:$0xff] %v1071_v38  ;;  %2096 = vst [vmem:[%s2569_s25 + $0x1d38] sm:$0xff] %v1072_v39  ;;  %v1073_v40 = vld [vmem:[%s2560_s30 + $0x1d40] sm:$0xff]  ;;  %v1074_v41 = vld [vmem:[%s2560_s30 + $0x1d48] sm:$0xff] }
 0x20d   : > { %v1075_v42 = vld [vmem:[%s2560_s30 + $0x1d50] sm:$0xff]  ;;  %2097 = vst [vmem:[%s2569_s25 + $0x1d40] sm:$0xff] %v1073_v40  ;;  %2098 = vst [vmem:[%s2569_s25 + $0x1d48] sm:$0xff] %v1074_v41  ;;  %v1076_v43 = vld [vmem:[%s2560_s30 + $0x1d58] sm:$0xff] }
 0x20e   : > { %2099 = vst [vmem:[%s2569_s25 + $0x1d50] sm:$0xff] %v1075_v42  ;;  %v1077_v44 = vld [vmem:[%s2560_s30 + $0x1d60] sm:$0xff]  ;;  %v1078_v45 = vld [vmem:[%s2560_s30 + $0x1d68] sm:$0xff]  ;;  %2100 = vst [vmem:[%s2569_s25 + $0x1d58] sm:$0xff] %v1076_v43 }
 0x20f   : > { %2101 = vst [vmem:[%s2569_s25 + $0x1d60] sm:$0xff] %v1077_v44  ;;  %2102 = vst [vmem:[%s2569_s25 + $0x1d68] sm:$0xff] %v1078_v45  ;;  %v1079_v46 = vld [vmem:[%s2560_s30 + $0x1d70] sm:$0xff]  ;;  %v1080_v47 = vld [vmem:[%s2560_s30 + $0x1d78] sm:$0xff] }
 0x210   : > { %v1081_v48 = vld [vmem:[%s2560_s30 + $0x1d80] sm:$0xff]  ;;  %2103 = vst [vmem:[%s2569_s25 + $0x1d70] sm:$0xff] %v1079_v46  ;;  %2104 = vst [vmem:[%s2569_s25 + $0x1d78] sm:$0xff] %v1080_v47  ;;  %v1082_v49 = vld [vmem:[%s2560_s30 + $0x1d88] sm:$0xff] }
 0x211   : > { %2105 = vst [vmem:[%s2569_s25 + $0x1d80] sm:$0xff] %v1081_v48  ;;  %v1083_v50 = vld [vmem:[%s2560_s30 + $0x1d90] sm:$0xff]  ;;  %v1084_v51 = vld [vmem:[%s2560_s30 + $0x1d98] sm:$0xff]  ;;  %2106 = vst [vmem:[%s2569_s25 + $0x1d88] sm:$0xff] %v1082_v49 }
 0x212   : > { %2107 = vst [vmem:[%s2569_s25 + $0x1d90] sm:$0xff] %v1083_v50  ;;  %2108 = vst [vmem:[%s2569_s25 + $0x1d98] sm:$0xff] %v1084_v51  ;;  %v1085_v52 = vld [vmem:[%s2560_s30 + $0x1da0] sm:$0xff]  ;;  %v1086_v53 = vld [vmem:[%s2560_s30 + $0x1da8] sm:$0xff] }
 0x213   : > { %v1087_v54 = vld [vmem:[%s2560_s30 + $0x1db0] sm:$0xff]  ;;  %2109 = vst [vmem:[%s2569_s25 + $0x1da0] sm:$0xff] %v1085_v52  ;;  %2110 = vst [vmem:[%s2569_s25 + $0x1da8] sm:$0xff] %v1086_v53  ;;  %v1088_v55 = vld [vmem:[%s2560_s30 + $0x1db8] sm:$0xff] }
 0x214   : > { %2111 = vst [vmem:[%s2569_s25 + $0x1db0] sm:$0xff] %v1087_v54  ;;  %v1089_v56 = vld [vmem:[%s2560_s30 + $0x1dc0] sm:$0xff]  ;;  %v1090_v57 = vld [vmem:[%s2560_s30 + $0x1dc8] sm:$0xff]  ;;  %2112 = vst [vmem:[%s2569_s25 + $0x1db8] sm:$0xff] %v1088_v55 }
 0x215   : > { %2113 = vst [vmem:[%s2569_s25 + $0x1dc0] sm:$0xff] %v1089_v56  ;;  %2114 = vst [vmem:[%s2569_s25 + $0x1dc8] sm:$0xff] %v1090_v57  ;;  %v1091_v58 = vld [vmem:[%s2560_s30 + $0x1dd0] sm:$0xff]  ;;  %v1092_v59 = vld [vmem:[%s2560_s30 + $0x1dd8] sm:$0xff] }
 0x216   : > { %v1093_v60 = vld [vmem:[%s2560_s30 + $0x1de0] sm:$0xff]  ;;  %2115 = vst [vmem:[%s2569_s25 + $0x1dd0] sm:$0xff] %v1091_v58  ;;  %2116 = vst [vmem:[%s2569_s25 + $0x1dd8] sm:$0xff] %v1092_v59  ;;  %v1094_v61 = vld [vmem:[%s2560_s30 + $0x1de8] sm:$0xff] }
 0x217   : > { %2117 = vst [vmem:[%s2569_s25 + $0x1de0] sm:$0xff] %v1093_v60  ;;  %v1095_v62 = vld [vmem:[%s2560_s30 + $0x1df0] sm:$0xff]  ;;  %v1096_v63 = vld [vmem:[%s2560_s30 + $0x1df8] sm:$0xff]  ;;  %2118 = vst [vmem:[%s2569_s25 + $0x1de8] sm:$0xff] %v1094_v61 }
 0x218   : > { %2119 = vst [vmem:[%s2569_s25 + $0x1df0] sm:$0xff] %v1095_v62  ;;  %2120 = vst [vmem:[%s2569_s25 + $0x1df8] sm:$0xff] %v1096_v63  ;;  %v1097_v0 = vld [vmem:[%s2560_s30 + $0x1e00] sm:$0xff]  ;;  %v1098_v1 = vld [vmem:[%s2560_s30 + $0x1e08] sm:$0xff] }
 0x219   : > { %v1099_v2 = vld [vmem:[%s2560_s30 + $0x1e10] sm:$0xff]  ;;  %2121 = vst [vmem:[%s2569_s25 + $0x1e00] sm:$0xff] %v1097_v0  ;;  %2122 = vst [vmem:[%s2569_s25 + $0x1e08] sm:$0xff] %v1098_v1  ;;  %v1100_v3 = vld [vmem:[%s2560_s30 + $0x1e18] sm:$0xff] }
 0x21a   : > { %2123 = vst [vmem:[%s2569_s25 + $0x1e10] sm:$0xff] %v1099_v2  ;;  %v1101_v4 = vld [vmem:[%s2560_s30 + $0x1e20] sm:$0xff]  ;;  %v1102_v5 = vld [vmem:[%s2560_s30 + $0x1e28] sm:$0xff]  ;;  %2124 = vst [vmem:[%s2569_s25 + $0x1e18] sm:$0xff] %v1100_v3 }
 0x21b   : > { %2125 = vst [vmem:[%s2569_s25 + $0x1e20] sm:$0xff] %v1101_v4  ;;  %2126 = vst [vmem:[%s2569_s25 + $0x1e28] sm:$0xff] %v1102_v5  ;;  %v1103_v6 = vld [vmem:[%s2560_s30 + $0x1e30] sm:$0xff]  ;;  %v1104_v7 = vld [vmem:[%s2560_s30 + $0x1e38] sm:$0xff] }
 0x21c   : > { %v1105_v8 = vld [vmem:[%s2560_s30 + $0x1e40] sm:$0xff]  ;;  %2127 = vst [vmem:[%s2569_s25 + $0x1e30] sm:$0xff] %v1103_v6  ;;  %2128 = vst [vmem:[%s2569_s25 + $0x1e38] sm:$0xff] %v1104_v7  ;;  %v1106_v9 = vld [vmem:[%s2560_s30 + $0x1e48] sm:$0xff] }
 0x21d   : > { %2129 = vst [vmem:[%s2569_s25 + $0x1e40] sm:$0xff] %v1105_v8  ;;  %v1107_v10 = vld [vmem:[%s2560_s30 + $0x1e50] sm:$0xff]  ;;  %v1108_v11 = vld [vmem:[%s2560_s30 + $0x1e58] sm:$0xff]  ;;  %2130 = vst [vmem:[%s2569_s25 + $0x1e48] sm:$0xff] %v1106_v9 }
 0x21e   : > { %2131 = vst [vmem:[%s2569_s25 + $0x1e50] sm:$0xff] %v1107_v10  ;;  %2132 = vst [vmem:[%s2569_s25 + $0x1e58] sm:$0xff] %v1108_v11  ;;  %v1109_v12 = vld [vmem:[%s2560_s30 + $0x1e60] sm:$0xff]  ;;  %v1110_v13 = vld [vmem:[%s2560_s30 + $0x1e68] sm:$0xff] }
 0x21f   : > { %v1111_v14 = vld [vmem:[%s2560_s30 + $0x1e70] sm:$0xff]  ;;  %2133 = vst [vmem:[%s2569_s25 + $0x1e60] sm:$0xff] %v1109_v12  ;;  %2134 = vst [vmem:[%s2569_s25 + $0x1e68] sm:$0xff] %v1110_v13  ;;  %v1112_v15 = vld [vmem:[%s2560_s30 + $0x1e78] sm:$0xff] }
 0x220   : > { %2135 = vst [vmem:[%s2569_s25 + $0x1e70] sm:$0xff] %v1111_v14  ;;  %v1113_v16 = vld [vmem:[%s2560_s30 + $0x1e80] sm:$0xff]  ;;  %v1114_v17 = vld [vmem:[%s2560_s30 + $0x1e88] sm:$0xff]  ;;  %2136 = vst [vmem:[%s2569_s25 + $0x1e78] sm:$0xff] %v1112_v15 }
 0x221   : > { %2137 = vst [vmem:[%s2569_s25 + $0x1e80] sm:$0xff] %v1113_v16  ;;  %2138 = vst [vmem:[%s2569_s25 + $0x1e88] sm:$0xff] %v1114_v17  ;;  %v1115_v18 = vld [vmem:[%s2560_s30 + $0x1e90] sm:$0xff]  ;;  %v1116_v19 = vld [vmem:[%s2560_s30 + $0x1e98] sm:$0xff] }
 0x222   : > { %v1117_v20 = vld [vmem:[%s2560_s30 + $0x1ea0] sm:$0xff]  ;;  %2139 = vst [vmem:[%s2569_s25 + $0x1e90] sm:$0xff] %v1115_v18  ;;  %2140 = vst [vmem:[%s2569_s25 + $0x1e98] sm:$0xff] %v1116_v19  ;;  %v1118_v21 = vld [vmem:[%s2560_s30 + $0x1ea8] sm:$0xff] }
 0x223   : > { %2141 = vst [vmem:[%s2569_s25 + $0x1ea0] sm:$0xff] %v1117_v20  ;;  %v1119_v22 = vld [vmem:[%s2560_s30 + $0x1eb0] sm:$0xff]  ;;  %v1120_v23 = vld [vmem:[%s2560_s30 + $0x1eb8] sm:$0xff]  ;;  %2142 = vst [vmem:[%s2569_s25 + $0x1ea8] sm:$0xff] %v1118_v21 }
 0x224   : > { %2143 = vst [vmem:[%s2569_s25 + $0x1eb0] sm:$0xff] %v1119_v22  ;;  %2144 = vst [vmem:[%s2569_s25 + $0x1eb8] sm:$0xff] %v1120_v23  ;;  %v1121_v24 = vld [vmem:[%s2560_s30 + $0x1ec0] sm:$0xff]  ;;  %v1122_v25 = vld [vmem:[%s2560_s30 + $0x1ec8] sm:$0xff] }
 0x225   : > { %v1123_v26 = vld [vmem:[%s2560_s30 + $0x1ed0] sm:$0xff]  ;;  %2145 = vst [vmem:[%s2569_s25 + $0x1ec0] sm:$0xff] %v1121_v24  ;;  %2146 = vst [vmem:[%s2569_s25 + $0x1ec8] sm:$0xff] %v1122_v25  ;;  %v1124_v27 = vld [vmem:[%s2560_s30 + $0x1ed8] sm:$0xff] }
 0x226   : > { %2147 = vst [vmem:[%s2569_s25 + $0x1ed0] sm:$0xff] %v1123_v26  ;;  %v1125_v28 = vld [vmem:[%s2560_s30 + $0x1ee0] sm:$0xff]  ;;  %v1126_v29 = vld [vmem:[%s2560_s30 + $0x1ee8] sm:$0xff]  ;;  %2148 = vst [vmem:[%s2569_s25 + $0x1ed8] sm:$0xff] %v1124_v27 }
 0x227   : > { %2149 = vst [vmem:[%s2569_s25 + $0x1ee0] sm:$0xff] %v1125_v28  ;;  %2150 = vst [vmem:[%s2569_s25 + $0x1ee8] sm:$0xff] %v1126_v29  ;;  %v1127_v30 = vld [vmem:[%s2560_s30 + $0x1ef0] sm:$0xff]  ;;  %v1128_v31 = vld [vmem:[%s2560_s30 + $0x1ef8] sm:$0xff] }
 0x228   : > { %v1129_v32 = vld [vmem:[%s2560_s30 + $0x1f00] sm:$0xff]  ;;  %2151 = vst [vmem:[%s2569_s25 + $0x1ef0] sm:$0xff] %v1127_v30  ;;  %2152 = vst [vmem:[%s2569_s25 + $0x1ef8] sm:$0xff] %v1128_v31  ;;  %v1130_v33 = vld [vmem:[%s2560_s30 + $0x1f08] sm:$0xff] }
 0x229   : > { %2153 = vst [vmem:[%s2569_s25 + $0x1f00] sm:$0xff] %v1129_v32  ;;  %v1131_v34 = vld [vmem:[%s2560_s30 + $0x1f10] sm:$0xff]  ;;  %v1132_v35 = vld [vmem:[%s2560_s30 + $0x1f18] sm:$0xff]  ;;  %2154 = vst [vmem:[%s2569_s25 + $0x1f08] sm:$0xff] %v1130_v33 }
 0x22a   : > { %2155 = vst [vmem:[%s2569_s25 + $0x1f10] sm:$0xff] %v1131_v34  ;;  %2156 = vst [vmem:[%s2569_s25 + $0x1f18] sm:$0xff] %v1132_v35  ;;  %v1133_v36 = vld [vmem:[%s2560_s30 + $0x1f20] sm:$0xff]  ;;  %v1134_v37 = vld [vmem:[%s2560_s30 + $0x1f28] sm:$0xff] }
 0x22b   : > { %v1135_v38 = vld [vmem:[%s2560_s30 + $0x1f30] sm:$0xff]  ;;  %2157 = vst [vmem:[%s2569_s25 + $0x1f20] sm:$0xff] %v1133_v36  ;;  %2158 = vst [vmem:[%s2569_s25 + $0x1f28] sm:$0xff] %v1134_v37  ;;  %v1136_v39 = vld [vmem:[%s2560_s30 + $0x1f38] sm:$0xff] }
 0x22c   : > { %2159 = vst [vmem:[%s2569_s25 + $0x1f30] sm:$0xff] %v1135_v38  ;;  %v1137_v40 = vld [vmem:[%s2560_s30 + $0x1f40] sm:$0xff]  ;;  %v1138_v41 = vld [vmem:[%s2560_s30 + $0x1f48] sm:$0xff]  ;;  %2160 = vst [vmem:[%s2569_s25 + $0x1f38] sm:$0xff] %v1136_v39 }
 0x22d   : > { %2161 = vst [vmem:[%s2569_s25 + $0x1f40] sm:$0xff] %v1137_v40  ;;  %2162 = vst [vmem:[%s2569_s25 + $0x1f48] sm:$0xff] %v1138_v41  ;;  %v1139_v42 = vld [vmem:[%s2560_s30 + $0x1f50] sm:$0xff]  ;;  %v1140_v43 = vld [vmem:[%s2560_s30 + $0x1f58] sm:$0xff] }
 0x22e   : > { %v1141_v44 = vld [vmem:[%s2560_s30 + $0x1f60] sm:$0xff]  ;;  %2163 = vst [vmem:[%s2569_s25 + $0x1f50] sm:$0xff] %v1139_v42  ;;  %2164 = vst [vmem:[%s2569_s25 + $0x1f58] sm:$0xff] %v1140_v43  ;;  %v1142_v45 = vld [vmem:[%s2560_s30 + $0x1f68] sm:$0xff] }
 0x22f   : > { %2165 = vst [vmem:[%s2569_s25 + $0x1f60] sm:$0xff] %v1141_v44  ;;  %v1143_v46 = vld [vmem:[%s2560_s30 + $0x1f70] sm:$0xff]  ;;  %v1144_v47 = vld [vmem:[%s2560_s30 + $0x1f78] sm:$0xff]  ;;  %2166 = vst [vmem:[%s2569_s25 + $0x1f68] sm:$0xff] %v1142_v45 }
 0x230   : > { %2167 = vst [vmem:[%s2569_s25 + $0x1f70] sm:$0xff] %v1143_v46  ;;  %2168 = vst [vmem:[%s2569_s25 + $0x1f78] sm:$0xff] %v1144_v47  ;;  %v1145_v48 = vld [vmem:[%s2560_s30 + $0x1f80] sm:$0xff]  ;;  %v1146_v49 = vld [vmem:[%s2560_s30 + $0x1f88] sm:$0xff] }
 0x231   : > { %v1147_v50 = vld [vmem:[%s2560_s30 + $0x1f90] sm:$0xff]  ;;  %2169 = vst [vmem:[%s2569_s25 + $0x1f80] sm:$0xff] %v1145_v48  ;;  %2170 = vst [vmem:[%s2569_s25 + $0x1f88] sm:$0xff] %v1146_v49  ;;  %v1148_v51 = vld [vmem:[%s2560_s30 + $0x1f98] sm:$0xff] }
 0x232   : > { %2171 = vst [vmem:[%s2569_s25 + $0x1f90] sm:$0xff] %v1147_v50  ;;  %v1149_v52 = vld [vmem:[%s2560_s30 + $0x1fa0] sm:$0xff]  ;;  %v1150_v53 = vld [vmem:[%s2560_s30 + $0x1fa8] sm:$0xff]  ;;  %2172 = vst [vmem:[%s2569_s25 + $0x1f98] sm:$0xff] %v1148_v51 }
 0x233   : > { %2173 = vst [vmem:[%s2569_s25 + $0x1fa0] sm:$0xff] %v1149_v52  ;;  %2174 = vst [vmem:[%s2569_s25 + $0x1fa8] sm:$0xff] %v1150_v53  ;;  %v1151_v54 = vld [vmem:[%s2560_s30 + $0x1fb0] sm:$0xff]  ;;  %v1152_v55 = vld [vmem:[%s2560_s30 + $0x1fb8] sm:$0xff] }
 0x234   : > { %v1153_v56 = vld [vmem:[%s2560_s30 + $0x1fc0] sm:$0xff]  ;;  %2175 = vst [vmem:[%s2569_s25 + $0x1fb0] sm:$0xff] %v1151_v54  ;;  %2176 = vst [vmem:[%s2569_s25 + $0x1fb8] sm:$0xff] %v1152_v55  ;;  %v1154_v57 = vld [vmem:[%s2560_s30 + $0x1fc8] sm:$0xff] }
 0x235   : > { %2177 = vst [vmem:[%s2569_s25 + $0x1fc0] sm:$0xff] %v1153_v56  ;;  %v1155_v58 = vld [vmem:[%s2560_s30 + $0x1fd0] sm:$0xff]  ;;  %v1156_v59 = vld [vmem:[%s2560_s30 + $0x1fd8] sm:$0xff]  ;;  %2178 = vst [vmem:[%s2569_s25 + $0x1fc8] sm:$0xff] %v1154_v57 }
 0x236   : > { %2179 = vst [vmem:[%s2569_s25 + $0x1fd0] sm:$0xff] %v1155_v58  ;;  %2180 = vst [vmem:[%s2569_s25 + $0x1fd8] sm:$0xff] %v1156_v59  ;;  %v1157_v60 = vld [vmem:[%s2560_s30 + $0x1fe0] sm:$0xff]  ;;  %v1158_v61 = vld [vmem:[%s2560_s30 + $0x1fe8] sm:$0xff] }
 0x237   : > { %v1159_v62 = vld [vmem:[%s2560_s30 + $0x1ff0] sm:$0xff]  ;;  %2181 = vst [vmem:[%s2569_s25 + $0x1fe0] sm:$0xff] %v1157_v60  ;;  %2182 = vst [vmem:[%s2569_s25 + $0x1fe8] sm:$0xff] %v1158_v61  ;;  %v1160_v63 = vld [vmem:[%s2560_s30 + $0x1ff8] sm:$0xff] }
 0x238   : > { %2183 = vst [vmem:[%s2569_s25 + $0x1ff0] sm:$0xff] %v1159_v62  ;;  %2184 = vst [vmem:[%s2569_s25 + $0x1ff8] sm:$0xff] %v1160_v63 }
 0x239   : > { %2381 = shalt.err (!%p2378_p2)
}
 0x23a   : > { %s2382_s13 = scalar_lea.hbm %s4610_s29, 131072  ;;  %s2386_s20 = scalar_lea.hbm %s4668_s1, 262144 }
 0x23b   : > { %p2383_p4 = scmp.ne.s32.totalorder %s4610_s29, %s2382_s13  ;;  %p2387_p9 = scmp.lt.u32.totalorder %s4610_s29, %s4668_s1 }
 0x23c   : > { %p2388_p1 = scmp.lt.u32.totalorder %s2386_s20, %s2382_s13  ;;  %p2390_p6 = scmp.lt.u32.totalorder %s2382_s13, %s4610_s29 }
 0x23d   : > { %p2384_p5 = pnand %p2383_p4, %p4675_p11 }
 0x23e   : > { %p2389_p3 = por %p2388_p1, %p2387_p9 }
 0x23f   : > { %p2385_p7 = pneg %p2384_p5 }
 0x240   : > { %p2391_p12 = por %p2390_p6, %p2389_p3 }
 0x242   : > { %p2392_p13 = pnand %p2391_p12, %p2385_p7 }
 0x244   : > { %2395 = shalt.err (!%p2392_p13)
}
 0x245   : > { %s2440_s24 = smov 128   ;;  %s2441_s26 = smov 8  }
 0x246   : > { %2290 = dma.vmem_to_hbm [thread:$0]  (%p4675_p11), %s4612_s27, 131072, %s4610_s29, %s2186_s2, %s2440_s24, %s2440_s24, %s2441_s26  }
 0x247 PF: > { %s2214_s30 = sand.u32 1, %s2422_s6   ;;  %p4676_p8 = scmp.ne.s32.totalorder %s4673_s19, 0 }
 0x248   : > { %p4677_p10 = scmp.ge.s32.totalorder %s2434_s9, 2  ;;  %s2215_s25 = scalar_lea.sflag [#allocation4], %s2214_s30 }
 0x24a   : > { %p2297_p0 = pnand %p4677_p10, %p4676_p8 }
 0x24c   : > { %2417 = dma.done.wait (!%p2297_p0), %s2215_s25, 131072  }
 0x24d   : > { %2419 = vsyncadd (!%p2297_p0), %s2215_s25, 4294836224  ;;  %p14_p2 = scmp.ge.s32.totalorder %s2477_s12, 4   ;;  %s4678_s6 = smov %s2426_s7 }
 0x24e   : > { %s4679_s7 = smov %s2430_s8  ;;  %s4680_s8 = smov %s2489_s15 }
 0x24f   : > { %s4681_s9 = smov %s2477_s12  ;;  %16 = sbr.rel (!%p14_p2) target bundleno = 5 (0x5), region = 69 }
 0x256   :  { %2220 = vsyncpa [#allocation3], 1 }
 0x257   :  { %2222 = vsyncpa [#allocation3 + $0x1], 1 }
 0x258   :  { %2223 = vsyncpa [#allocation4], 1 }
 0x259   :  { %2225 = vsyncpa [#allocation4 + $0x1], 1 }

</bundles_post_ra>
